<compile_context>
chip_gen: v5e
topology: v5e:2x2
jax: 0.10.0
libtpu: 0.0.40
codegen_flags: <defaults>
</compile_context>

<pallas_src>
import functools
import numpy as np

import jax
import jax.numpy as jnp
from jax.experimental import pallas as pl
from jax.experimental.pallas import tpu as pltpu


# ---------------------------------------------------------------------------
# Kernel A: hoisted x-path ChebConv over ALL timesteps (grid over batch).
#   x is presented node-major as (B, N, T*Cin) so the Chebyshev recurrence is a
#   chain of plain 2-D (N, N) @ (N, T*Cin) matmuls, and the weight contraction
#   is one (N*T, K*Cin) @ (K*Cin, 4H) matmul.
# ---------------------------------------------------------------------------
def _xconv_kernel(k_order, seq_len, x_ref, lap_ref, wx_ref, bx_ref, o_ref):
    n = x_ref.shape[1]
    tc = x_ref.shape[2]
    t = seq_len
    c = tc // t
    out_dim = wx_ref.shape[1]

    lap = lap_ref[0]                      # (N, N)  scaled Laplacian
    z0 = x_ref[0]                         # (N, T*C)

    zs = [z0]
    if k_order > 1:
        zs.append(jnp.dot(lap, z0, preferred_element_type=jnp.float32))
    for _ in range(2, k_order):
        zs.append(2.0 * jnp.dot(lap, zs[-1], preferred_element_type=jnp.float32)
                  - zs[-2])

    # [Z0 | Z1 | ... | Z_{K-1}] along the feature axis -> single MXU matmul.
    zcat = jnp.concatenate([z.reshape(n, t, c) for z in zs], axis=-1)  # (N,T,K*C)
    zflat = zcat.reshape(n * t, k_order * c)                           # (N*T,K*C)
    out = jnp.dot(zflat, wx_ref[...],
                  preferred_element_type=jnp.float32) + bx_ref[0]      # (N*T,4H)
    o_ref[0] = out.reshape(n, t, out_dim)


def _xconv_pallas(x_nm, lap, wx_flat, bx, *, k_order, seq_len):
    B, N, TC = x_nm.shape
    out_dim = wx_flat.shape[1]
    T = seq_len
    return pl.pallas_call(
        functools.partial(_xconv_kernel, k_order, T),
        grid=(B,),
        in_specs=[
            pl.BlockSpec((1, N, TC), lambda b: (b, 0, 0)),       # x[b] node-major
            pl.BlockSpec((1, N, N), lambda b: (b, 0, 0)),        # L_hat[b]
            pl.BlockSpec(wx_flat.shape, lambda b: (0, 0)),       # Wx (K*C, 4H)
            pl.BlockSpec(bx.shape, lambda b: (0, 0)),            # bias x (1, 4H)
        ],
        out_specs=pl.BlockSpec((1, N, T, out_dim), lambda b: (b, 0, 0, 0)),
        out_shape=jax.ShapeDtypeStruct((B, N, T, out_dim), jnp.float32),
        compiler_params=pltpu.CompilerParams(
            dimension_semantics=("parallel",)),
    )(x_nm, lap, wx_flat, bx)


# ---------------------------------------------------------------------------
# Kernel B: fused recurrence over time for the whole batch.
#   grid=(T,) "arbitrary"; h/c live in VMEM scratch across steps; the layer
#   output (T, B, N, H) is VMEM-resident and written back to HBM once.
# ---------------------------------------------------------------------------
def _recurrent_kernel(k_order, hidden_dim, xconv_ref, lap_ref, wh_ref, bh_ref,
                      out_ref, c_last_ref, h_st, c_st):
    t = pl.program_id(0)
    H = hidden_dim

    @pl.when(t == 0)
    def _():
        h_st[...] = jnp.zeros_like(h_st)   # init_hidden: zeros
        c_st[...] = jnp.zeros_like(c_st)

    lap = lap_ref[...]                     # (B, N, N)
    h = h_st[...]                          # (B, N, H)
    c = c_st[...]                          # (B, N, H)
    b, n = h.shape[0], h.shape[1]

    # Chebyshev basis of h (batched graph matmuls), concat on feature axis.
    zs = [h]
    if k_order > 1:
        zs.append(jnp.einsum('bnm,bmh->bnh', lap, h,
                             preferred_element_type=jnp.float32))
    for _ in range(2, k_order):
        zs.append(2.0 * jnp.einsum('bnm,bmh->bnh', lap, zs[-1],
                                   preferred_element_type=jnp.float32) - zs[-2])
    zcat = jnp.concatenate(zs, axis=-1)                          # (B, N, K*H)
    zflat = zcat.reshape(b * n, k_order * H)                     # stack B*N rows
    h_conv = jnp.dot(zflat, wh_ref[...],
                     preferred_element_type=jnp.float32).reshape(b, n, 4 * H)

    combined = xconv_ref[0] + h_conv + bh_ref[0]                 # (B, N, 4H)

    # lane-dense activation: sigmoid on i/f/o lanes, tanh on g lanes.
    lane = jax.lax.broadcasted_iota(jnp.int32, combined.shape, 2)
    act = jnp.where(lane < 3 * H, jax.nn.sigmoid(combined), jnp.tanh(combined))
    i_g = act[..., 0 * H:1 * H]
    f_g = act[..., 1 * H:2 * H]
    o_g = act[..., 2 * H:3 * H]
    g_g = act[..., 3 * H:4 * H]

    c_next = f_g * c + i_g * g_g
    h_next = o_g * jnp.tanh(c_next)

    h_st[...] = h_next
    c_st[...] = c_next
    out_ref[t] = h_next                    # VMEM-resident output slab

    @pl.when(t == pl.num_programs(0) - 1)
    def _():
        c_last_ref[...] = c_next


def _recurrent_pallas(xconv_t, lap, wh_flat, bh, *, k_order, hidden_dim):
    T, B, N, H4 = xconv_t.shape
    H = hidden_dim
    out_shape = (jax.ShapeDtypeStruct((T, B, N, H), jnp.float32),
                 jax.ShapeDtypeStruct((B, N, H), jnp.float32))
    return pl.pallas_call(
        functools.partial(_recurrent_kernel, k_order, H),
        grid=(T,),
        in_specs=[
            pl.BlockSpec((1, B, N, H4), lambda t: (t, 0, 0, 0)),   # x_conv at t
            pl.BlockSpec((B, N, N), lambda t: (0, 0, 0)),          # L_hat (resident)
            pl.BlockSpec(wh_flat.shape, lambda t: (0, 0)),         # Wh (resident)
            pl.BlockSpec(bh.shape, lambda t: (0, 0)),              # bias h
        ],
        out_specs=(
            pl.BlockSpec((T, B, N, H), lambda t: (0, 0, 0, 0)),    # full seq output
            pl.BlockSpec((B, N, H), lambda t: (0, 0, 0)),          # final cell state
        ),
        out_shape=out_shape,
        scratch_shapes=[pltpu.VMEM((B, N, H), jnp.float32),        # h state
                        pltpu.VMEM((B, N, H), jnp.float32)],       # c state
        compiler_params=pltpu.CompilerParams(
            dimension_semantics=("arbitrary",)),
    )(xconv_t, lap, wh_flat, bh)


# ---------------------------------------------------------------------------
# chebLSTM forward (plain-JAX glue around the two kernels).
# ---------------------------------------------------------------------------
def cheb_lstm_forward(x_seq, lap, params, hidden_dims, batch_first=False,
                      return_all_layers=False):
    """x_seq: (T, B, N, C) if not batch_first else (B, T, N, C); lap: (B, N, N)."""
    if not batch_first:
        x_seq = jnp.transpose(x_seq, (1, 0, 2, 3))     # -> (B, T, N, C)
    B, T, N, _ = x_seq.shape

    layer_outputs, last_states = [], []
    cur = x_seq
    for layer_idx, (wx, wh, bx, bh) in enumerate(params):
        K, Cin, H4 = wx.shape
        H = hidden_dims[layer_idx]
        assert H4 == 4 * H

        # Hoisted x-path ChebConv for all timesteps (non-recurrent).
        x_nm = jnp.transpose(cur, (0, 2, 1, 3)).reshape(B, N, T * Cin)
        wx_flat = wx.reshape(K * Cin, 4 * H)
        xconv_nm = _xconv_pallas(x_nm, lap, wx_flat, bx, k_order=K, seq_len=T)
        xconv_t = jnp.transpose(xconv_nm, (2, 0, 1, 3))          # (T, B, N, 4H)

        # Fused-time recurrent kernel.
        wh_flat = wh.reshape(K * H, 4 * H)
        out_t, c_last = _recurrent_pallas(xconv_t, lap, wh_flat, bh,
                                          k_order=K, hidden_dim=H)
        layer_out = jnp.transpose(out_t, (1, 0, 2, 3))           # (B, T, N, H)
        h_last = layer_out[:, -1]

        cur = layer_out
        layer_outputs.append(layer_out)
        last_states.append((h_last, c_last))

    if not return_all_layers:
        layer_outputs = layer_outputs[-1:]
        last_states = last_states[-1:]
    return layer_outputs, last_states


# ---------------------------------------------------------------------------
# Pure-JAX reference (correctness check of the PyTorch semantics).
# ---------------------------------------------------------------------------
def _cheb_conv_ref(x, lap, w, b):
    K = w.shape[0]
    zs = [x]
    if K > 1:
        zs.append(lap @ x)
    for _ in range(2, K):
        zs.append(2.0 * (lap @ zs[-1]) - zs[-2])
    out = b[0]
    for k in range(K):
        out = out + zs[k] @ w[k]
    return out


def _forward_ref(x_seq, lap, params, hidden_dims, batch_first=False):
    if not batch_first:
        x_seq = jnp.transpose(x_seq, (1, 0, 2, 3))
    B, T, N, _ = x_seq.shape
    cur_input = x_seq
    for layer_idx, (wx, wh, bx, bh) in enumerate(params):
        H = hidden_dims[layer_idx]
        h = jnp.zeros((B, N, H), jnp.float32)
        c = jnp.zeros((B, N, H), jnp.float32)
        outs = []
        for t in range(T):
            combined = []
            for i in range(B):
                xc = _cheb_conv_ref(cur_input[i, t], lap[i], wx, bx)
                hc = _cheb_conv_ref(h[i], lap[i], wh, bh)
                combined.append(xc + hc)
            combined = jnp.stack(combined, 0)
            cc_i, cc_f, cc_o, cc_g = jnp.split(combined, 4, axis=2)
            i_g = jax.nn.sigmoid(cc_i)
            f_g = jax.nn.sigmoid(cc_f)
            o_g = jax.nn.sigmoid(cc_o)
            g_g = jnp.tanh(cc_g)
            c = f_g * c + i_g * g_g
            h = o_g * jnp.tanh(c)
            outs.append(h)
        cur_input = jnp.stack(outs, 1)
    return cur_input, (h, c)


# ---------------------------------------------------------------------------
# Parameter / input construction.
# ---------------------------------------------------------------------------
def build_scaled_laplacian(adj):
    """Dense scaled Laplacian L_hat = 2 L / lambda_max - I  (lambda_max = 2)."""
    N = adj.shape[-1]
    deg = adj.sum(-1)
    d_is = jnp.where(deg > 0, 1.0 / jnp.sqrt(deg), 0.0)
    lap = jnp.eye(N) - d_is[..., :, None] * adj * d_is[..., None, :]
    return lap - jnp.eye(N)               # 2L/2 - I


def init_params(key, input_dim, hidden_dims, kernel_sizes):
    params = []
    cur_in = input_dim
    for H, K in zip(hidden_dims, kernel_sizes):
        k1, k2, k3, k4, key = jax.random.split(key, 5)
        sx = float(np.sqrt(2.0 / (cur_in + 4 * H)))
        sh = float(np.sqrt(2.0 / (H + 4 * H)))
        wx = sx * jax.random.normal(k1, (K, cur_in, 4 * H), jnp.float32)
        wh = sh * jax.random.normal(k2, (K, H, 4 * H), jnp.float32)
        bx = 0.01 * jax.random.normal(k3, (1, 4 * H), jnp.float32)
        bh = 0.01 * jax.random.normal(k4, (1, 4 * H), jnp.float32)
        params.append((wx, wh, bx, bh))
        cur_in = H
    return params


if __name__ == "__main__":
    # Small shapes consistent with the module: node count N == input_dim.
    T, B = 8, 2
    input_dim = 16                 # N nodes == feature width of first-layer input
    hidden_dims = (32, 32)
    kernel_sizes = (3, 3)

    key = jax.random.PRNGKey(0)
    kx, ka, kp = jax.random.split(key, 3)

    # x: (T, B, N, C) with batch_first=False  (PyTorch (t, b, h, w))
    x = jax.random.normal(kx, (T, B, input_dim, input_dim), jnp.float32)
    # per-sample symmetric non-negative adjacency -> dense scaled Laplacian
    a = jax.random.uniform(ka, (B, input_dim, input_dim), jnp.float32)
    adj = 0.5 * (a + jnp.transpose(a, (0, 2, 1)))
    lap = build_scaled_laplacian(adj)

    params = init_params(kp, input_dim, hidden_dims, kernel_sizes)

    fwd = jax.jit(functools.partial(cheb_lstm_forward, hidden_dims=hidden_dims))
    layer_output_list, last_state_list = fwd(x, lap, params)

    out = jax.block_until_ready(layer_output_list[0])        # (B, T, N, H_last)
    h_last = jax.block_until_ready(last_state_list[0][0])
    c_last = jax.block_until_ready(last_state_list[0][1])

    # Correctness check against a pure-JAX reference of the PyTorch semantics.
    ref_fwd = jax.jit(functools.partial(_forward_ref, hidden_dims=hidden_dims))
    out_ref, (h_ref, c_ref) = ref_fwd(x, lap, params)
    np.testing.assert_allclose(np.asarray(out), np.asarray(out_ref),
                               rtol=1e-4, atol=1e-4)
    np.testing.assert_allclose(np.asarray(h_last), np.asarray(h_ref),
                               rtol=1e-4, atol=1e-4)
    np.testing.assert_allclose(np.asarray(c_last), np.asarray(c_ref),
                               rtol=1e-4, atol=1e-4)

    print("KERNEL_OK")
</pallas_src>

<mosaic_0001>
module attributes {stable_mosaic.version = 11 : i64} {
  func.func @_xconv_kernel(%arg0: i32, %arg1: memref<1x16x128xf32, #tpu.memory_space<vmem>>, %arg2: memref<1x16x16xf32, #tpu.memory_space<vmem>>, %arg3: memref<48x128xf32, #tpu.memory_space<vmem>>, %arg4: memref<1x128xf32, #tpu.memory_space<vmem>>, %arg5: memref<1x16x8x128xf32, #tpu.memory_space<vmem>>) attributes {dimension_semantics = [#tpu.dimension_semantics<parallel>], iteration_bounds = array<i64: 2>, scalar_prefetch = 0 : i64, scratch_operands = 0 : i64, tpu.core_type = #tpu.core_type<tc>, window_params = [{transform_indices = @transform_0, window_bounds = array<i64: 1, 16, 128>}, {transform_indices = @transform_1, window_bounds = array<i64: 1, 16, 16>}, {pipeline_mode = #tpu.pipeline_mode<synchronous>, transform_indices = @transform_2, window_bounds = array<i64: 48, 128>}, {pipeline_mode = #tpu.pipeline_mode<synchronous>, transform_indices = @transform_3, window_bounds = array<i64: 1, 128>}, {transform_indices = @transform_4, window_bounds = array<i64: 1, 16, 8, 128>}]} {
    %c0 = arith.constant 0 : index
    %c0_0 = arith.constant 0 : index
    %c0_1 = arith.constant 0 : index
    %0 = vector.load %arg2[%c0, %c0_0, %c0_1] : memref<1x16x16xf32, #tpu.memory_space<vmem>>, vector<1x16x16xf32>
    %1 = vector.shape_cast %0 : vector<1x16x16xf32> to vector<16x16xf32>
    %c0_2 = arith.constant 0 : index
    %c0_3 = arith.constant 0 : index
    %c0_4 = arith.constant 0 : index
    %2 = vector.load %arg1[%c0_2, %c0_3, %c0_4] : memref<1x16x128xf32, #tpu.memory_space<vmem>>, vector<1x16x128xf32>
    %3 = vector.shape_cast %2 : vector<1x16x128xf32> to vector<16x128xf32>
    %cst = arith.constant dense<0.000000e+00> : vector<16x128xf32>
    %4 = tpu.matmul %1, %3, %cst {dimension_numbers = #tpu.dot_dimension_numbers<[1], [0], [0], [1], [0, 0, 1, 1], [], []>} : vector<16x16xf32>, vector<16x128xf32>, vector<16x128xf32> -> vector<16x128xf32>
    %cst_5 = arith.constant dense<0.000000e+00> : vector<16x128xf32>
    %5 = tpu.matmul %1, %4, %cst_5 {dimension_numbers = #tpu.dot_dimension_numbers<[1], [0], [0], [1], [0, 0, 1, 1], [], []>} : vector<16x16xf32>, vector<16x128xf32>, vector<16x128xf32> -> vector<16x128xf32>
    %cst_6 = arith.constant 2.000000e+00 : f32
    %6 = vector.broadcast %cst_6 : f32 to vector<16x128xf32>
    %7 = arith.mulf %6, %5 : vector<16x128xf32>
    %8 = arith.subf %7, %3 : vector<16x128xf32>
    %9 = vector.shape_cast %3 : vector<16x128xf32> to vector<16x8x16xf32>
    %10 = vector.shape_cast %4 : vector<16x128xf32> to vector<16x8x16xf32>
    %11 = vector.shape_cast %8 : vector<16x128xf32> to vector<16x8x16xf32>
    %12 = tpu.concatenate %9, %10, %11 in 2 : vector<16x8x16xf32>, vector<16x8x16xf32>, vector<16x8x16xf32> -> vector<16x8x48xf32>
    %13 = vector.shape_cast %12 : vector<16x8x48xf32> to vector<128x48xf32>
    %c0_7 = arith.constant 0 : index
    %c0_8 = arith.constant 0 : index
    %14 = vector.load %arg3[%c0_7, %c0_8] : memref<48x128xf32, #tpu.memory_space<vmem>>, vector<48x128xf32>
    %cst_9 = arith.constant dense<0.000000e+00> : vector<128x128xf32>
    %15 = tpu.matmul %13, %14, %cst_9 {dimension_numbers = #tpu.dot_dimension_numbers<[1], [0], [0], [1], [0, 0, 1, 1], [], []>} : vector<128x48xf32>, vector<48x128xf32>, vector<128x128xf32> -> vector<128x128xf32>
    %c0_10 = arith.constant 0 : index
    %c0_11 = arith.constant 0 : index
    %16 = vector.load %arg4[%c0_10, %c0_11] : memref<1x128xf32, #tpu.memory_space<vmem>>, vector<1x128xf32>
    %17 = vector.shape_cast %16 : vector<1x128xf32> to vector<128xf32>
    %18 = vector.shape_cast %17 : vector<128xf32> to vector<1x128xf32>
    %19 = vector.broadcast %18 : vector<1x128xf32> to vector<128x128xf32>
    %20 = arith.addf %15, %19 : vector<128x128xf32>
    %21 = vector.shape_cast %20 : vector<128x128xf32> to vector<16x8x128xf32>
    %c0_12 = arith.constant 0 : index
    %c0_13 = arith.constant 0 : index
    %c0_14 = arith.constant 0 : index
    %c0_15 = arith.constant 0 : index
    %22 = vector.load %arg5[%c0_12, %c0_13, %c0_14, %c0_15] : memref<1x16x8x128xf32, #tpu.memory_space<vmem>>, vector<1x16x8x128xf32>
    %23 = vector.shape_cast %22 : vector<1x16x8x128xf32> to vector<16x8x128xf32>
    %24 = vector.shape_cast %21 : vector<16x8x128xf32> to vector<1x16x8x128xf32>
    tpu.vector_store %arg5[%c0_12, %c0_13, %c0_14, %c0_15], %24 {strides = array<i32>} : memref<1x16x8x128xf32, #tpu.memory_space<vmem>>, vector<1x16x8x128xf32>,
    return
  }
  func.func @transform_0(%arg0: i32) -> (i32, i32, i32) {
    %c0_i32 = arith.constant 0 : i32
    %c0_i32_0 = arith.constant 0 : i32
    %c0_i32_1 = arith.constant 0 : i32
    return %arg0, %c0_i32, %c0_i32_0 : i32, i32, i32
  }
  func.func @transform_1(%arg0: i32) -> (i32, i32, i32) {
    %c0_i32 = arith.constant 0 : i32
    %c0_i32_0 = arith.constant 0 : i32
    %c0_i32_1 = arith.constant 0 : i32
    return %arg0, %c0_i32, %c0_i32_0 : i32, i32, i32
  }
  func.func @transform_2(%arg0: i32) -> (i32, i32) {
    %c0_i32 = arith.constant 0 : i32
    %c0_i32_0 = arith.constant 0 : i32
    %c0_i32_1 = arith.constant 0 : i32
    return %c0_i32, %c0_i32_0 : i32, i32
  }
  func.func @transform_3(%arg0: i32) -> (i32, i32) {
    %c0_i32 = arith.constant 0 : i32
    %c0_i32_0 = arith.constant 0 : i32
    %c0_i32_1 = arith.constant 0 : i32
    return %c0_i32, %c0_i32_0 : i32, i32
  }
  func.func @transform_4(%arg0: i32) -> (i32, i32, i32, i32) {
    %c0_i32 = arith.constant 0 : i32
    %c0_i32_0 = arith.constant 0 : i32
    %c0_i32_1 = arith.constant 0 : i32
    %c0_i32_2 = arith.constant 0 : i32
    return %arg0, %c0_i32, %c0_i32_0, %c0_i32_1 : i32, i32, i32, i32
  }
}

module attributes {stable_mosaic.version = 11 : i64} {
  func.func @_recurrent_kernel(%arg0: i32, %arg1: memref<1x2x16x128xf32, #tpu.memory_space<vmem>>, %arg2: memref<2x16x16xf32, #tpu.memory_space<vmem>>, %arg3: memref<96x128xf32, #tpu.memory_space<vmem>>, %arg4: memref<1x128xf32, #tpu.memory_space<vmem>>, %arg5: memref<8x2x16x32xf32, #tpu.memory_space<vmem>>, %arg6: memref<2x16x32xf32, #tpu.memory_space<vmem>>, %arg7: memref<2x16x32xf32, #tpu.memory_space<vmem>>, %arg8: memref<2x16x32xf32, #tpu.memory_space<vmem>>) attributes {dimension_semantics = [#tpu.dimension_semantics<arbitrary>], iteration_bounds = array<i64: 8>, scalar_prefetch = 0 : i64, scratch_operands = 2 : i64, tpu.core_type = #tpu.core_type<tc>, window_params = [{transform_indices = @transform_0, window_bounds = array<i64: 1, 2, 16, 128>}, {pipeline_mode = #tpu.pipeline_mode<synchronous>, transform_indices = @transform_1, window_bounds = array<i64: 2, 16, 16>}, {pipeline_mode = #tpu.pipeline_mode<synchronous>, transform_indices = @transform_2, window_bounds = array<i64: 96, 128>}, {pipeline_mode = #tpu.pipeline_mode<synchronous>, transform_indices = @transform_3, window_bounds = array<i64: 1, 128>}, {pipeline_mode = #tpu.pipeline_mode<synchronous>, transform_indices = @transform_4, window_bounds = array<i64: 8, 2, 16, 32>}, {pipeline_mode = #tpu.pipeline_mode<synchronous>, transform_indices = @transform_5, window_bounds = array<i64: 2, 16, 32>}]} {
    %c0_i32 = arith.constant 0 : i32
    %0 = arith.cmpi eq, %arg0, %c0_i32 : i32
    %1 = arith.extui %0 : i1 to i32
    %c0_i32_0 = arith.constant 0 : i32
    %2 = arith.cmpi ne, %1, %c0_i32_0 : i32
    scf.if %2 {
      %cst_31 = arith.constant 0.000000e+00 : f32
      %52 = vector.broadcast %cst_31 : f32 to vector<2x16x32xf32>
      %c0_32 = arith.constant 0 : index
      %c0_33 = arith.constant 0 : index
      %c0_34 = arith.constant 0 : index
      %53 = vector.load %arg7[%c0_32, %c0_33, %c0_34] : memref<2x16x32xf32, #tpu.memory_space<vmem>>, vector<2x16x32xf32>
      tpu.vector_store %arg7[%c0_32, %c0_33, %c0_34], %52 {strides = array<i32>} : memref<2x16x32xf32, #tpu.memory_space<vmem>>, vector<2x16x32xf32>,
      %cst_35 = arith.constant 0.000000e+00 : f32
      %54 = vector.broadcast %cst_35 : f32 to vector<2x16x32xf32>
      %c0_36 = arith.constant 0 : index
      %c0_37 = arith.constant 0 : index
      %c0_38 = arith.constant 0 : index
      %55 = vector.load %arg8[%c0_36, %c0_37, %c0_38] : memref<2x16x32xf32, #tpu.memory_space<vmem>>, vector<2x16x32xf32>
      tpu.vector_store %arg8[%c0_36, %c0_37, %c0_38], %54 {strides = array<i32>} : memref<2x16x32xf32, #tpu.memory_space<vmem>>, vector<2x16x32xf32>,
    } else {
    }
    %c0 = arith.constant 0 : index
    %c0_1 = arith.constant 0 : index
    %c0_2 = arith.constant 0 : index
    %3 = vector.load %arg2[%c0, %c0_1, %c0_2] : memref<2x16x16xf32, #tpu.memory_space<vmem>>, vector<2x16x16xf32>
    %c0_3 = arith.constant 0 : index
    %c0_4 = arith.constant 0 : index
    %c0_5 = arith.constant 0 : index
    %4 = vector.load %arg7[%c0_3, %c0_4, %c0_5] : memref<2x16x32xf32, #tpu.memory_space<vmem>>, vector<2x16x32xf32>
    %c0_6 = arith.constant 0 : index
    %c0_7 = arith.constant 0 : index
    %c0_8 = arith.constant 0 : index
    %5 = vector.load %arg8[%c0_6, %c0_7, %c0_8] : memref<2x16x32xf32, #tpu.memory_space<vmem>>, vector<2x16x32xf32>
    "tpu.trace_start"() <{level = 10 : i32, message = "bnm,bmh->bnh"}> : () -> ()
    %cst = arith.constant dense<0.000000e+00> : vector<2x16x32xf32>
    %6 = tpu.matmul %3, %4, %cst {dimension_numbers = #tpu.dot_dimension_numbers<[2], [1], [1], [2], [0, 0, 0, 1, 1, 2], [0], [0]>} : vector<2x16x16xf32>, vector<2x16x32xf32>, vector<2x16x32xf32> -> vector<2x16x32xf32>
    %cst_9 = arith.constant dense<0.000000e+00> : vector<2x16x32xf32>
    %7 = tpu.matmul %3, %6, %cst_9 {dimension_numbers = #tpu.dot_dimension_numbers<[2], [1], [1], [2], [0, 0, 0, 1, 1, 2], [0], [0]>} : vector<2x16x16xf32>, vector<2x16x32xf32>, vector<2x16x32xf32> -> vector<2x16x32xf32>
    "tpu.trace_stop"() : () -> ()
    %cst_10 = arith.constant 2.000000e+00 : f32
    %8 = vector.broadcast %cst_10 : f32 to vector<2x16x32xf32>
    %9 = arith.mulf %8, %7 : vector<2x16x32xf32>
    %10 = arith.subf %9, %4 : vector<2x16x32xf32>
    %11 = tpu.concatenate %4, %6, %10 in 2 : vector<2x16x32xf32>, vector<2x16x32xf32>, vector<2x16x32xf32> -> vector<2x16x96xf32>
    %12 = vector.shape_cast %11 : vector<2x16x96xf32> to vector<32x96xf32>
    %c0_11 = arith.constant 0 : index
    %c0_12 = arith.constant 0 : index
    %13 = vector.load %arg3[%c0_11, %c0_12] : memref<96x128xf32, #tpu.memory_space<vmem>>, vector<96x128xf32>
    %cst_13 = arith.constant dense<0.000000e+00> : vector<32x128xf32>
    %14 = tpu.matmul %12, %13, %cst_13 {dimension_numbers = #tpu.dot_dimension_numbers<[1], [0], [0], [1], [0, 0, 1, 1], [], []>} : vector<32x96xf32>, vector<96x128xf32>, vector<32x128xf32> -> vector<32x128xf32>
    %15 = vector.shape_cast %14 : vector<32x128xf32> to vector<2x16x128xf32>
    %c0_14 = arith.constant 0 : index
    %c0_15 = arith.constant 0 : index
    %c0_16 = arith.constant 0 : index
    %c0_17 = arith.constant 0 : index
    %16 = vector.load %arg1[%c0_14, %c0_15, %c0_16, %c0_17] : memref<1x2x16x128xf32, #tpu.memory_space<vmem>>, vector<1x2x16x128xf32>
    %17 = vector.shape_cast %16 : vector<1x2x16x128xf32> to vector<2x16x128xf32>
    %18 = arith.addf %17, %15 : vector<2x16x128xf32>
    %c0_18 = arith.constant 0 : index
    %c0_19 = arith.constant 0 : index
    %19 = vector.load %arg4[%c0_18, %c0_19] : memref<1x128xf32, #tpu.memory_space<vmem>>, vector<1x128xf32>
    %20 = vector.shape_cast %19 : vector<1x128xf32> to vector<128xf32>
    %21 = vector.shape_cast %20 : vector<128xf32> to vector<1x1x128xf32>
    %22 = vector.broadcast %21 : vector<1x1x128xf32> to vector<2x16x128xf32>
    %23 = arith.addf %18, %22 : vector<2x16x128xf32>
    %24 = tpu.iota {dimensions = array<i32: 2>} : vector<2x16x128xi32>
    %c96_i32 = arith.constant 96 : i32
    %25 = vector.broadcast %c96_i32 : i32 to vector<2x16x128xi32>
    %26 = arith.cmpi slt, %24, %25 : vector<2x16x128xi32>
    %27 = arith.negf %23 : vector<2x16x128xf32>
    %28 = math.exp %27 : vector<2x16x128xf32>
    %cst_20 = arith.constant 1.000000e+00 : f32
    %29 = vector.broadcast %cst_20 : f32 to vector<2x16x128xf32>
    %30 = arith.addf %29, %28 : vector<2x16x128xf32>
    %31 = arith.divf %29, %30 : vector<2x16x128xf32>
    %32 = math.tanh %23 : vector<2x16x128xf32>
    %33 = arith.select %26, %31, %32 : vector<2x16x128xi1>, vector<2x16x128xf32>
    %34 = vector.extract_strided_slice %33 {offsets = [0, 0, 0], sizes = [2, 16, 32], strides = [1, 1, 1]} : vector<2x16x128xf32> to vector<2x16x32xf32>
    %35 = vector.extract_strided_slice %33 {offsets = [0, 0, 32], sizes = [2, 16, 32], strides = [1, 1, 1]} : vector<2x16x128xf32> to vector<2x16x32xf32>
    %36 = vector.extract_strided_slice %33 {offsets = [0, 0, 64], sizes = [2, 16, 32], strides = [1, 1, 1]} : vector<2x16x128xf32> to vector<2x16x32xf32>
    %37 = vector.extract_strided_slice %33 {offsets = [0, 0, 96], sizes = [2, 16, 32], strides = [1, 1, 1]} : vector<2x16x128xf32> to vector<2x16x32xf32>
    %38 = arith.mulf %35, %5 : vector<2x16x32xf32>
    %39 = arith.mulf %34, %37 : vector<2x16x32xf32>
    %40 = arith.addf %38, %39 : vector<2x16x32xf32>
    %41 = math.tanh %40 : vector<2x16x32xf32>
    %42 = arith.mulf %36, %41 : vector<2x16x32xf32>
    %c0_21 = arith.constant 0 : index
    %c0_22 = arith.constant 0 : index
    %c0_23 = arith.constant 0 : index
    %43 = vector.load %arg7[%c0_21, %c0_22, %c0_23] : memref<2x16x32xf32, #tpu.memory_space<vmem>>, vector<2x16x32xf32>
    tpu.vector_store %arg7[%c0_21, %c0_22, %c0_23], %42 {strides = array<i32>} : memref<2x16x32xf32, #tpu.memory_space<vmem>>, vector<2x16x32xf32>,
    %c0_24 = arith.constant 0 : index
    %c0_25 = arith.constant 0 : index
    %c0_26 = arith.constant 0 : index
    %44 = vector.load %arg8[%c0_24, %c0_25, %c0_26] : memref<2x16x32xf32, #tpu.memory_space<vmem>>, vector<2x16x32xf32>
    tpu.vector_store %arg8[%c0_24, %c0_25, %c0_26], %40 {strides = array<i32>} : memref<2x16x32xf32, #tpu.memory_space<vmem>>, vector<2x16x32xf32>,
    %45 = arith.index_cast %arg0 : i32 to index
    %c0_27 = arith.constant 0 : index
    %c0_28 = arith.constant 0 : index
    %c0_29 = arith.constant 0 : index
    %46 = vector.load %arg5[%45, %c0_27, %c0_28, %c0_29] : memref<8x2x16x32xf32, #tpu.memory_space<vmem>>, vector<1x2x16x32xf32>
    %47 = vector.shape_cast %46 : vector<1x2x16x32xf32> to vector<2x16x32xf32>
    %48 = vector.shape_cast %42 : vector<2x16x32xf32> to vector<1x2x16x32xf32>
    tpu.vector_store %arg5[%45, %c0_27, %c0_28, %c0_29], %48 {strides = array<i32>} : memref<8x2x16x32xf32, #tpu.memory_space<vmem>>, vector<1x2x16x32xf32>,
    %c7_i32 = arith.constant 7 : i32
    %49 = arith.cmpi eq, %arg0, %c7_i32 : i32
    %50 = arith.extui %49 : i1 to i32
    %c0_i32_30 = arith.constant 0 : i32
    %51 = arith.cmpi ne, %50, %c0_i32_30 : i32
    scf.if %51 {
      %c0_31 = arith.constant 0 : index
      %c0_32 = arith.constant 0 : index
      %c0_33 = arith.constant 0 : index
      %52 = vector.load %arg6[%c0_31, %c0_32, %c0_33] : memref<2x16x32xf32, #tpu.memory_space<vmem>>, vector<2x16x32xf32>
      tpu.vector_store %arg6[%c0_31, %c0_32, %c0_33], %40 {strides = array<i32>} : memref<2x16x32xf32, #tpu.memory_space<vmem>>, vector<2x16x32xf32>,
    } else {
    }
    return
  }
  func.func @transform_0(%arg0: i32) -> (i32, i32, i32, i32) {
    %c0_i32 = arith.constant 0 : i32
    %c0_i32_0 = arith.constant 0 : i32
    %c0_i32_1 = arith.constant 0 : i32
    %c0_i32_2 = arith.constant 0 : i32
    return %arg0, %c0_i32, %c0_i32_0, %c0_i32_1 : i32, i32, i32, i32
  }
  func.func @transform_1(%arg0: i32) -> (i32, i32, i32) {
    %c0_i32 = arith.constant 0 : i32
    %c0_i32_0 = arith.constant 0 : i32
    %c0_i32_1 = arith.constant 0 : i32
    %c0_i32_2 = arith.constant 0 : i32
    return %c0_i32, %c0_i32_0, %c0_i32_1 : i32, i32, i32
  }
  func.func @transform_2(%arg0: i32) -> (i32, i32) {
    %c0_i32 = arith.constant 0 : i32
    %c0_i32_0 = arith.constant 0 : i32
    %c0_i32_1 = arith.constant 0 : i32
    return %c0_i32, %c0_i32_0 : i32, i32
  }
  func.func @transform_3(%arg0: i32) -> (i32, i32) {
    %c0_i32 = arith.constant 0 : i32
    %c0_i32_0 = arith.constant 0 : i32
    %c0_i32_1 = arith.constant 0 : i32
    return %c0_i32, %c0_i32_0 : i32, i32
  }
  func.func @transform_4(%arg0: i32) -> (i32, i32, i32, i32) {
    %c0_i32 = arith.constant 0 : i32
    %c0_i32_0 = arith.constant 0 : i32
    %c0_i32_1 = arith.constant 0 : i32
    %c0_i32_2 = arith.constant 0 : i32
    %c0_i32_3 = arith.constant 0 : i32
    return %c0_i32, %c0_i32_0, %c0_i32_1, %c0_i32_2 : i32, i32, i32, i32
  }
  func.func @transform_5(%arg0: i32) -> (i32, i32, i32) {
    %c0_i32 = arith.constant 0 : i32
    %c0_i32_0 = arith.constant 0 : i32
    %c0_i32_1 = arith.constant 0 : i32
    %c0_i32_2 = arith.constant 0 : i32
    return %c0_i32, %c0_i32_0, %c0_i32_1 : i32, i32, i32
  }
}

module attributes {stable_mosaic.version = 11 : i64} {
  func.func @_xconv_kernel(%arg0: i32, %arg1: memref<1x16x256xf32, #tpu.memory_space<vmem>>, %arg2: memref<1x16x16xf32, #tpu.memory_space<vmem>>, %arg3: memref<96x128xf32, #tpu.memory_space<vmem>>, %arg4: memref<1x128xf32, #tpu.memory_space<vmem>>, %arg5: memref<1x16x8x128xf32, #tpu.memory_space<vmem>>) attributes {dimension_semantics = [#tpu.dimension_semantics<parallel>], iteration_bounds = array<i64: 2>, scalar_prefetch = 0 : i64, scratch_operands = 0 : i64, tpu.core_type = #tpu.core_type<tc>, window_params = [{transform_indices = @transform_0, window_bounds = array<i64: 1, 16, 256>}, {transform_indices = @transform_1, window_bounds = array<i64: 1, 16, 16>}, {pipeline_mode = #tpu.pipeline_mode<synchronous>, transform_indices = @transform_2, window_bounds = array<i64: 96, 128>}, {pipeline_mode = #tpu.pipeline_mode<synchronous>, transform_indices = @transform_3, window_bounds = array<i64: 1, 128>}, {transform_indices = @transform_4, window_bounds = array<i64: 1, 16, 8, 128>}]} {
    %c0 = arith.constant 0 : index
    %c0_0 = arith.constant 0 : index
    %c0_1 = arith.constant 0 : index
    %0 = vector.load %arg2[%c0, %c0_0, %c0_1] : memref<1x16x16xf32, #tpu.memory_space<vmem>>, vector<1x16x16xf32>
    %1 = vector.shape_cast %0 : vector<1x16x16xf32> to vector<16x16xf32>
    %c0_2 = arith.constant 0 : index
    %c0_3 = arith.constant 0 : index
    %c0_4 = arith.constant 0 : index
    %2 = vector.load %arg1[%c0_2, %c0_3, %c0_4] : memref<1x16x256xf32, #tpu.memory_space<vmem>>, vector<1x16x256xf32>
    %3 = vector.shape_cast %2 : vector<1x16x256xf32> to vector<16x256xf32>
    %cst = arith.constant dense<0.000000e+00> : vector<16x256xf32>
    %4 = tpu.matmul %1, %3, %cst {dimension_numbers = #tpu.dot_dimension_numbers<[1], [0], [0], [1], [0, 0, 1, 1], [], []>} : vector<16x16xf32>, vector<16x256xf32>, vector<16x256xf32> -> vector<16x256xf32>
    %cst_5 = arith.constant dense<0.000000e+00> : vector<16x256xf32>
    %5 = tpu.matmul %1, %4, %cst_5 {dimension_numbers = #tpu.dot_dimension_numbers<[1], [0], [0], [1], [0, 0, 1, 1], [], []>} : vector<16x16xf32>, vector<16x256xf32>, vector<16x256xf32> -> vector<16x256xf32>
    %cst_6 = arith.constant 2.000000e+00 : f32
    %6 = vector.broadcast %cst_6 : f32 to vector<16x256xf32>
    %7 = arith.mulf %6, %5 : vector<16x256xf32>
    %8 = arith.subf %7, %3 : vector<16x256xf32>
    %9 = vector.shape_cast %3 : vector<16x256xf32> to vector<16x8x32xf32>
    %10 = vector.shape_cast %4 : vector<16x256xf32> to vector<16x8x32xf32>
    %11 = vector.shape_cast %8 : vector<16x256xf32> to vector<16x8x32xf32>
    %12 = tpu.concatenate %9, %10, %11 in 2 : vector<16x8x32xf32>, vector<16x8x32xf32>, vector<16x8x32xf32> -> vector<16x8x96xf32>
    %13 = vector.shape_cast %12 : vector<16x8x96xf32> to vector<128x96xf32>
    %c0_7 = arith.constant 0 : index
    %c0_8 = arith.constant 0 : index
    %14 = vector.load %arg3[%c0_7, %c0_8] : memref<96x128xf32, #tpu.memory_space<vmem>>, vector<96x128xf32>
    %cst_9 = arith.constant dense<0.000000e+00> : vector<128x128xf32>
    %15 = tpu.matmul %13, %14, %cst_9 {dimension_numbers = #tpu.dot_dimension_numbers<[1], [0], [0], [1], [0, 0, 1, 1], [], []>} : vector<128x96xf32>, vector<96x128xf32>, vector<128x128xf32> -> vector<128x128xf32>
    %c0_10 = arith.constant 0 : index
    %c0_11 = arith.constant 0 : index
    %16 = vector.load %arg4[%c0_10, %c0_11] : memref<1x128xf32, #tpu.memory_space<vmem>>, vector<1x128xf32>
    %17 = vector.shape_cast %16 : vector<1x128xf32> to vector<128xf32>
    %18 = vector.shape_cast %17 : vector<128xf32> to vector<1x128xf32>
    %19 = vector.broadcast %18 : vector<1x128xf32> to vector<128x128xf32>
    %20 = arith.addf %15, %19 : vector<128x128xf32>
    %21 = vector.shape_cast %20 : vector<128x128xf32> to vector<16x8x128xf32>
    %c0_12 = arith.constant 0 : index
    %c0_13 = arith.constant 0 : index
    %c0_14 = arith.constant 0 : index
    %c0_15 = arith.constant 0 : index
    %22 = vector.load %arg5[%c0_12, %c0_13, %c0_14, %c0_15] : memref<1x16x8x128xf32, #tpu.memory_space<vmem>>, vector<1x16x8x128xf32>
    %23 = vector.shape_cast %22 : vector<1x16x8x128xf32> to vector<16x8x128xf32>
    %24 = vector.shape_cast %21 : vector<16x8x128xf32> to vector<1x16x8x128xf32>
    tpu.vector_store %arg5[%c0_12, %c0_13, %c0_14, %c0_15], %24 {strides = array<i32>} : memref<1x16x8x128xf32, #tpu.memory_space<vmem>>, vector<1x16x8x128xf32>,
    return
  }
  func.func @transform_0(%arg0: i32) -> (i32, i32, i32) {
    %c0_i32 = arith.constant 0 : i32
    %c0_i32_0 = arith.constant 0 : i32
    %c0_i32_1 = arith.constant 0 : i32
    return %arg0, %c0_i32, %c0_i32_0 : i32, i32, i32
  }
  func.func @transform_1(%arg0: i32) -> (i32, i32, i32) {
    %c0_i32 = arith.constant 0 : i32
    %c0_i32_0 = arith.constant 0 : i32
    %c0_i32_1 = arith.constant 0 : i32
    return %arg0, %c0_i32, %c0_i32_0 : i32, i32, i32
  }
  func.func @transform_2(%arg0: i32) -> (i32, i32) {
    %c0_i32 = arith.constant 0 : i32
    %c0_i32_0 = arith.constant 0 : i32
    %c0_i32_1 = arith.constant 0 : i32
    return %c0_i32, %c0_i32_0 : i32, i32
  }
  func.func @transform_3(%arg0: i32) -> (i32, i32) {
    %c0_i32 = arith.constant 0 : i32
    %c0_i32_0 = arith.constant 0 : i32
    %c0_i32_1 = arith.constant 0 : i32
    return %c0_i32, %c0_i32_0 : i32, i32
  }
  func.func @transform_4(%arg0: i32) -> (i32, i32, i32, i32) {
    %c0_i32 = arith.constant 0 : i32
    %c0_i32_0 = arith.constant 0 : i32
    %c0_i32_1 = arith.constant 0 : i32
    %c0_i32_2 = arith.constant 0 : i32
    return %arg0, %c0_i32, %c0_i32_0, %c0_i32_1 : i32, i32, i32, i32
  }
}

</mosaic_0001>

<bundles_post_ra>
// kernel: cheb_lstm_forward.5
= control target key start
LH: loop header
LB: loop body
LE: loop exit
PB: predicated region body
PF: predicated region fallthrough
CT: control target
= control target key end

     0   :  { %11 = vsyncpa [#allocation5], 0  ;;  %s939_s18 = smov 0   ;;  %s1131_s0 = inlined_call_operand.vmem [shape: f32[8,2,16,128], index: 0, kind: input, shape index: {}]   ;;  %s1132_s1 = inlined_call_operand.vmem [shape: f32[2,16,16], index: 1, kind: input, shape index: {}]   ;;  %s1133_s2 = inlined_call_operand.vmem [shape: f32[96,128], index: 2, kind: input, shape index: {}]   ;;  %s1134_s3 = inlined_call_operand.vmem [shape: f32[1,128], index: 3, kind: input, shape index: {}]   ;;  %s1135_s4 = inlined_call_operand.vmem [shape: f32[8,2,16,32], index: 4, kind: output, shape index: {0}]   ;;  %s1136_s5 = inlined_call_operand.hbm [shape: f32[2,16,32], index: 5, kind: output, shape index: {1}]  }
   0x1 LB: > { %s945_s19 = sadd.s32 4294967295, %s900_s18   ;;  %p745_p0 = scmp.ge.s32.totalorder %s900_s18, 1  ;;  %s900_s18 = sphi %s939_s18, %s17_s18  }
   0x2   : > { %p181_p1 = scmp.lt.s32.totalorder %s900_s18, 9 }
   0x4   : > { %p182_p2 = pnand %p745_p0, %p181_p1 }
   0x5   : > { %p204_p3 = scmp.lt.s32.totalorder (!%p182_p2), %s945_s19, 7  ;;  %p748_p4 = scmp.ne.s32.totalorder (!%p182_p2), %s945_s19, 0 }
   0x6   : > { %185 = sbr.rel (%p182_p2) target bundleno = 1064 (0x428), region = 36 }
   0xb   : > { %s205_s20 = scalar_select %p204_p3, %s945_s19, 7 }
   0xc   : > { %212 = sbr.rel (%p748_p4) target bundleno = 26 (0x1a), region = 40 }
   0xd   : > { %s771_s21 = sshll.u32 %s205_s20, 5 }
   0xe   : > { %s954_s24 = scalar_lea.vmem %s1131_s0, %s771_s21 }
  0x11   : > { %vm213_vm0 = vcmask 261120   ;;  %v902_v0 = vmov 0.0  }
  0x12   : > { %214 = vst.msk [vmem:[#allocation2] sm:$0xff] %vm213_vm0, %v902_v0 }
  0x13   : > { %215 = vst.msk [vmem:[#allocation2 + $0x8] sm:$0xff] %vm213_vm0, %v902_v0 }
  0x14   : > { %216 = vst.msk [vmem:[#allocation2 + $0x10] sm:$0xff] %vm213_vm0, %v902_v0 }
  0x15   : > { %217 = vst.msk [vmem:[#allocation2 + $0x18] sm:$0xff] %vm213_vm0, %v902_v0 }
  0x16   : > { %218 = vst.msk [vmem:[#allocation3] sm:$0xff] %vm213_vm0, %v902_v0 }
  0x17   : > { %219 = vst.msk [vmem:[#allocation3 + $0x8] sm:$0xff] %vm213_vm0, %v902_v0 }
  0x18   : > { %220 = vst.msk [vmem:[#allocation3 + $0x10] sm:$0xff] %vm213_vm0, %v902_v0 }
  0x19   : > { %221 = vst.msk [vmem:[#allocation3 + $0x18] sm:$0xff] %vm213_vm0, %v902_v0 }
  0x1a PF: > { %v957_v1 = vld [vmem:[#allocation2 + $0x8] sm:$0xff]  ;;  %v961_v3 = vld [vmem:[#allocation2] sm:$0xff]  ;;  %vm234_vm1 = vcmask 130048   ;;  %v224_v6 = vld [vmem:[%s1132_s1 + $0x10] sm:$0xff]  ;;  %s903_s8 = smov 32   ;;  %s904_s30 = smov 64  }
  0x1b   : > { %255 = vmatpush.msra.mxu0 %v957_v1  ;;  %v965_v4 = vld [vmem:[#allocation2 + $0x10] sm:$0xff]  ;;  %v222_v5 = vld [vmem:[%s1132_s1] sm:$0xff]  ;;  %v223_v7 = vld [vmem:[%s1132_s1 + $0x8] sm:$0xff]  ;;  %vm379_vm2 = vcmask 261120   ;;  %vm384_vm3 = vcmask 523264   ;;  %vm401_vm4 = vcmask 785408  }
  0x1c   : > { %v959_v2 = vld [vmem:[#allocation2 + $0x18] sm:$0xff]  ;;  %v399_v14 = vld [vmem:[%s1133_s2 + $0x50] sm:$0xff]  ;;  %v398_v15 = vld [vmem:[%s1133_s2 + $0x48] sm:$0xff]  ;;  %p766_p5 = scmp.ne.s32.totalorder %s945_s19, 7 }
  0x1d   : > { %284 = vmatpush.msra.mxu1 %v959_v2  ;;  %256 = vmatpush.msra.mxu0 %v961_v3  ;;  %v225_v8 = vld [vmem:[%s1132_s1 + $0x18] sm:$0xff]  ;;  %v397_v16 = vld [vmem:[%s1133_s2 + $0x40] sm:$0xff]  ;;  %v395_v18 = vld [vmem:[%s1133_s2 + $0x30] sm:$0xff] }
  0x1e   : > { %749 = vmatmul.msk.f32.vlgmr.msra.gmra.mxu0 %vm234_vm1, %v222_v5  ;;  %v400_v13 = vld [vmem:[%s1133_s2 + $0x58] sm:$0xff]  ;;  %v394_v19 = vld [vmem:[%s1133_s2 + $0x28] sm:$0xff]  ;;  %v393_v23 = vld [vmem:[%s1133_s2 + $0x20] sm:$0xff] }
  0x1f   : > { %285 = vmatpush.msra.mxu1 %v965_v4  ;;  %418 = vmatpush.msrb.mxu0 %v400_v13  ;;  %v396_v17 = vld [vmem:[%s1133_s2 + $0x38] sm:$0xff]  ;;  %v391_v28 = vld [vmem:[%s1133_s2 + $0x10] sm:$0xff]  ;;  %v390_v29 = vld [vmem:[%s1133_s2 + $0x8] sm:$0xff] }
  0x20   : > { %751 = vmatmul.msk.f32.vlgmr.msra.gmra.mxu1 %vm234_vm1, %v224_v6  ;;  %v392_v26 = vld [vmem:[%s1133_s2 + $0x18] sm:$0xff]  ;;  %v389_v36 = vld [vmem:[%s1133_s2] sm:$0xff]  ;;  %v445_v58 = vld [vmem:[%s954_s24 + $0x10] sm:$0xff] }
  0x21   : > { %772 = vmatpush.msrb.mxu1 %v400_v13  ;;  %419 = vmatpush.msrb.mxu0 %v399_v14  ;;  %v443_v53 = vld [vmem:[%s954_s24] sm:$0xff]  ;;  %v446_v0 = vld [vmem:[%s954_s24 + $0x18] sm:$0xff] }
  0x22   : > { %v829_v54 = vld [vmem:[%s1134_s3] ss:$0 sm:$0xff] }
  0x23   : > { %775 = vmatpush.msrb.mxu1 %v399_v14  ;;  %420 = vmatpush.msrb.mxu0 %v398_v15 }
  0x25   : > { %778 = vmatpush.msrb.mxu1 %v398_v15  ;;  %421 = vmatpush.msrb.mxu0 %v397_v16 }
  0x26   : > { %750 = vmatmul.msk.f32.gmra.mxu0 %vm234_vm1, %v223_v7 }
  0x27   : > { %781 = vmatpush.msrb.mxu1 %v397_v16  ;;  %422 = vmatpush.msrb.mxu0 %v396_v17 }
  0x28   : > { %752 = vmatmul.msk.f32.gmra.mxu1 %vm234_vm1, %v225_v8 }
  0x29   : > { %784 = vmatpush.msrb.mxu1 %v396_v17  ;;  %423 = vmatpush.msrb.mxu0 %v395_v18 }
  0x2b   : > { %787 = vmatpush.msrb.mxu1 %v395_v18  ;;  %424 = vmatpush.msrb.mxu0 %v394_v19 }
  0x2d   : > { %790 = vmatpush.msrb.mxu1 %v394_v19  ;;  %425 = vmatpush.msrb.mxu0 %v393_v23 }
  0x2f   : > { %426 = vmatpush.msrb.mxu0 %v392_v26  ;;  %793 = vmatpush.msrb.mxu1 %v393_v23 }
  0x31   : > { %427 = vmatpush.msrb.mxu0 %v391_v28  ;;  %796 = vmatpush.msrb.mxu1 %v392_v26 }
  0x33   : > { %428 = vmatpush.msrb.mxu0 %v390_v29  ;;  %799 = vmatpush.msrb.mxu1 %v391_v28 }
  0x35   : > { %802 = vmatpush.msrb.mxu1 %v390_v29  ;;  %429 = vmatpush.msrb.mxu0 %v389_v36 }
  0x37   : > { %805 = vmatpush.msrb.mxu1 %v389_v36 }
  0x9b   : > { %v258_v9 = vpop.f32.mrf.mxu0 }
  0x9c   : > { %351 = vrot.lane.b32.xlu2 %v258_v9, %s903_s8 }
  0x9d   : > { %v287_v10 = vpop.f32.mrf.mxu1 }
  0x9e   : > { %355 = vrot.lane.b32.xlu0 %v287_v10, %s903_s8 }
  0xa3   : > { %v261_v11 = vpop.f32.mrf.mxu0 }
  0xa4   : > { %307 = vmatpush.msra.mxu2 %v261_v11  ;;  %353 = vrot.lane.b32.xlu2 %v261_v11, %s903_s8 }
  0xa5   : > { %v290_v12 = vpop.f32.mrf.mxu1 }
  0xa6   : > { %357 = vrot.lane.b32.xlu0 %v290_v12, %s903_s8  ;;  %330 = vmatpush.msra.mxu3 %v290_v12 }
  0xa7   : > { %308 = vmatpush.msra.mxu2 %v258_v9 }
  0xa8   : > { %331 = vmatpush.msra.mxu3 %v287_v10  ;;  %753 = vmatmul.msk.f32.vlgmr.msra.gmra.mxu2 %vm234_vm1, %v222_v5 }
  0xa9   : > { %755 = vmatmul.msk.f32.vlgmr.msra.gmra.mxu3 %vm234_vm1, %v224_v6  ;;  %773 = vmatpush.msrb.mxu2 %v400_v13 }
  0xaa   : > { %774 = vmatpush.msrb.mxu3 %v400_v13 }
  0xab   : > { %776 = vmatpush.msrb.mxu2 %v399_v14 }
  0xac   : > { %777 = vmatpush.msrb.mxu3 %v399_v14 }
  0xad   : > { %779 = vmatpush.msrb.mxu2 %v398_v15 }
  0xae   : > { %780 = vmatpush.msrb.mxu3 %v398_v15  ;;  %v459_v15 = vlaneseq }
  0xaf   : > { %782 = vmatpush.msrb.mxu2 %v397_v16 }
  0xb0   : > { %754 = vmatmul.msk.f32.gmra.mxu2 %vm234_vm1, %v223_v7  ;;  %783 = vmatpush.msrb.mxu3 %v397_v16 }
  0xb1   : > { %756 = vmatmul.msk.f32.gmra.mxu3 %vm234_vm1, %v225_v8  ;;  %785 = vmatpush.msrb.mxu2 %v396_v17 }
  0xb2   : > { %786 = vmatpush.msrb.mxu3 %v396_v17 }
  0xb3   : > { %788 = vmatpush.msrb.mxu2 %v395_v18 }
  0xb4   : > { %789 = vmatpush.msrb.mxu3 %v395_v18 }
  0xb5   : > { %791 = vmatpush.msrb.mxu2 %v394_v19 }
  0xb6   : > { %792 = vmatpush.msrb.mxu3 %v394_v19  ;;  %v1060_v19 = vand.u32 127, %v459_v15 }
  0xb7   : > { %794 = vmatpush.msrb.mxu2 %v393_v23 }
  0xb8   : > { %795 = vmatpush.msrb.mxu3 %v393_v23  ;;  %vm461_vm7 = vcmp.lt.s32.totalorder %v1060_v19, 96 }
  0xb9   : > { %797 = vmatpush.msrb.mxu2 %v392_v26 }
  0xba   : > { %798 = vmatpush.msrb.mxu3 %v392_v26 }
  0xbb   : > { %800 = vmatpush.msrb.mxu2 %v391_v28 }
  0xbc   : > { %801 = vmatpush.msrb.mxu3 %v391_v28 }
  0xbd   : > { %803 = vmatpush.msrb.mxu2 %v390_v29 }
  0xbe   : > { %804 = vmatpush.msrb.mxu3 %v390_v29 }
  0xbf   : > { %806 = vmatpush.msrb.mxu2 %v389_v36 }
  0xc0   : > { %807 = vmatpush.msrb.mxu3 %v389_v36 }
  0xf6   : > { %v352_v39 = vpop.permute.xlu2 %351 }
  0xf7   : > { %v380_v42 = vsel %vm379_vm2, %v961_v3, %v352_v39 }
  0xfe   : > { %v354_v49 = vpop.permute.xlu2 %353 }
  0xff   : > { %v381_v50 = vsel %vm379_vm2, %v957_v1, %v354_v49 }
 0x110   : > { %v356_v37 = vpop.permute.xlu0 %355 }
 0x111   : > { %v382_v40 = vsel %vm379_vm2, %v965_v4, %v356_v37 }
 0x118   : > { %v358_v38 = vpop.permute.xlu0 %357 }
 0x119   : > { %v383_v46 = vsel %vm379_vm2, %v959_v2, %v358_v38 }
 0x12b   : > { %v310_v21 = vpop.f32.mrf.mxu2 }
 0x12c   : > { %v333_v20 = vpop.f32.mrf.mxu3  ;;  %v339_v24 = vmul.f32 2.0, %v310_v21 }
 0x12d   : > { %v341_v22 = vmul.f32 2.0, %v333_v20 }
 0x12e   : > { %v343_v27 = vsub.f32 %v339_v24, %v961_v3  ;;  %v444_v3 = vld [vmem:[%s954_s24 + $0x8] sm:$0xff]  ;;  %s905_s24 = smov 96  }
 0x12f   : > { %v345_v25 = vsub.f32 %v341_v22, %v965_v4 }
 0x130   : > { %367 = vrot.lane.b32.xlu0 %v343_v27, %s904_s30 }
 0x131   : > { %371 = vrot.lane.b32.xlu1 %v345_v25, %s904_s30 }
 0x133   : > { %v313_v32 = vpop.f32.mrf.mxu2 }
 0x134   : > { %v336_v30 = vpop.f32.mrf.mxu3  ;;  %v340_v34 = vmul.f32 2.0, %v313_v32 }
 0x135   : > { %v342_v31 = vmul.f32 2.0, %v336_v30 }
 0x136   : > { %v344_v35 = vsub.f32 %v340_v34, %v957_v1 }
 0x137   : > { %v346_v33 = vsub.f32 %v342_v31, %v959_v2 }
 0x139   : > { %373 = vrot.lane.b32.xlu1 %v346_v33, %s904_s30 }
 0x141   : > { %369 = vrot.lane.b32.xlu1 %v344_v35, %s904_s30 }
 0x1a2   : > { %v368_v44 = vpop.permute.xlu0 %367 }
 0x1a3   : > { %v372_v41 = vpop.permute.xlu1 %371  ;;  %v385_v45 = vsel %vm384_vm3, %v380_v42, %v368_v44 }
 0x1a4   : > { %v387_v43 = vsel %vm384_vm3, %v382_v40, %v372_v41  ;;  %757 = vmatmul.msk.f32.vlgmr.msrb.gmra.mxu0 %vm401_vm4, %v385_v45 }
 0x1a5   : > { %759 = vmatmul.msk.f32.vlgmr.msrb.gmra.mxu2 %vm401_vm4, %v387_v43 }
 0x1ab   : > { %v374_v47 = vpop.permute.xlu1 %373 }
 0x1ac   : > { %v388_v48 = vsel %vm384_vm3, %v383_v46, %v374_v47 }
 0x1ad   : > { %760 = vmatmul.msk.f32.vlgmr.msrb.gmra.mxu3 %vm401_vm4, %v388_v48 }
 0x1b3   : > { %v370_v51 = vpop.permute.xlu1 %369 }
 0x1b4   : > { %v386_v52 = vsel %vm384_vm3, %v381_v50, %v370_v51 }
 0x1b5   : > { %758 = vmatmul.msk.f32.vlgmr.msrb.gmra.mxu1 %vm401_vm4, %v386_v52 }
 0x221   : > { %v431_v55 = vpop.f32.mrf.mxu0 }
 0x222   : > { %v447_v56 = vadd.f32 %v443_v53, %v431_v55 }
 0x224   : > { %v455_v57 = vadd.f32 %v829_v54, %v447_v56 }
 0x226   : > { %v761_v59 = vmul.f32 -1.442695, %v455_v57 }
 0x228   : > { %v437_v60 = vpop.f32.mrf.mxu2  ;;  %830 = vpow2.f32 %v761_v59  ;;  %v231_v59 = vld [vmem:[#allocation3 + $0x8] sm:$0xff] }
 0x229   : > { %v449_v61 = vadd.f32 %v445_v58, %v437_v60 }
 0x22b   : > { %v457_v62 = vadd.f32 %v829_v54, %v449_v61 }
 0x22d   : > { %v763_v63 = vmul.f32 -1.442695, %v457_v62 }
 0x22e   : > { %v831_v1 = vpop.eup %830 }
 0x22f   : > { %832 = vpow2.f32 %v763_v63  ;;  %v474_v4 = vadd.f32 1.0, %v831_v1 }
 0x230   : > { %v440_v2 = vpop.f32.mrf.mxu3 }
 0x231   : > { %v450_v5 = vadd.f32 %v446_v0, %v440_v2  ;;  %834 = vrcp.f32 %v474_v4  ;;  %v489_v20 = vand.u32 2147483648, %v474_v4  ;;  %v487_v24 = vand.u32 2147483647, %v474_v4 }
 0x232   : > { %v434_v6 = vpop.f32.mrf.mxu1  ;;  %vm483_vm6 = vweird.f32 %v474_v4 }
 0x233   : > { %v458_v7 = vadd.f32 %v829_v54, %v450_v5  ;;  %v448_v8 = vadd.f32 %v444_v3, %v434_v6  ;;  %v490_v29 = vor.u32 1.1754944e-38, %v489_v20  ;;  %vm488_vm9 = vcmp.eq.f32.partialorder %v487_v24, 8.507059e+37  ;;  %v232_v5 = vld [vmem:[#allocation3 + $0x10] sm:$0xff]  ;;  %v230_v6 = vld [vmem:[#allocation3] sm:$0xff] }
 0x235   : > { %v833_v9 = vpop.eup %832  ;;  %v764_v10 = vmul.f32 -1.442695, %v458_v7  ;;  %v456_v11 = vadd.f32 %v829_v54, %v448_v8 }
 0x236   : > { %v476_v12 = vadd.f32 1.0, %v833_v9 }
 0x237   : > { %836 = vpow2.f32 %v764_v10  ;;  %v762_v13 = vmul.f32 -1.442695, %v456_v11  ;;  %v835_v14 = vpop.eup %834 }
 0x238   : > { %838 = vrcp.f32 %v476_v12  ;;  %v479_v16 = vmul.f32 %v835_v14, %v474_v4  ;;  %vm484_vm5 = vweird.f32 %v835_v14  ;;  %v519_v32 = vand.u32 2147483648, %v476_v12 }
 0x239   : > { %840 = vpow2.f32 %v762_v13  ;;  %vm485_vm8 = vmor %vm483_vm6, %vm484_vm5  ;;  %v517_v36 = vand.u32 2147483647, %v476_v12  ;;  %vm513_vm11 = vweird.f32 %v476_v12 }
 0x23a   : > { %v480_v17 = vsub.f32 1.0, %v479_v16  ;;  %842 = vtanh.f32 %v455_v57  ;;  %v520_v40 = vor.u32 1.1754944e-38, %v519_v32 }
 0x23b   : > { %vm518_vm13 = vcmp.eq.f32.partialorder %v517_v36, 8.507059e+37 }
 0x23c   : > { %v481_v23 = vmul.f32 %v835_v14, %v480_v17 }
 0x23d   : > { %v837_v18 = vpop.eup %836 }
 0x23e   : > { %v839_v21 = vpop.eup %838  ;;  %v477_v22 = vadd.f32 1.0, %v837_v18  ;;  %v482_v28 = vadd.f32 %v835_v14, %v481_v23 }
 0x23f   : > { %v841_v25 = vpop.eup %840  ;;  %v509_v26 = vmul.f32 %v839_v21, %v476_v12  ;;  %vm514_vm10 = vweird.f32 %v839_v21 }
 0x240   : > { %844 = vrcp.f32 %v477_v22  ;;  %v475_v27 = vadd.f32 1.0, %v841_v25  ;;  %v486_v31 = vsel %vm485_vm8, %v835_v14, %v482_v28  ;;  %v843_v33 = vpop.eup %842  ;;  %vm515_vm12 = vmor %vm513_vm11, %vm514_vm10  ;;  %v534_v49 = vand.u32 2147483648, %v477_v22 }
 0x241   : > { %846 = vtanh.f32 %v457_v62  ;;  %v510_v30 = vsub.f32 1.0, %v509_v26  ;;  %v491_v34 = vsel %vm488_vm9, %v490_v29, %v486_v31  ;;  %v532_v51 = vand.u32 2147483647, %v477_v22 }
 0x242   : > { %848 = vrcp.f32 %v475_v27  ;;  %v1065_v37 = vsel %vm461_vm7, %v491_v34, %v843_v33  ;;  %vm528_vm15 = vweird.f32 %v477_v22  ;;  %v504_v53 = vand.u32 2147483648, %v475_v27 }
 0x243   : > { %v511_v35 = vmul.f32 %v839_v21, %v510_v30  ;;  %570 = vrot.lane.b32.xlu2 %v1065_v37, %s903_s8  ;;  %850 = vtanh.f32 %v458_v7  ;;  %v502_v56 = vand.u32 2147483647, %v475_v27  ;;  %v535_v57 = vor.u32 1.1754944e-38, %v534_v49  ;;  %v233_v7 = vld [vmem:[#allocation3 + $0x18] sm:$0xff] }
 0x244   : > { %852 = vtanh.f32 %v456_v11  ;;  %vm533_vm3 = vcmp.eq.f32.partialorder %v532_v51, 8.507059e+37  ;;  %vm498_vm4 = vweird.f32 %v475_v27  ;;  %v505_v63 = vor.u32 1.1754944e-38, %v504_v53 }
 0x245   : > { %v512_v38 = vadd.f32 %v839_v21, %v511_v35  ;;  %vm503_vm6 = vcmp.eq.f32.partialorder %v502_v56, 8.507059e+37 }
 0x246   : > { %v845_v39 = vpop.eup %844 }
 0x247   : > { %v847_v41 = vpop.eup %846  ;;  %v516_v42 = vsel %vm515_vm12, %v839_v21, %v512_v38  ;;  %v524_v43 = vmul.f32 %v845_v39, %v477_v22  ;;  %vm529_vm14 = vweird.f32 %v845_v39 }
 0x248   : > { %v849_v44 = vpop.eup %848  ;;  %v521_v45 = vsel %vm518_vm13, %v520_v40, %v516_v42  ;;  %vm530_vm1 = vmor %vm528_vm15, %vm529_vm14 }
 0x249   : > { %v1071_v46 = vsel %vm461_vm7, %v521_v45, %v847_v41  ;;  %v525_v47 = vsub.f32 1.0, %v524_v43  ;;  %v494_v48 = vmul.f32 %v849_v44, %v475_v27  ;;  %vm499_vm0 = vweird.f32 %v849_v44  ;;  %v851_v61 = vpop.eup %850 }
 0x24a   : > { %574 = vrot.lane.b32.xlu1 %v1071_v46, %s903_s8  ;;  %vm500_vm5 = vmor %vm498_vm4, %vm499_vm0  ;;  %v853_v2 = vpop.eup %852 }
 0x24b   : > { %v526_v50 = vmul.f32 %v845_v39, %v525_v47  ;;  %v495_v52 = vsub.f32 1.0, %v494_v48 }
 0x24d   : > { %v527_v54 = vadd.f32 %v845_v39, %v526_v50  ;;  %v496_v55 = vmul.f32 %v849_v44, %v495_v52 }
 0x24f   : > { %v531_v58 = vsel %vm530_vm1, %v845_v39, %v527_v54  ;;  %v497_v60 = vadd.f32 %v849_v44, %v496_v55 }
 0x250   : > { %v536_v62 = vsel %vm533_vm3, %v535_v57, %v531_v58 }
 0x251   : > { %v545_v0 = vsel %vm461_vm7, %v536_v62, %v851_v61  ;;  %v501_v1 = vsel %vm500_vm5, %v849_v44, %v497_v60 }
 0x252   : > { %576 = vrot.lane.b32.xlu2 %v545_v0, %s903_s8  ;;  %552 = vrot.lane.b32.xlu1 %v231_v59, %s903_s8  ;;  %v506_v3 = vsel %vm503_vm6, %v505_v63, %v501_v1 }
 0x253   : > { %v543_v4 = vsel %vm461_vm7, %v506_v3, %v853_v2 }
 0x254   : > { %572 = vrot.lane.b32.xlu0 %v543_v4, %s903_s8 }
 0x25a   : > { %554 = vrot.lane.b32.xlu2 %v232_v5, %s903_s8 }
 0x25c   : > { %550 = vrot.lane.b32.xlu0 %v230_v6, %s903_s8 }
 0x264   : > { %556 = vrot.lane.b32.xlu0 %v233_v7, %s903_s8 }
 0x29d   : > { %v571_v8 = vpop.permute.xlu2 %570 }
 0x29e   : > { %v582_v9 = vmul.f32 %v571_v8, %v1065_v37 }
 0x2a0   : > { %590 = vrot.lane.b32.xlu1 %v582_v9, %s903_s8 }
 0x2ac   : > { %v577_v10 = vpop.permute.xlu2 %576 }
 0x2ad   : > { %v585_v11 = vmul.f32 %v577_v10, %v545_v0 }
 0x2af   : > { %596 = vrot.lane.b32.xlu1 %v585_v11, %s903_s8 }
 0x2b4   : > { %v555_v21 = vpop.permute.xlu2 %554 }
 0x2b5   : > { %v564_v32 = vmul.f32 %v555_v21, %v1071_v46 }
 0x2bc   : > { %v575_v12 = vpop.permute.xlu1 %574 }
 0x2bd   : > { %v584_v13 = vmul.f32 %v575_v12, %v1071_v46 }
 0x2bf   : > { %594 = vrot.lane.b32.xlu0 %v584_v13, %s903_s8 }
 0x2c4   : > { %v553_v16 = vpop.permute.xlu1 %552 }
 0x2c5   : > { %v563_v26 = vmul.f32 %v553_v16, %v543_v4 }
 0x2c6   : > { %v573_v14 = vpop.permute.xlu0 %572 }
 0x2c7   : > { %v583_v15 = vmul.f32 %v573_v14, %v543_v4 }
 0x2c9   : > { %592 = vrot.lane.b32.xlu2 %v583_v15, %s903_s8 }
 0x2ce   : > { %v551_v17 = vpop.permute.xlu0 %550 }
 0x2cf   : > { %v562_v18 = vmul.f32 %v551_v17, %v1065_v37 }
 0x2d6   : > { %v557_v23 = vpop.permute.xlu0 %556 }
 0x2d7   : > { %v565_v24 = vmul.f32 %v557_v23, %v545_v0 }
 0x312   : > { %v591_v19 = vpop.permute.xlu1 %590 }
 0x313   : > { %v602_v20 = vadd.f32 %v591_v19, %v562_v18 }
 0x315   : > { %854 = vtanh.f32 %v602_v20 }
 0x31b   : > { %v855_v22 = vpop.eup %854 }
 0x31c   : > { %614 = vrot.lane.b32.xlu2 %v855_v22, %s903_s8 }
 0x321   : > { %v597_v25 = vpop.permute.xlu1 %596 }
 0x322   : > { %v605_v27 = vadd.f32 %v597_v25, %v565_v24 }
 0x323   : > { %v593_v28 = vpop.permute.xlu2 %592 }
 0x324   : > { %856 = vtanh.f32 %v605_v27  ;;  %v603_v29 = vadd.f32 %v593_v28, %v563_v26 }
 0x326   : > { %858 = vtanh.f32 %v603_v29 }
 0x32a   : > { %v857_v30 = vpop.eup %856 }
 0x32b   : > { %620 = vrot.lane.b32.xlu2 %v857_v30, %s903_s8 }
 0x32c   : > { %v859_v31 = vpop.eup %858 }
 0x32d   : > { %616 = vrot.lane.b32.xlu0 %v859_v31, %s903_s8 }
 0x331   : > { %v595_v33 = vpop.permute.xlu0 %594 }
 0x332   : > { %v604_v34 = vadd.f32 %v595_v33, %v564_v32 }
 0x334   : > { %860 = vtanh.f32 %v604_v34 }
 0x33a   : > { %v861_v35 = vpop.eup %860 }
 0x33b   : > { %618 = vrot.lane.b32.xlu1 %v861_v35, %s903_s8  ;;  %s765_s8 = sshll.u32 %s945_s19, 5 }
 0x33c   : > { %s671_s17 = scalar_lea.vmem %s1135_s4, %s765_s8 }
 0x343   : > { %654 = vrot.lane.b32.xlu1 %v602_v20, %s905_s24 }
 0x376   : > { %v615_v36 = vpop.permute.xlu2 %614 }
 0x377   : > { %v626_v38 = vmul.f32 %v615_v36, %v1065_v37 }
 0x379   : > { %634 = vrot.lane.b32.xlu0 %v626_v38, %s904_s30 }
 0x385   : > { %v621_v39 = vpop.permute.xlu2 %620 }
 0x386   : > { %v629_v40 = vmul.f32 %v621_v39, %v545_v0 }
 0x388   : > { %640 = vrot.lane.b32.xlu0 %v629_v40, %s904_s30 }
 0x390   : > { %658 = vrot.lane.b32.xlu0 %v604_v34, %s905_s24 }
 0x39f   : > { %v617_v41 = vpop.permute.xlu0 %616 }
 0x3a0   : > { %v627_v42 = vmul.f32 %v617_v41, %v543_v4 }
 0x3a2   : > { %636 = vrot.lane.b32.xlu1 %v627_v42, %s904_s30 }
 0x3aa   : > { %660 = vrot.lane.b32.xlu1 %v605_v27, %s905_s24 }
 0x3ad   : > { %v619_v43 = vpop.permute.xlu1 %618 }
 0x3ae   : > { %v628_v44 = vmul.f32 %v619_v43, %v1071_v46 }
 0x3b0   : > { %638 = vrot.lane.b32.xlu2 %v628_v44, %s904_s30 }
 0x3b5   : > { %v655_v45 = vpop.permute.xlu1 %654 }
 0x3b6   : > { %666 = vst.msk [vmem:[#allocation3] sm:$0xff] %vm379_vm2, %v655_v45 }
 0x3b8   : > { %656 = vrot.lane.b32.xlu2 %v603_v29, %s905_s24 }
 0x3eb   : > { %v635_v37 = vpop.permute.xlu0 %634 }
 0x3ec   : > { %646 = vst.msk [vmem:[#allocation2] sm:$0xff] %vm379_vm2, %v635_v37 }
 0x3ed   : > { %672 = vst.msk [vmem:[%s671_s17] sm:$0xff] %vm379_vm2, %v635_v37 }
 0x3fa   : > { %v641_v47 = vpop.permute.xlu0 %640 }
 0x3fb   : > { %649 = vst.msk [vmem:[#allocation2 + $0x18] sm:$0xff] %vm379_vm2, %v641_v47 }
 0x3fc   : > { %675 = vst.msk [vmem:[%s671_s17 + $0x18] sm:$0xff] %vm379_vm2, %v641_v47 }
 0x402   : > { %v659_v46 = vpop.permute.xlu0 %658 }
 0x403   : > { %668 = vst.msk [vmem:[#allocation3 + $0x10] sm:$0xff] %vm379_vm2, %v659_v46 }
 0x40a   : > { %v639_v48 = vpop.permute.xlu2 %638 }
 0x40b   : > { %648 = vst.msk [vmem:[#allocation2 + $0x10] sm:$0xff] %vm379_vm2, %v639_v48 }
 0x40c   : > { %674 = vst.msk [vmem:[%s671_s17 + $0x10] sm:$0xff] %vm379_vm2, %v639_v48 }
 0x412   : > { %v657_v49 = vpop.permute.xlu2 %656 }
 0x413   : > { %667 = vst.msk [vmem:[#allocation3 + $0x8] sm:$0xff] %vm379_vm2, %v657_v49 }
 0x414   : > { %v637_v50 = vpop.permute.xlu1 %636 }
 0x415   : > { %647 = vst.msk [vmem:[#allocation2 + $0x8] sm:$0xff] %vm379_vm2, %v637_v50 }
 0x416   : > { %673 = vst.msk [vmem:[%s671_s17 + $0x8] sm:$0xff] %vm379_vm2, %v637_v50 }
 0x419   : > { %679 = sbr.rel (%p766_p5) target bundleno = 1058 (0x422), region = 44 }
 0x41c   : > { %v661_v51 = vpop.permute.xlu1 %660 }
 0x41d   : > { %669 = vst.msk [vmem:[#allocation3 + $0x18] sm:$0xff] %vm379_vm2, %v661_v51 }
 0x41e   : > { %680 = vst.msk [vmem:[#allocation4] sm:$0xff] %vm379_vm2, %v655_v45 }
 0x41f   : > { %681 = vst.msk [vmem:[#allocation4 + $0x8] sm:$0xff] %vm379_vm2, %v657_v49 }
 0x420   : > { %682 = vst.msk [vmem:[#allocation4 + $0x10] sm:$0xff] %vm379_vm2, %v659_v46 }
 0x421   : > { %683 = vst.msk [vmem:[#allocation4 + $0x18] sm:$0xff] %vm379_vm2, %v661_v51 }
 0x422 PF: > { %p812_p6 = scmp.eq.s32.totalorder %s945_s19, 7  ;;  %s906_s20 = smov [#allocation4]  }
 0x423   : > { %s692_s21 = sshll.u32 %s906_s20, 4  ;;  %s694_s25 = sshll.u32 %s1136_s5, 4  ;;  %s693_s21 = int_to_ptr.vmem [resolvable:$true] %s692_s21  ;;  %s695_s25 = int_to_ptr.hbm [resolvable:$true] %s694_s25 }
 0x424   : > { %s907_s26 = smov 128   ;;  %s908_s27 = smov 8  }
 0x425   : > { %809 = dma.vmem_to_hbm [thread:$0]  (%p812_p6), %s693_s21, 512, %s695_s25, [#allocation5], %s907_s26, %s907_s26, %s908_s27  }
 0x426   : > { %895 = dma.done.wait (%p812_p6), [#allocation5], 512  }
 0x427   : > { %897 = vsyncadd (%p812_p6), [#allocation5], 4294966784 }
 0x428 PF: > { %s17_s18 = sadd.s32 1, %s900_s18  }
 0x429   : > { %p14_p7 = scmp.ge.s32.totalorder %s17_s18, 10  }
 0x42b   :  { %16 = sbr.rel (!%p14_p7) target bundleno = 1 (0x1), region = 80 }
 0x430   :  { %714 = vsyncpa [#allocation5], 1 }
 0x431   :  { %716 = vsyncpa [#allocation5 + $0x1], 1 }

// kernel: cheb_lstm_forward.4
= control target key start
LH: loop header
LB: loop body
LE: loop exit
PB: predicated region body
PF: predicated region fallthrough
CT: control target
= control target key end

     0   :  { %s1566_s15 = smov 0   ;;  %s2360_s0 = inlined_call_operand.vmem [shape: f32[2,16,128], index: 0, kind: input, shape index: {}]   ;;  %s2361_s1 = inlined_call_operand.vmem [shape: f32[2,16,16], index: 1, kind: input, shape index: {}]   ;;  %s2362_s2 = inlined_call_operand.vmem [shape: f32[48,128], index: 2, kind: input, shape index: {}]   ;;  %s2363_s3 = inlined_call_operand.vmem [shape: f32[1,128], index: 3, kind: input, shape index: {}]   ;;  %s2364_s4 = inlined_call_operand.vmem [shape: f32[2,16,8,128], index: 4, kind: output, shape index: {}]  }
   0x1 LB: > { %s1452_s16 = sadd.s32 4294967295, %s1530_s15   ;;  %p1456_p0 = scmp.ge.s32.totalorder %s1530_s15, 1  ;;  %s1530_s15 = sphi %s1566_s15, %s14_s15  }
   0x2   : > { %p172_p1 = scmp.lt.s32.totalorder %s1530_s15, 3 }
   0x4   : > { %p173_p2 = pnand %p1456_p0, %p172_p1 }
   0x5   : > { %p203_p3 = scmp.lt.s32.totalorder (!%p173_p2), %s1452_s16, 1  ;;  %s1532_s24 = smov (!%p173_p2), 96  }
   0x6   : > { %176 = sbr.rel (%p173_p2) target bundleno = 742 (0x2e6), region = 36  ;;  %s1533_s25 = smov (!%p173_p2), 80  }
   0x7   : > { %s1534_s26 = smov (!%p173_p2), 64   ;;  %s1535_s27 = smov (!%p173_p2), 48  }
   0x8   : > { %s1536_s28 = smov (!%p173_p2), 32   ;;  %s1537_s29 = smov (!%p173_p2), 112  }
   0x9   : > { %s1538_s30 = smov (!%p173_p2), 16  }
   0xb   : > { %s2366_s16 = smov (!%p203_p3, %s1452_s16), 1  ;;  %vm222_vm0 = vcmask 130048   ;;  %vm324_vm1 = vcmask 1047556   ;;  %v1539_v9 = vmov 1983009808   ;;  %vm1228_vm2 = vcmask 261120  }
   0xc   : > { %s1485_s17 = sshll.u32 %s2366_s16, 4  ;;  %v329_v10 = vunpack.c.l.s4 %v1539_v9  ;;  %vm1255_vm3 = vcmask 392192   ;;  %s1487_s19 = sshll.u32 %s2366_s16, 7 }
   0xd   : > { %s207_s20 = scalar_lea.vmem %s2360_s0, %s1485_s17  ;;  %s212_s23 = scalar_lea.vmem %s2361_s1, %s1485_s17 }
   0xe   : > { %v1580_v0 = vld [vmem:[%s207_s20 + $0x8] sm:$0xff]  ;;  %v1582_v1 = vld [vmem:[%s207_s20] sm:$0xff]  ;;  %v1652_v17 = vunpack.c.0.s8 %v329_v10 }
   0xf   : > { %243 = vmatpush.msra.mxu0 %v1580_v0  ;;  %v218_v2 = vld [vmem:[%s212_s23] sm:$0xff]  ;;  %289 = vrot.lane.b32.xlu1 %v1580_v0, %s1532_s24  ;;  %v219_v3 = vld [vmem:[%s212_s23 + $0x8] sm:$0xff]  ;;  %v438_v8 = vrot.slane %v1580_v0, 4  ;;  %v326_v48 = vrot.slane %v1582_v1, 4 }
  0x10   : > { %295 = vrot.lane.b32.xlu0 %v1580_v0, %s1533_s25  ;;  %299 = vrot.lane.b32.xlu2 %v1582_v1, %s1534_s26 }
  0x11   : > { %244 = vmatpush.msra.mxu0 %v1582_v1 }
  0x12   : > { %1463 = vmatmul.msk.f32.vlgmr.msra.gmra.mxu0 %vm222_vm0, %v218_v2 }
  0x17   : > { %305 = vrot.lane.b32.xlu1 %v1582_v1, %s1535_s27 }
  0x18   : > { %313 = vrot.lane.b32.xlu0 %v1580_v0, %s1536_s28  ;;  %311 = vrot.lane.b32.xlu2 %v1582_v1, %s1536_s28 }
  0x1a   : > { %1464 = vmatmul.msk.f32.gmra.mxu0 %vm222_vm0, %v219_v3 }
  0x1f   : > { %281 = vrot.lane.b32.xlu1 %v1582_v1, %s1537_s29 }
  0x20   : > { %287 = vrot.lane.b32.xlu0 %v1582_v1, %s1532_s24  ;;  %283 = vrot.lane.b32.xlu2 %v1580_v0, %s1537_s29 }
  0x27   : > { %301 = vrot.lane.b32.xlu1 %v1580_v0, %s1534_s26 }
  0x28   : > { %319 = vrot.lane.b32.xlu0 %v1580_v0, %s1538_s30  ;;  %317 = vrot.lane.b32.xlu2 %v1582_v1, %s1538_s30 }
  0x2f   : > { %293 = vrot.lane.b32.xlu1 %v1582_v1, %s1533_s25 }
  0x6a   : > { %v300_v6 = vpop.permute.xlu2 %299 }
  0x6b   : > { %v350_v7 = vrot.slane %v300_v6, 4 }
  0x72   : > { %v312_v11 = vpop.permute.xlu2 %311 }
  0x73   : > { %v348_v12 = vrot.slane %v312_v11, 4  ;;  %v351_v13 = vsel %vm324_vm1, %v312_v11, %v350_v7 }
  0x74   : > { %v359_v26 = vperm.slane %v351_v13, %v1652_v17 }
  0x75   : > { %v1648_v15 = vsel %vm324_vm1, %v348_v12, %v300_v6 }
  0x76   : > { %v410_v32 = vrot.slane %v359_v26, 4 }
  0x7a   : > { %v284_v21 = vpop.permute.xlu2 %283 }
  0x7b   : > { %v450_v22 = vrot.slane %v284_v21, 4 }
  0x81   : > { %v1644_v14 = vpop.permute.xlu1 %289 }
  0x82   : > { %v439_v16 = vsel %vm324_vm1, %v1644_v14, %v438_v8  ;;  %v296_v18 = vpop.permute.xlu0 %295  ;;  %v318_v34 = vpop.permute.xlu2 %317 }
  0x83   : > { %v448_v19 = vrot.slane %v296_v18, 4  ;;  %v447_v20 = vperm.slane %v439_v16, %v1652_v17  ;;  %v451_v25 = vsel %vm324_vm1, %v296_v18, %v450_v22  ;;  %v360_v35 = vrot.slane %v318_v34, 4 }
  0x84   : > { %v459_v27 = vperm.slane %v451_v25, %v1652_v17 }
  0x85   : > { %v1662_v23 = vsel %vm324_vm1, %v448_v19, %v284_v21  ;;  %v498_v24 = vrot.slane %v447_v20, 4 }
  0x86   : > { %v496_v30 = vrot.slane %v459_v27, 4 }
  0x87   : > { %v1668_v31 = vsel %vm324_vm1, %v459_v27, %v498_v24 }
  0x88   : > { %v1673_v33 = vsel %vm324_vm1, %v496_v30, %v447_v20 }
  0x89   : > { %v306_v28 = vpop.permute.xlu1 %305 }
  0x8a   : > { %v362_v29 = vrot.slane %v306_v28, 4  ;;  %v1678_v38 = vsel %vm324_vm1, %v360_v35, %v306_v28  ;;  %v314_v43 = vpop.permute.xlu0 %313 }
  0x8b   : > { %v460_v44 = vrot.slane %v314_v43, 4 }
  0x8c   : > { %v363_v36 = vsel %vm324_vm1, %v318_v34, %v362_v29  ;;  %v1540_v34 = vmov 1934713408  }
  0x8d   : > { %v371_v37 = vperm.slane %v363_v36, %v1652_v17  ;;  %v377_v35 = vunpack.c.l.s4 %v1540_v34 }
  0x8f   : > { %v1617_v4 = vpop.f32.mrf.mxu0  ;;  %v408_v39 = vrot.slane %v371_v37, 4  ;;  %v1681_v40 = vsel %vm324_vm1, %v371_v37, %v410_v32 }
  0x90   : > { %586 = vrot.lane.b32.xlu1 %v1617_v4, %s1538_s30  ;;  %574 = vrot.lane.b32.xlu2 %v1617_v4, %s1535_s27  ;;  %v594_v37 = vrot.slane %v1617_v4, 4 }
  0x91   : > { %568 = vrot.lane.b32.xlu0 %v1617_v4, %s1534_s26  ;;  %v1684_v41 = vsel %vm324_vm1, %v408_v39, %v359_v26  ;;  %v282_v42 = vpop.permute.xlu1 %281 }
  0x92   : > { %v1695_v50 = vpop.permute.xlu0 %287  ;;  %v338_v53 = vrot.slane %v282_v42, 4 }
  0x93   : > { %v327_v51 = vsel %vm324_vm1, %v1695_v50, %v326_v48 }
  0x94   : > { %v335_v52 = vperm.slane %v327_v51, %v1652_v17 }
  0x96   : > { %v386_v54 = vrot.slane %v335_v52, 4 }
  0x97   : > { %v1625_v5 = vpop.f32.mrf.mxu0 }
  0x98   : > { %556 = vrot.lane.b32.xlu2 %v1617_v4, %s1532_s24  ;;  %582 = vrot.lane.b32.xlu1 %v1625_v5, %s1536_s28 }
  0x99   : > { %580 = vrot.lane.b32.xlu0 %v1617_v4, %s1536_s28  ;;  %266 = vmatpush.msra.mxu1 %v1625_v5  ;;  %v302_v45 = vpop.permute.xlu1 %301 }
  0x9a   : > { %v1689_v46 = vsel %vm324_vm1, %v460_v44, %v302_v45  ;;  %v462_v47 = vrot.slane %v302_v45, 4  ;;  %v1711_v63 = vpop.permute.xlu0 %319  ;;  %v1743_v45 = vunpack.c.0.s8 %v377_v35 }
  0x9b   : > { %267 = vmatpush.msra.mxu1 %v1617_v4 }
  0x9c   : > { %1465 = vmatmul.msk.f32.vlgmr.msra.gmra.mxu1 %vm222_vm0, %v218_v2  ;;  %v1693_v49 = vsel %vm324_vm1, %v314_v43, %v462_v47 }
  0xa0   : > { %552 = vrot.lane.b32.xlu1 %v1625_v5, %s1537_s29  ;;  %564 = vrot.lane.b32.xlu2 %v1625_v5, %s1533_s25 }
  0xa1   : > { %550 = vrot.lane.b32.xlu0 %v1617_v4, %s1537_s29  ;;  %v294_v55 = vpop.permute.xlu1 %293 }
  0xa2   : > { %v336_v56 = vrot.slane %v294_v55, 4  ;;  %v339_v57 = vsel %vm324_vm1, %v294_v55, %v338_v53 }
  0xa3   : > { %v347_v58 = vperm.slane %v339_v57, %v1652_v17 }
  0xa4   : > { %1466 = vmatmul.msk.f32.gmra.mxu1 %vm222_vm0, %v219_v3  ;;  %v1703_v59 = vsel %vm324_vm1, %v336_v56, %v282_v42 }
  0xa5   : > { %v384_v60 = vrot.slane %v347_v58, 4  ;;  %v1706_v61 = vsel %vm324_vm1, %v347_v58, %v386_v54 }
  0xa7   : > { %v1709_v62 = vsel %vm324_vm1, %v384_v60, %v335_v52 }
  0xa8   : > { %576 = vrot.lane.b32.xlu1 %v1625_v5, %s1535_s27  ;;  %588 = vrot.lane.b32.xlu2 %v1625_v5, %s1538_s30 }
  0xa9   : > { %562 = vrot.lane.b32.xlu0 %v1617_v4, %s1533_s25 }
  0xb1   : > { %558 = vrot.lane.b32.xlu0 %v1625_v5, %s1532_s24 }
  0xb9   : > { %570 = vrot.lane.b32.xlu0 %v1625_v5, %s1534_s26 }
  0xea   : > { %v575_v2 = vpop.permute.xlu2 %574 }
  0xeb   : > { %v630_v7 = vrot.slane %v575_v2, 4 }
  0xf2   : > { %v557_v25 = vpop.permute.xlu2 %556 }
  0xf3   : > { %v592_v28 = vrot.slane %v557_v25, 4  ;;  %v595_v47 = vsel %vm324_vm1, %v557_v25, %v594_v37 }
  0xf4   : > { %v1756_v56 = vperm.slane %v595_v47, %v1652_v17 }
  0xf5   : > { %v593_v36 = vsel %vm324_vm1, %v592_v28, %v1617_v4 }
  0xf6   : > { %v1741_v42 = vperm.slane %v593_v36, %v1652_v17 }
  0xf8   : > { %v642_v57 = vrot.slane %v1741_v42, 4 }
  0xfa   : > { %v1746_v51 = vpop.permute.xlu2 %564 }
 0x102   : > { %v587_v3 = vpop.permute.xlu1 %586  ;;  %v589_v35 = vpop.permute.xlu2 %588 }
 0x103   : > { %v569_v6 = vpop.permute.xlu0 %568  ;;  %v631_v8 = vsel %vm324_vm1, %v587_v3, %v630_v7  ;;  %v628_v10 = vrot.slane %v587_v3, 4  ;;  %v436_v7 = vrot.slane %v1644_v14, 4 }
 0x104   : > { %v1715_v9 = vperm.slane %v631_v8, %v1652_v17  ;;  %v618_v11 = vrot.slane %v569_v6, 4 }
 0x105   : > { %v629_v20 = vsel %vm324_vm1, %v628_v10, %v575_v2  ;;  %v437_v14 = vsel %vm324_vm1, %v436_v7, %v1580_v0 }
 0x106   : > { %v676_v18 = vrot.slane %v1715_v9, 4  ;;  %v1730_v26 = vperm.slane %v629_v20, %v1652_v17 }
 0x10a   : > { %v1733_v29 = vpop.permute.xlu1 %582 }
 0x10b   : > { %v581_v12 = vpop.permute.xlu0 %580  ;;  %v728_v7 = vrot.slane %v1733_v29, 4 }
 0x10c   : > { %v616_v13 = vrot.slane %v581_v12, 4  ;;  %v619_v16 = vsel %vm324_vm1, %v581_v12, %v618_v11  ;;  %v706_v12 = vrot.slane %v1625_v5, 4 }
 0x10d   : > { %v1720_v19 = vperm.slane %v619_v16, %v1652_v17 }
 0x10e   : > { %v617_v21 = vsel %vm324_vm1, %v616_v13, %v569_v6 }
 0x10f   : > { %v1725_v22 = vperm.slane %v617_v21, %v1652_v17  ;;  %v677_v24 = vsel %vm324_vm1, %v676_v18, %v1720_v19 }
 0x110   : > { %v683_v3 = vperm.slane %v677_v24, %v1743_v45 }
 0x111   : > { %v666_v27 = vrot.slane %v1725_v22, 4 }
 0x112   : > { %v553_v4 = vpop.permute.xlu1 %552  ;;  %v696_v20 = vrot.slane %v683_v3, 4 }
 0x113   : > { %v551_v30 = vpop.permute.xlu0 %550  ;;  %v667_v32 = vsel %vm324_vm1, %v1730_v26, %v666_v27  ;;  %v718_v8 = vrot.slane %v553_v4, 4 }
 0x114   : > { %v606_v43 = vrot.slane %v551_v30, 4  ;;  %v675_v6 = vperm.slane %v667_v32, %v1743_v45 }
 0x115   : > { %v719_v25 = vsel %vm324_vm1, %v1746_v51, %v718_v8 }
 0x116   : > { %v692_v24 = vrot.slane %v675_v6, 4 }
 0x119   : > { %v269_v39 = vpop.f32.mrf.mxu1 }
 0x11a   : > { %v275_v44 = vmul.f32 2.0, %v269_v39  ;;  %v577_v47 = vpop.permute.xlu1 %576 }
 0x11b   : > { %v563_v48 = vpop.permute.xlu0 %562  ;;  %v742_v8 = vrot.slane %v577_v47, 4 }
 0x11c   : > { %v1749_v52 = vsub.f32 %v275_v44, %v1582_v1  ;;  %v604_v53 = vrot.slane %v563_v48, 4  ;;  %v607_v54 = vsel %vm324_vm1, %v563_v48, %v606_v43  ;;  %v1799_v43 = vperm.slane %v437_v14, %v1652_v17 }
 0x11d   : > { %v1753_v55 = vperm.slane %v607_v54, %v1652_v17  ;;  %v1802_v44 = vperm.slane %v719_v25, %v1652_v17  ;;  %v1837_v14 = vperm.slane %v1703_v59, %v1652_v17 }
 0x11e   : > { %v605_v58 = vsel %vm324_vm1, %v604_v53, %v551_v30  ;;  %824 = vrot.lane.b32.xlu2 %v1749_v52, %s1532_s24  ;;  %842 = vrot.lane.b32.xlu0 %v1749_v52, %s1535_s27 }
 0x11f   : > { %v1765_v60 = vperm.slane %v605_v58, %v1652_v17  ;;  %v652_v2 = vrot.slane %v1753_v55, 4  ;;  %836 = vrot.lane.b32.xlu1 %v1749_v52, %s1534_s26  ;;  %v740_v58 = vrot.slane %v589_v35, 4 }
 0x121   : > { %v653_v10 = vsel %vm324_vm1, %v652_v2, %v1756_v56  ;;  %v643_v11 = vsel %vm324_vm1, %v1765_v60, %v642_v57  ;;  %v272_v18 = vpop.f32.mrf.mxu1 }
 0x122   : > { %v659_v13 = vperm.slane %v653_v10, %v1743_v45  ;;  %v651_v21 = vperm.slane %v643_v11, %v1743_v45  ;;  %v276_v36 = vmul.f32 2.0, %v272_v18  ;;  %v486_v11 = vrot.slane %v1799_v43, 4 }
 0x123   : > { %v559_v16 = vpop.permute.xlu0 %558 }
 0x124   : > { %v704_v27 = vrot.slane %v559_v16, 4  ;;  %v707_v28 = vsel %vm324_vm1, %v559_v16, %v706_v12  ;;  %v1789_v32 = vsel %vm324_vm1, %v696_v20, %v659_v13  ;;  %v1792_v34 = vsel %vm324_vm1, %v692_v24, %v651_v21 }
 0x125   : > { %v1786_v30 = vperm.slane %v707_v28, %v1652_v17  ;;  %v698_v37 = vrot.slane %v659_v13, 4  ;;  %v694_v39 = vrot.slane %v651_v21, 4  ;;  %v1822_v10 = vsub.f32 %v276_v36, %v1580_v0 }
 0x126   : > { %830 = vrot.lane.b32.xlu2 %v1749_v52, %s1533_s25  ;;  %818 = vrot.lane.b32.xlu0 %v1749_v52, %s1537_s29  ;;  %v705_v48 = vsel %vm324_vm1, %v704_v27, %v1625_v5  ;;  %v323_v13 = vrot.slane %v1695_v50, 4  ;;  %v741_v16 = vsel %vm324_vm1, %v740_v58, %v577_v47 }
 0x127   : > { %v766_v53 = vrot.slane %v1786_v30, 4  ;;  %848 = vrot.lane.b32.xlu1 %v1749_v52, %s1536_s28  ;;  %v1810_v54 = vsel %vm324_vm1, %v683_v3, %v698_v37  ;;  %v1813_v57 = vsel %vm324_vm1, %v675_v6, %v694_v39  ;;  %v1819_v5 = vperm.slane %v705_v48, %v1652_v17 }
 0x128   : > { %v455_v3 = vperm.slane %v1662_v23, %v1652_v17  ;;  %v716_v6 = vrot.slane %v1746_v51, 4  ;;  %v743_v23 = vsel %vm324_vm1, %v589_v35, %v742_v8  ;;  %v1849_v25 = vperm.slane %v741_v16, %v1652_v17 }
 0x129   : > { %v767_v2 = vsel %vm324_vm1, %v1802_v44, %v766_v53  ;;  %v754_v51 = vrot.slane %v1819_v5, 4  ;;  %v325_v28 = vsel %vm324_vm1, %v323_v13, %v1582_v1  ;;  %v751_v36 = vperm.slane %v743_v23, %v1652_v17 }
 0x12a   : > { %v717_v21 = vsel %vm324_vm1, %v716_v6, %v553_v4  ;;  %v678_v4 = vrot.slane %v1720_v19, 4  ;;  %v1865_v19 = vsel %vm324_vm1, %v455_v3, %v486_v11  ;;  %v775_v47 = vperm.slane %v767_v2, %v1743_v45 }
 0x12b   : > { %v571_v12 = vpop.permute.xlu0 %570  ;;  %v1862_v35 = vperm.slane %v717_v21, %v1652_v17  ;;  %v372_v1 = vrot.slane %v1837_v14, 4  ;;  %v331_v8 = vperm.slane %v325_v28, %v1652_v17  ;;  %v654_v11 = vrot.slane %v1756_v56, 4 }
 0x12c   : > { %v729_v18 = vsel %vm324_vm1, %v728_v7, %v571_v12  ;;  %v730_v20 = vrot.slane %v571_v12, 4  ;;  %v679_v53 = vsel %vm324_vm1, %v1715_v9, %v678_v4  ;;  %v814_v12 = vrot.slane %v775_v47, 4 }
 0x12d   : > { %v1833_v24 = vperm.slane %v729_v18, %v1652_v17  ;;  %v355_v16 = vperm.slane %v1648_v15, %v1652_v17  ;;  %v484_v18 = vrot.slane %v455_v3, 4  ;;  %v655_v9 = vsel %vm324_vm1, %v1753_v55, %v654_v11 }
 0x12e   : > { %v731_v50 = vsel %vm324_vm1, %v1733_v29, %v730_v20  ;;  %838 = vrot.lane.b32.xlu0 %v1822_v10, %s1534_s26  ;;  %832 = vrot.lane.b32.xlu2 %v1822_v10, %s1533_s25  ;;  %v1857_v29 = vperm.slane %v1678_v38, %v1652_v17  ;;  %v755_v38 = vsel %vm324_vm1, %v1862_v35, %v754_v51 }
 0x12f   : > { %v739_v59 = vperm.slane %v731_v50, %v1652_v17  ;;  %v778_v27 = vrot.slane %v1833_v24, 4  ;;  %854 = vrot.lane.b32.xlu1 %v1749_v52, %s1538_s30  ;;  %v763_v2 = vperm.slane %v755_v38, %v1743_v45  ;;  %v687_v56 = vperm.slane %v679_v53, %v1743_v45 }
 0x130   : > { %v396_v7 = vrot.slane %v1857_v29, 4  ;;  %v373_v20 = vsel %vm324_vm1, %v372_v1, %v331_v8  ;;  %v419_v23 = vperm.slane %v1681_v40, %v1743_v45  ;;  %v663_v51 = vperm.slane %v655_v9, %v1743_v45 }
 0x131   : > { %v790_v37 = vrot.slane %v739_v59, 4  ;;  %v779_v39 = vsel %vm324_vm1, %v1849_v25, %v778_v27  ;;  %v1911_v27 = vsel %vm324_vm1, %v484_v18, %v1799_v43  ;;  %v700_v28 = vrot.slane %v687_v56, 4 }
 0x132   : > { %v787_v48 = vperm.slane %v779_v39, %v1743_v45  ;;  %v397_v55 = vsel %vm324_vm1, %v396_v7, %v355_v16  ;;  %v432_v39 = vrot.slane %v419_v23, 4  ;;  %v379_v40 = vperm.slane %v373_v20, %v1743_v45 }
 0x133   : > { %v791_v58 = vsel %vm324_vm1, %v751_v36, %v790_v37  ;;  %v403_v4 = vperm.slane %v397_v55, %v1743_v45  ;;  %v395_v37 = vperm.slane %v1706_v61, %v1743_v45  ;;  %v701_v1 = vsel %vm324_vm1, %v700_v28, %v663_v51 }
 0x134   : > { %v799_v6 = vperm.slane %v791_v58, %v1743_v45  ;;  %v804_v13 = vrot.slane %v787_v48, 4  ;;  %v788_v61 = vrot.slane %v751_v36, 4  ;;  %v806_v58 = vrot.slane %v763_v2, 4 }
 0x135   : > { %v420_v38 = vrot.slane %v403_v4, 4  ;;  %v422_v11 = vrot.slane %v379_v40, 4  ;;  %v398_v36 = vrot.slane %v355_v16, 4 }
 0x136   : > { %844 = vrot.lane.b32.xlu0 %v1822_v10, %s1535_s27  ;;  %850 = vrot.lane.b32.xlu2 %v1822_v10, %s1536_s28  ;;  %v812_v21 = vrot.slane %v799_v6, 4  ;;  %v1896_v15 = vsel %vm324_vm1, %v799_v6, %v814_v12  ;;  %v1899_v3 = vsel %vm324_vm1, %v804_v13, %v763_v2  ;;  %v789_v53 = vsel %vm324_vm1, %v788_v61, %v739_v59 }
 0x137   : > { %826 = vrot.lane.b32.xlu1 %v1822_v10, %s1532_s24  ;;  %v1924_v43 = vsel %vm324_vm1, %v420_v38, %v379_v40  ;;  %v795_v7 = vperm.slane %v789_v53, %v1743_v45  ;;  %v434_v6 = vrot.slane %v395_v37, 4  ;;  %v374_v12 = vrot.slane %v331_v8, 4  ;;  %s2339_s24 = scalar_lea.vmem %s2364_s4, %s1487_s19 }
 0x138   : > { %v1906_v50 = vsel %vm324_vm1, %v812_v21, %v775_v47  ;;  %v1921_v47 = vsel %vm324_vm1, %v432_v39, %v395_v37  ;;  %v764_v13 = vrot.slane %v1802_v44, 4  ;;  %v807_v18 = vsel %vm324_vm1, %v787_v48, %v806_v58 }
 0x139   : > { %v1936_v9 = vsel %vm324_vm1, %v403_v4, %v422_v11  ;;  %v1939_v59 = vsel %vm324_vm1, %v419_v23, %v434_v6  ;;  %v664_v8 = vrot.slane %v1730_v26, 4  ;;  %v640_v44 = vrot.slane %v1765_v60, 4 }
 0x13a   : > { %v765_v2 = vsel %vm324_vm1, %v764_v13, %v1786_v30  ;;  %v808_v20 = vrot.slane %v795_v7, 4  ;;  %v702_v48 = vrot.slane %v663_v51, 4  ;;  %v375_v21 = vsel %vm324_vm1, %v1837_v14, %v374_v12 }
 0x13b   : > { %v771_v23 = vperm.slane %v765_v2, %v1743_v45  ;;  %v665_v16 = vsel %vm324_vm1, %v664_v8, %v1725_v22  ;;  %v383_v30 = vperm.slane %v375_v21, %v1743_v45  ;;  %v415_v26 = vperm.slane %v1684_v41, %v1743_v45 }
 0x13c   : > { %v399_v60 = vsel %vm324_vm1, %v1857_v29, %v398_v36  ;;  %v641_v14 = vsel %vm324_vm1, %v640_v44, %v1741_v42  ;;  %v703_v22 = vsel %vm324_vm1, %v687_v56, %v702_v48  ;;  %v671_v4 = vperm.slane %v665_v16, %v1743_v45 }
 0x13d   : > { %v426_v51 = vrot.slane %v383_v30, 4  ;;  %v752_v41 = vrot.slane %v1862_v35, 4  ;;  %v391_v37 = vperm.slane %v1709_v62, %v1743_v45  ;;  %v647_v39 = vperm.slane %v641_v14, %v1743_v45 }
 0x13e   : > { %1112 = vrot.lane.b32.xlu0 %v701_v1, %s1538_s30  ;;  %856 = vrot.lane.b32.xlu2 %v1822_v10, %s1538_s30  ;;  %v428_v38 = vrot.slane %v415_v26, 4  ;;  %v688_v61 = vrot.slane %v671_v4, 4  ;;  %v810_v6 = vrot.slane %v771_v23, 4 }
 0x13f   : > { %820 = vrot.lane.b32.xlu1 %v1822_v10, %s1537_s29  ;;  %v753_v56 = vsel %vm324_vm1, %v752_v41, %v1819_v5  ;;  %v430_v1 = vrot.slane %v391_v37, 4  ;;  %v690_v36 = vrot.slane %v647_v39, 4  ;;  %v2016_v41 = vperm.slane %v1693_v49, %v1652_v17 }
 0x140   : > { %v1980_v53 = vsel %vm324_vm1, %v428_v38, %v391_v37  ;;  %v759_v58 = vperm.slane %v753_v56, %v1743_v45  ;;  %v689_v11 = vsel %vm324_vm1, %v688_v61, %v647_v39  ;;  %v811_v13 = vsel %vm324_vm1, %v795_v7, %v810_v6 }
 0x141   : > { %v1983_v62 = vsel %vm324_vm1, %v415_v26, %v430_v1  ;;  %v691_v2 = vsel %vm324_vm1, %v671_v4, %v690_v36  ;;  %v862_v7 = vrot.slane %v1749_v52, 4  ;;  %v472_v39 = vrot.slane %v1711_v63, 4 }
 0x142   : > { %v802_v12 = vrot.slane %v759_v58, 4  ;;  %v2025_v1 = vperm.slane %v1865_v19, %v1743_v45 }
 0x146   : > { %307 = vrot.lane.b32.xlu2 %v1580_v0, %s1535_s27  ;;  %v776_v0 = vrot.slane %v1849_v25, 4  ;;  %v809_v25 = vsel %vm324_vm1, %v808_v20, %v771_v23 }
 0x147   : > { %1122 = vrot.lane.b32.xlu1 %v807_v18, %s1538_s30 }
 0x148   : > { %v777_v55 = vsel %vm324_vm1, %v776_v0, %v1833_v24  ;;  %v407_v24 = vperm.slane %v399_v60, %v1743_v45  ;;  %v467_v60 = vperm.slane %v1689_v46, %v1652_v17 }
 0x149   : > { %v783_v28 = vperm.slane %v777_v55, %v1743_v45 }
 0x14a   : > { %v424_v29 = vrot.slane %v407_v24, 4  ;;  %v1971_v42 = vsel %vm324_vm1, %v407_v24, %v426_v51 }
 0x14b   : > { %v800_v35 = vrot.slane %v783_v28, 4  ;;  %v803_v18 = vsel %vm324_vm1, %v783_v28, %v802_v12 }
 0x14c   : > { %v1977_v40 = vsel %vm324_vm1, %v424_v29, %v383_v30  ;;  %v510_v29 = vrot.slane %v467_v60, 4 }
 0x14d   : > { %v801_v5 = vsel %vm324_vm1, %v800_v35, %v759_v58 }
 0x14e   : > { %1124 = vrot.lane.b32.xlu2 %v809_v25, %s1538_s30 }
 0x14f   : > { %1114 = vrot.lane.b32.xlu1 %v703_v22, %s1538_s30 }
 0x156   : > { %1100 = vrot.lane.b32.xlu2 %v689_v11, %s1538_s30 }
 0x157   : > { %1116 = vrot.lane.b32.xlu1 %v801_v5, %s1538_s30  ;;  %v503_v5 = vperm.slane %v1673_v33, %v1743_v45 }
 0x15e   : > { %1126 = vrot.lane.b32.xlu2 %v811_v13, %s1538_s30 }
 0x15f   : > { %1118 = vrot.lane.b32.xlu1 %v803_v18, %s1538_s30 }
 0x166   : > { %1102 = vrot.lane.b32.xlu2 %v691_v2, %s1538_s30 }
 0x178   : > { %v825_v8 = vpop.permute.xlu2 %824 }
 0x179   : > { %v863_v55 = vsel %vm324_vm1, %v825_v8, %v862_v7  ;;  %v860_v24 = vrot.slane %v825_v8, 4  ;;  %v538_v7 = vrot.slane %v2025_v1, 4 }
 0x17a   : > { %v2007_v25 = vperm.slane %v863_v55, %v1652_v17 }
 0x17b   : > { %v861_v56 = vsel %vm324_vm1, %v860_v24, %v1749_v52 }
 0x17c   : > { %v922_v46 = vrot.slane %v2007_v25, 4  ;;  %v2040_v18 = vperm.slane %v861_v56, %v1652_v17 }
 0x180   : > { %v831_v44 = vpop.permute.xlu2 %830 }
 0x181   : > { %v872_v38 = vrot.slane %v831_v44, 4 }
 0x188   : > { %v1996_v0 = vpop.permute.xlu2 %832 }
 0x190   : > { %v843_v20 = vpop.permute.xlu0 %842  ;;  %v1998_v48 = vpop.permute.xlu2 %850 }
 0x191   : > { %v837_v21 = vpop.permute.xlu1 %836  ;;  %v898_v35 = vrot.slane %v843_v20, 4 }
 0x192   : > { %v886_v51 = vrot.slane %v837_v21, 4 }
 0x198   : > { %v819_v23 = vpop.permute.xlu0 %818  ;;  %v2002_v16 = vpop.permute.xlu2 %856 }
 0x199   : > { %v874_v30 = vrot.slane %v819_v23, 4  ;;  %v849_v26 = vpop.permute.xlu1 %848  ;;  %v873_v52 = vsel %vm324_vm1, %v872_v38, %v819_v23 }
 0x19a   : > { %v884_v14 = vrot.slane %v849_v26, 4  ;;  %v887_v28 = vsel %vm324_vm1, %v849_v26, %v886_v51  ;;  %v879_v55 = vperm.slane %v873_v52, %v1652_v17 }
 0x19b   : > { %v875_v22 = vsel %vm324_vm1, %v831_v44, %v874_v30  ;;  %v2028_v61 = vperm.slane %v887_v28, %v1652_v17 }
 0x19c   : > { %v2011_v4 = vperm.slane %v875_v22, %v1652_v17  ;;  %v885_v37 = vsel %vm324_vm1, %v884_v14, %v837_v21 }
 0x19d   : > { %v891_v6 = vperm.slane %v885_v37, %v1652_v17  ;;  %v946_v23 = vrot.slane %v2028_v61, 4 }
 0x19e   : > { %v923_v11 = vsel %vm324_vm1, %v2011_v4, %v922_v46 }
 0x19f   : > { %v931_v21 = vperm.slane %v923_v11, %v1743_v45  ;;  %v934_v14 = vrot.slane %v891_v6, 4 }
 0x1a0   : > { %v2030_v49 = vpop.permute.xlu0 %838  ;;  %v308_v58 = vpop.permute.xlu2 %307 }
 0x1a1   : > { %v855_v12 = vpop.permute.xlu1 %854  ;;  %v473_v19 = vsel %vm324_vm1, %v472_v39, %v308_v58  ;;  %v474_v13 = vrot.slane %v308_v58, 4  ;;  %v970_v56 = vrot.slane %v931_v21, 4 }
 0x1a2   : > { %v896_v36 = vrot.slane %v855_v12, 4  ;;  %v899_v2 = vsel %vm324_vm1, %v855_v12, %v898_v35  ;;  %v479_v8 = vperm.slane %v473_v19, %v1652_v17 }
 0x1a3   : > { %v2045_v44 = vperm.slane %v899_v2, %v1652_v17  ;;  %v475_v33 = vsel %vm324_vm1, %v1711_v63, %v474_v13  ;;  %v910_v63 = vrot.slane %v2040_v18, 4 }
 0x1a4   : > { %v897_v30 = vsel %vm324_vm1, %v896_v36, %v843_v20  ;;  %v2055_v26 = vperm.slane %v475_v33, %v1652_v17  ;;  %v508_v51 = vrot.slane %v479_v8, 4  ;;  %v511_v22 = vsel %vm324_vm1, %v479_v8, %v510_v29 }
 0x1a5   : > { %v903_v24 = vperm.slane %v897_v30, %v1652_v17  ;;  %v2061_v28 = vperm.slane %v511_v22, %v1743_v45  ;;  %v947_v37 = vsel %vm324_vm1, %v2045_v44, %v946_v23  ;;  %v911_v11 = vsel %vm324_vm1, %v879_v55, %v910_v63 }
 0x1a6   : > { %v520_v46 = vrot.slane %v2055_v26, 4  ;;  %v509_v20 = vsel %vm324_vm1, %v508_v51, %v467_v60  ;;  %v955_v39 = vperm.slane %v947_v37, %v1743_v45  ;;  %v998_v8 = vrot.slane %v2030_v49, 4 }
 0x1a7   : > { %v935_v38 = vsel %vm324_vm1, %v903_v24, %v934_v14  ;;  %v2079_v12 = vsel %vm324_vm1, %v2061_v28, %v538_v7  ;;  %v932_v2 = vrot.slane %v903_v24, 4  ;;  %v2089_v7 = vperm.slane %v911_v11, %v1743_v45 }
 0x1a8   : > { %v2069_v35 = vpop.permute.xlu0 %844  ;;  %v521_v29 = vsel %vm324_vm1, %v520_v46, %v2016_v41  ;;  %v1125_v58 = vpop.permute.xlu2 %1124  ;;  %v2075_v52 = vperm.slane %v935_v38, %v1743_v45  ;;  %v971_v60 = vsel %vm324_vm1, %v955_v39, %v970_v56  ;;  %v968_v33 = vrot.slane %v955_v39, 4 }
 0x1a9   : > { %v1010_v19 = vrot.slane %v2069_v35, 4  ;;  %v527_v13 = vperm.slane %v521_v29, %v1743_v45  ;;  %v827_v36 = vpop.permute.xlu1 %826  ;;  %1178 = vrot.lane.b32.xlu0 %v971_v60, %s1536_s28  ;;  %v515_v51 = vperm.slane %v509_v20, %v1743_v45  ;;  %v542_v63 = vrot.slane %v503_v5, 4 }
 0x1aa   : > { %v960_v14 = vrot.slane %v2075_v52, 4  ;;  %v969_v24 = vsel %vm324_vm1, %v968_v33, %v931_v21  ;;  %v999_v39 = vsel %vm324_vm1, %v1998_v48, %v998_v8  ;;  %v933_v20 = vsel %vm324_vm1, %v932_v2, %v891_v6 }
 0x1ab   : > { %v1011_v23 = vsel %vm324_vm1, %v2002_v16, %v1010_v19  ;;  %v540_v30 = vrot.slane %v527_v13, 4  ;;  %1176 = vrot.lane.b32.xlu2 %v969_v24, %s1536_s28  ;;  %v543_v21 = vsel %vm324_vm1, %v527_v13, %v542_v63  ;;  %v908_v38 = vrot.slane %v879_v55, 4 }
 0x1ac   : > { %v2094_v22 = vperm.slane %v1011_v23, %v1652_v17  ;;  %v961_v37 = vsel %vm324_vm1, %v960_v14, %v2089_v7  ;;  %v491_v29 = vperm.slane %v1911_v27, %v1743_v45  ;;  %v972_v11 = vrot.slane %v827_v36, 4 }
 0x1ad   : > { %v541_v46 = vsel %vm324_vm1, %v540_v30, %v503_v5  ;;  %1168 = vrot.lane.b32.xlu1 %v961_v37, %s1536_s28  ;;  %v532_v19 = vrot.slane %v515_v51, 4  ;;  %v2115_v8 = vperm.slane %v999_v39, %v1652_v17  ;;  %v939_v33 = vperm.slane %v933_v20, %v1743_v45 }
 0x1ae   : > { %v2104_v56 = vsel %vm222_vm0, %v541_v46, %v1125_v58  ;;  %v1056_v5 = vrot.slane %v2094_v22, 4  ;;  %v974_v6 = vrot.slane %v1822_v10, 4  ;;  %v909_v13 = vsel %vm324_vm1, %v908_v38, %v2040_v18 }
 0x1af   : > { %v534_v2 = vrot.slane %v491_v29, 4  ;;  %v973_v23 = vsel %vm324_vm1, %v972_v11, %v1822_v10  ;;  %v2131_v24 = vsel %vm324_vm1, %v532_v19, %v491_v29  ;;  %v944_v63 = vrot.slane %v2045_v44, 4 }
 0x1b0   : > { %v2112_v60 = vpop.permute.xlu2 %1100  ;;  %v1057_v27 = vsel %vm324_vm1, %v1056_v5, %v2115_v8  ;;  %v975_v30 = vsel %vm324_vm1, %v827_v36, %v974_v6  ;;  %v956_v46 = vrot.slane %v939_v33, 4  ;;  %v996_v10 = vrot.slane %v1998_v48, 4 }
 0x1b1   : > { %v821_v58 = vpop.permute.xlu1 %820  ;;  %1108 = vrot.lane.b32.xlu0 %v1789_v32, %s1538_s30  ;;  %v984_v32 = vrot.slane %v1996_v0, 4  ;;  %v915_v36 = vperm.slane %v909_v13, %v1743_v45  ;;  %v1063_v37 = vperm.slane %v1057_v27, %v1743_v45  ;;  %v2149_v44 = vperm.slane %v973_v23, %v1652_v17 }
 0x1b2   : > { %v986_v55 = vrot.slane %v821_v58, 4  ;;  %v983_v39 = vperm.slane %v975_v30, %v1652_v17  ;;  %v507_v48 = vperm.slane %v1668_v31, %v1743_v45  ;;  %v1008_v38 = vrot.slane %v2002_v16, 4 }
 0x1b3   : > { %1128 = vrot.lane.b32.xlu2 %v1906_v50, %s1538_s30  ;;  %v985_v50 = vsel %vm324_vm1, %v984_v32, %v821_v58  ;;  %v957_v29 = vsel %vm324_vm1, %v956_v46, %v915_v36  ;;  %v945_v58 = vsel %vm324_vm1, %v944_v63, %v2028_v61  ;;  %v997_v31 = vsel %vm324_vm1, %v996_v10, %v2030_v49 }
 0x1b4   : > { %v987_v14 = vsel %vm324_vm1, %v1996_v0, %v986_v55  ;;  %v2146_v0 = vsel %vm324_vm1, %v515_v51, %v534_v2  ;;  %v962_v51 = vrot.slane %v2089_v7, 4  ;;  %v1076_v7 = vrot.slane %v1063_v37, 4 }
 0x1b5   : > { %v2136_v18 = vperm.slane %v987_v14, %v1652_v17  ;;  %1130 = vrot.lane.b32.xlu1 %v1896_v15, %s1538_s30  ;;  %v522_v15 = vrot.slane %v2016_v41, 4  ;;  %v991_v41 = vperm.slane %v985_v50, %v1652_v17  ;;  %v920_v6 = vrot.slane %v2011_v4, 4 }
 0x1b6   : > { %v1022_v55 = vrot.slane %v2149_v44, 4  ;;  %v2177_v61 = vperm.slane %v945_v58, %v1743_v45  ;;  %v2181_v49 = vsel %vm324_vm1, %v2075_v52, %v962_v51  ;;  %v1003_v2 = vperm.slane %v997_v31, %v1652_v17 }
 0x1b7   : > { %v1032_v20 = vrot.slane %v2136_v18, 4  ;;  %v523_v27 = vsel %vm324_vm1, %v2055_v26, %v522_v15  ;;  %v546_v23 = vrot.slane %v507_v48, 4  ;;  %v536_v30 = vrot.slane %v2061_v28, 4 }
 0x1b8   : > { %v1127_v5 = vpop.permute.xlu2 %1126  ;;  %v1023_v4 = vsel %vm324_vm1, %v991_v41, %v1022_v55  ;;  %v958_v14 = vrot.slane %v915_v36, 4  ;;  %v921_v26 = vsel %vm324_vm1, %v920_v6, %v2007_v25  ;;  %v964_v32 = vrot.slane %v2177_v61, 4  ;;  %v1249_v55 = vld [vmem:[%s2362_s2 + $0x20] sm:$0xff] }
 0x1b9   : > { %v2161_v11 = vsel %vm222_vm0, %v543_v21, %v1127_v5  ;;  %v1033_v19 = vsel %vm324_vm1, %v1032_v20, %v983_v39  ;;  %1164 = vrot.lane.b32.xlu0 %v957_v29, %s1536_s28  ;;  %v1009_v21 = vsel %vm324_vm1, %v1008_v38, %v2069_v35  ;;  %v531_v35 = vperm.slane %v523_v27, %v1743_v45 }
 0x1ba   : > { %v1039_v16 = vperm.slane %v1033_v19, %v1743_v45  ;;  %v1015_v52 = vperm.slane %v1009_v21, %v1652_v17  ;;  %v2201_v46 = vsel %vm324_vm1, %v536_v30, %v2025_v1  ;;  %v1046_v10 = vrot.slane %v1003_v2, 4  ;;  %v1250_v21 = vld [vmem:[%s2362_s2 + $0x28] sm:$0xff]  ;;  %v1245_v30 = vld [vmem:[%s2362_s2] sm:$0xff] }
 0x1bb   : > { %1104 = vrot.lane.b32.xlu2 %v1792_v34, %s1538_s30  ;;  %v544_v63 = vrot.slane %v531_v35, 4  ;;  %v2197_v34 = vsel %vm324_vm1, %v531_v35, %v546_v23  ;;  %v959_v50 = vsel %vm324_vm1, %v939_v33, %v958_v14  ;;  %v1031_v17 = vperm.slane %v1023_v4, %v1743_v45  ;;  %1489 = vmatpush.msra.mxu2 %v1250_v21 }
 0x1bc   : > { %v1077_v13 = vsel %vm324_vm1, %v1076_v7, %v1039_v16  ;;  %v1078_v28 = vrot.slane %v1039_v16, 4  ;;  %v1058_v36 = vrot.slane %v2115_v8, 4  ;;  %v927_v25 = vperm.slane %v921_v26, %v1743_v45  ;;  %1488 = vmatpush.msrb.mxu1 %v1250_v21  ;;  %1314 = vmatpush.msrb.mxu0 %v1250_v21  ;;  %v1113_v26 = vpop.permute.xlu0 %1112 }
 0x1bd   : > { %1188 = vrot.lane.b32.xlu1 %v1077_v13, %s1536_s28  ;;  %v2209_v20 = vsel %vm324_vm1, %v544_v63, %v507_v48  ;;  %v1047_v15 = vsel %vm324_vm1, %v1015_v52, %v1046_v10  ;;  %v1034_v38 = vrot.slane %v983_v39, 4  ;;  %v1074_v8 = vrot.slane %v1031_v17, 4  ;;  %v1248_v13 = vld [vmem:[%s2362_s2 + $0x18] sm:$0xff]  ;;  %1490 = vmatpush.msra.mxu3 %v1250_v21 }
 0x1be   : > { %v965_v1 = vsel %vm324_vm1, %v964_v32, %v927_v25  ;;  %v1059_v33 = vsel %vm324_vm1, %v2094_v22, %v1058_v36  ;;  %v1079_v5 = vsel %vm324_vm1, %v1063_v37, %v1078_v28  ;;  %v1055_v51 = vperm.slane %v1047_v15, %v1743_v45  ;;  %1492 = vmatpush.msra.mxu2 %v1249_v55 }
 0x1bf   : > { %v1035_v48 = vsel %vm324_vm1, %v2136_v18, %v1034_v38  ;;  %v1067_v29 = vperm.slane %v1059_v33, %v1743_v45  ;;  %v1044_v31 = vrot.slane %v1015_v52, 4  ;;  %v1020_v7 = vrot.slane %v991_v41, 4  ;;  %1491 = vmatpush.msrb.mxu1 %v1249_v55  ;;  %1315 = vmatpush.msrb.mxu0 %v1249_v55 }
 0x1c0   : > { %v1075_v39 = vsel %vm324_vm1, %v1055_v51, %v1074_v8  ;;  %v1043_v19 = vperm.slane %v1035_v48, %v1743_v45  ;;  %v1072_v22 = vrot.slane %v1055_v51, 4  ;;  %1495 = vmatpush.msra.mxu2 %v1248_v13  ;;  %1493 = vmatpush.msra.mxu3 %v1249_v55  ;;  %v1103_v14 = vpop.permute.xlu2 %1102  ;;  %v1218_v63 = vsel %vm222_vm0, %v1921_v47, %v1113_v26 }
 0x1c1   : > { %1166 = vrot.lane.b32.xlu0 %v959_v50, %s1536_s28  ;;  %v1080_v58 = vrot.slane %v1067_v29, 4  ;;  %v1045_v18 = vsel %vm324_vm1, %v1044_v31, %v1003_v2  ;;  %v1021_v6 = vsel %vm324_vm1, %v1020_v7, %v2149_v44  ;;  %v1247_v44 = vld [vmem:[%s2362_s2 + $0x10] sm:$0xff]  ;;  %v1246_v2 = vld [vmem:[%s2362_s2 + $0x8] sm:$0xff]  ;;  %1494 = vmatpush.msrb.mxu1 %v1248_v13 }
 0x1c2   : > { %v1073_v37 = vsel %vm324_vm1, %v1072_v22, %v1031_v17  ;;  %v1051_v41 = vperm.slane %v1045_v18, %v1743_v45  ;;  %1498 = vmatpush.msra.mxu2 %v1247_v44  ;;  %1316 = vmatpush.msrb.mxu0 %v1248_v13  ;;  %v1082_v23 = vrot.slane %v1043_v19, 4 }
 0x1c3   : > { %1172 = vrot.lane.b32.xlu2 %v965_v1, %s1536_s28  ;;  %v1081_v16 = vsel %vm324_vm1, %v1080_v58, %v1043_v19  ;;  %1497 = vmatpush.msrb.mxu1 %v1247_v44  ;;  %v1213_v19 = vsel %vm222_vm0, %v1936_v9, %v1103_v14 }
 0x1c4   : > { %v1068_v27 = vrot.slane %v1051_v41, 4  ;;  %1501 = vmatpush.msra.mxu2 %v1246_v2  ;;  %1317 = vmatpush.msrb.mxu0 %v1247_v44  ;;  %v1083_v52 = vsel %vm324_vm1, %v1067_v29, %v1082_v23 }
 0x1c5   : > { %1190 = vrot.lane.b32.xlu1 %v1079_v5, %s1536_s28  ;;  %1500 = vmatpush.msrb.mxu1 %v1246_v2 }
 0x1c6   : > { %1496 = vmatpush.msra.mxu3 %v1248_v13  ;;  %1318 = vmatpush.msrb.mxu0 %v1246_v2 }
 0x1c7   : > { %1504 = vmatpush.msra.mxu2 %v1245_v30  ;;  %1503 = vmatpush.msrb.mxu1 %v1245_v30 }
 0x1c8   : > { %1499 = vmatpush.msra.mxu3 %v1247_v44  ;;  %1319 = vmatpush.msrb.mxu0 %v1245_v30 }
 0x1c9   : > { %1186 = vrot.lane.b32.xlu0 %v1075_v39, %s1536_s28 }
 0x1ca   : > { %1502 = vmatpush.msra.mxu3 %v1246_v2 }
 0x1cb   : > { %1184 = vrot.lane.b32.xlu2 %v1073_v37, %s1536_s28 }
 0x1cc   : > { %1505 = vmatpush.msra.mxu3 %v1245_v30 }
 0x1cd   : > { %1192 = vrot.lane.b32.xlu1 %v1081_v16, %s1536_s28 }
 0x1d1   : > { %1120 = vrot.lane.b32.xlu0 %v1899_v3, %s1538_s30  ;;  %v1027_v3 = vperm.slane %v1021_v6, %v1743_v45 }
 0x1d3   : > { %1110 = vrot.lane.b32.xlu2 %v1810_v54, %s1538_s30  ;;  %v1069_v45 = vsel %vm324_vm1, %v1068_v27, %v1027_v3  ;;  %v966_v54 = vrot.slane %v927_v25, 4  ;;  %v1070_v4 = vrot.slane %v1027_v3, 4 }
 0x1d5   : > { %1106 = vrot.lane.b32.xlu1 %v1813_v57, %s1538_s30  ;;  %v967_v57 = vsel %vm324_vm1, %v2177_v61, %v966_v54  ;;  %v1071_v35 = vsel %vm324_vm1, %v1051_v41, %v1070_v4  ;;  %v1123_v61 = vpop.permute.xlu1 %1122 }
 0x1d6   : > { %v1223_v31 = vsel %vm222_vm0, %v2079_v12, %v1123_v61 }
 0x1d9   : > { %1180 = vrot.lane.b32.xlu0 %v1069_v45, %s1536_s28 }
 0x1dd   : > { %1174 = vrot.lane.b32.xlu1 %v967_v57, %s1536_s28  ;;  %v1115_v32 = vpop.permute.xlu1 %1114 }
 0x1e1   : > { %1182 = vrot.lane.b32.xlu0 %v1071_v35, %s1536_s28 }
 0x1e5   : > { %v1117_v28 = vpop.permute.xlu1 %1116 }
 0x1e9   : > { %1194 = vrot.lane.b32.xlu0 %v1083_v52, %s1536_s28 }
 0x1ed   : > { %v1119_v36 = vpop.permute.xlu1 %1118 }
 0x1f1   : > { %1170 = vrot.lane.b32.xlu0 %v2181_v49, %s1536_s28  ;;  %v1219_v49 = vsel %vm222_vm0, %v1939_v59, %v1115_v32  ;;  %v1212_v59 = vsel %vm222_vm0, %v1924_v43, %v2112_v60 }
 0x205   : > { %v1177_v10 = vpop.permute.xlu2 %1176 }
 0x206   : > { %v1235_v50 = vsel %vm1228_vm2, %v1218_v63, %v1177_v10 }
 0x207   : > { %1473 = vmatmul.msk.f32.vlgmr.msra.gmra.mxu2 %vm1255_vm3, %v1235_v50 }
 0x20d   : > { %v1129_v17 = vpop.permute.xlu2 %1128 }
 0x20e   : > { %v1226_v27 = vsel %vm222_vm0, %v2209_v20, %v1129_v17 }
 0x215   : > { %v1105_v25 = vpop.permute.xlu2 %1104 }
 0x216   : > { %v1214_v43 = vsel %vm222_vm0, %v1977_v40, %v1105_v25  ;;  %v1220_v40 = vsel %vm222_vm0, %v2131_v24, %v1117_v28  ;;  %v1221_v24 = vsel %vm222_vm0, %v2146_v0, %v1119_v36 }
 0x21b   : > { %v1179_v15 = vpop.permute.xlu0 %1178 }
 0x21c   : > { %v1236_v38 = vsel %vm1228_vm2, %v1219_v49, %v1179_v15 }
 0x21d   : > { %1474 = vmatmul.msk.f32.gmra.mxu2 %vm1255_vm3, %v1236_v38  ;;  %v1173_v47 = vpop.permute.xlu2 %1172 }
 0x21f   : > { %v1169_v1 = vpop.permute.xlu1 %1168 }
 0x220   : > { %v1231_v37 = vsel %vm1228_vm2, %v1214_v43, %v1169_v1 }
 0x223   : > { %v1109_v33 = vpop.permute.xlu0 %1108 }
 0x224   : > { %v1216_v5 = vsel %vm222_vm0, %v1980_v53, %v1109_v33 }
 0x225   : > { %v1233_v8 = vsel %vm1228_vm2, %v1216_v5, %v1173_v47  ;;  %v1185_v7 = vpop.permute.xlu2 %1184 }
 0x226   : > { %1471 = vmatmul.msk.f32.vlgmr.msrb.gmra.mxu1 %vm1255_vm3, %v1233_v8 }
 0x227   : > { %v1131_v51 = vpop.permute.xlu1 %1130 }
 0x228   : > { %v1227_v54 = vsel %vm222_vm0, %v2197_v34, %v1131_v51  ;;  %v1523_v34 = vld [vmem:[%s2363_s3] ss:$0 sm:$0xff] }
 0x22b   : > { %v1165_v48 = vpop.permute.xlu0 %1164 }
 0x22c   : > { %v1229_v29 = vsel %vm1228_vm2, %v1212_v59, %v1165_v48 }
 0x22d   : > { %1467 = vmatmul.msk.f32.vlgmr.msrb.gmra.mxu0 %vm1255_vm3, %v1229_v29  ;;  %v1111_v55 = vpop.permute.xlu2 %1110 }
 0x22f   : > { %v1189_v39 = vpop.permute.xlu1 %1188 }
 0x230   : > { %v1241_v6 = vsel %vm1228_vm2, %v2104_v56, %v1189_v39  ;;  %v1217_v56 = vsel %vm222_vm0, %v1983_v62, %v1111_v55 }
 0x233   : > { %v1167_v22 = vpop.permute.xlu0 %1166 }
 0x234   : > { %v1230_v53 = vsel %vm1228_vm2, %v1213_v19, %v1167_v22 }
 0x235   : > { %1468 = vmatmul.msk.f32.gmra.mxu0 %vm1255_vm3, %v1230_v53 }
 0x237   : > { %v1191_v58 = vpop.permute.xlu1 %1190 }
 0x238   : > { %v1242_v13 = vsel %vm1228_vm2, %v2161_v11, %v1191_v58 }
 0x23b   : > { %v1187_v60 = vpop.permute.xlu0 %1186 }
 0x23c   : > { %v1240_v16 = vsel %vm1228_vm2, %v1223_v31, %v1187_v60 }
 0x23d   : > { %1469 = vmatmul.msk.f32.gmra.mxu0 %vm1255_vm3, %v1231_v37  ;;  %1478 = vmatmul.msk.f32.vlgmr.msra.gmra.mxu3 %vm1255_vm3, %v1240_v16 }
 0x23f   : > { %v1193_v9 = vpop.permute.xlu1 %1192 }
 0x240   : > { %v1243_v45 = vsel %vm1228_vm2, %v1226_v27, %v1193_v9 }
 0x243   : > { %v1121_v18 = vpop.permute.xlu0 %1120 }
 0x244   : > { %v1222_v62 = vsel %vm222_vm0, %v2201_v46, %v1121_v18 }
 0x245   : > { %1479 = vmatmul.msk.f32.gmra.mxu3 %vm1255_vm3, %v1241_v6  ;;  %v1239_v57 = vsel %vm1228_vm2, %v1222_v62, %v1185_v7 }
 0x247   : > { %v1107_v12 = vpop.permute.xlu1 %1106 }
 0x248   : > { %v1215_v4 = vsel %vm222_vm0, %v1971_v42, %v1107_v12 }
 0x24b   : > { %v1181_v21 = vpop.permute.xlu0 %1180 }
 0x24c   : > { %v1237_v41 = vsel %vm1228_vm2, %v1220_v40, %v1181_v21 }
 0x24d   : > { %1475 = vmatmul.msk.f32.gmra.mxu2 %vm1255_vm3, %v1237_v41  ;;  %1480 = vmatmul.msk.f32.gmra.mxu3 %vm1255_vm3, %v1242_v13 }
 0x24f   : > { %v1175_v3 = vpop.permute.xlu1 %1174 }
 0x250   : > { %v1234_v44 = vsel %vm1228_vm2, %v1217_v56, %v1175_v3 }
 0x251   : > { %1472 = vmatmul.msk.f32.gmra.mxu1 %vm1255_vm3, %v1234_v44 }
 0x253   : > { %v1183_v2 = vpop.permute.xlu0 %1182 }
 0x254   : > { %v1238_v11 = vsel %vm1228_vm2, %v1221_v24, %v1183_v2 }
 0x255   : > { %1476 = vmatmul.msk.f32.gmra.mxu2 %vm1255_vm3, %v1238_v11  ;;  %1481 = vmatmul.msk.f32.gmra.mxu3 %vm1255_vm3, %v1243_v45 }
 0x25b   : > { %v1195_v0 = vpop.permute.xlu0 %1194 }
 0x25c   : > { %v1244_v20 = vsel %vm1228_vm2, %v1227_v54, %v1195_v0 }
 0x25d   : > { %1477 = vmatmul.msk.f32.gmra.mxu2 %vm1255_vm3, %v1239_v57  ;;  %1482 = vmatmul.msk.f32.gmra.mxu3 %vm1255_vm3, %v1244_v20 }
 0x263   : > { %v1171_v35 = vpop.permute.xlu0 %1170 }
 0x264   : > { %v1232_v23 = vsel %vm1228_vm2, %v1215_v4, %v1171_v35 }
 0x265   : > { %1470 = vmatmul.msk.f32.gmra.mxu0 %vm1255_vm3, %v1232_v23 }
 0x28a   : > { %v1339_v42 = vpop.f32.mrf.mxu2 }
 0x28b   : > { %v1340_v46 = vadd.f32 %v1523_v34, %v1339_v42 }
 0x28d   : > { %1375 = vst [vmem:[%s2339_s24 + $0x30] sm:$0xff] %v1340_v46 }
 0x2a0   : > { %v1342_v30 = vpop.f32.mrf.mxu2 }
 0x2a1   : > { %v1343_v52 = vadd.f32 %v1523_v34, %v1342_v30 }
 0x2a3   : > { %1376 = vst [vmem:[%s2339_s24 + $0x38] sm:$0xff] %v1343_v52  ;;  %v1333_v61 = vpop.f32.mrf.mxu1 }
 0x2a4   : > { %v1334_v14 = vadd.f32 %v1523_v34, %v1333_v61 }
 0x2a6   : > { %1373 = vst [vmem:[%s2339_s24 + $0x20] sm:$0xff] %v1334_v14 }
 0x2aa   : > { %v1321_v26 = vpop.f32.mrf.mxu0 }
 0x2ab   : > { %v1322_v32 = vadd.f32 %v1523_v34, %v1321_v26 }
 0x2ad   : > { %1369 = vst [vmem:[%s2339_s24] sm:$0xff] %v1322_v32 }
 0x2b2   : > { %v1324_v63 = vpop.f32.mrf.mxu0 }
 0x2b3   : > { %v1325_v10 = vadd.f32 %v1523_v34, %v1324_v63 }
 0x2b5   : > { %1370 = vst [vmem:[%s2339_s24 + $0x8] sm:$0xff] %v1325_v10 }
 0x2ba   : > { %v1327_v50 = vpop.f32.mrf.mxu0 }
 0x2bb   : > { %v1328_v28 = vadd.f32 %v1523_v34, %v1327_v50 }
 0x2bd   : > { %1371 = vst [vmem:[%s2339_s24 + $0x10] sm:$0xff] %v1328_v28 }
 0x2c0   : > { %v1354_v17 = vpop.f32.mrf.mxu3 }
 0x2c1   : > { %v1355_v36 = vadd.f32 %v1523_v34, %v1354_v17 }
 0x2c3   : > { %1380 = vst [vmem:[%s2339_s24 + $0x58] sm:$0xff] %v1355_v36 }
 0x2c8   : > { %v1357_v25 = vpop.f32.mrf.mxu3 }
 0x2c9   : > { %v1358_v49 = vadd.f32 %v1523_v34, %v1357_v25 }
 0x2cb   : > { %1381 = vst [vmem:[%s2339_s24 + $0x60] sm:$0xff] %v1358_v49 }
 0x2ce   : > { %v1336_v15 = vpop.f32.mrf.mxu1 }
 0x2cf   : > { %v1337_v38 = vadd.f32 %v1523_v34, %v1336_v15 }
 0x2d0   : > { %v1345_v1 = vpop.f32.mrf.mxu2  ;;  %v1360_v33 = vpop.f32.mrf.mxu3 }
 0x2d1   : > { %1374 = vst [vmem:[%s2339_s24 + $0x28] sm:$0xff] %v1337_v38  ;;  %v1346_v47 = vadd.f32 %v1523_v34, %v1345_v1  ;;  %v1361_v5 = vadd.f32 %v1523_v34, %v1360_v33 }
 0x2d3   : > { %1377 = vst [vmem:[%s2339_s24 + $0x40] sm:$0xff] %v1346_v47 }
 0x2d4   : > { %1382 = vst [vmem:[%s2339_s24 + $0x68] sm:$0xff] %v1361_v5 }
 0x2d8   : > { %v1348_v8 = vpop.f32.mrf.mxu2  ;;  %v1363_v51 = vpop.f32.mrf.mxu3 }
 0x2d9   : > { %v1349_v59 = vadd.f32 %v1523_v34, %v1348_v8  ;;  %v1364_v48 = vadd.f32 %v1523_v34, %v1363_v51 }
 0x2db   : > { %1378 = vst [vmem:[%s2339_s24 + $0x48] sm:$0xff] %v1349_v59 }
 0x2dc   : > { %1383 = vst [vmem:[%s2339_s24 + $0x70] sm:$0xff] %v1364_v48 }
 0x2e0   : > { %v1351_v29 = vpop.f32.mrf.mxu2  ;;  %v1366_v39 = vpop.f32.mrf.mxu3 }
 0x2e1   : > { %v1352_v19 = vadd.f32 %v1523_v34, %v1351_v29  ;;  %v1367_v22 = vadd.f32 %v1523_v34, %v1366_v39 }
 0x2e2   : > { %v1330_v53 = vpop.f32.mrf.mxu0 }
 0x2e3   : > { %1379 = vst [vmem:[%s2339_s24 + $0x50] sm:$0xff] %v1352_v19  ;;  %v1331_v58 = vadd.f32 %v1523_v34, %v1330_v53 }
 0x2e4   : > { %1384 = vst [vmem:[%s2339_s24 + $0x78] sm:$0xff] %v1367_v22 }
 0x2e5   : > { %1372 = vst [vmem:[%s2339_s24 + $0x18] sm:$0xff] %v1331_v58 }
 0x2e6 PF: > { %s14_s15 = sadd.s32 1, %s1530_s15  }
 0x2e7   : > { %p11_p4 = scmp.ge.s32.totalorder %s14_s15, 4  }
 0x2e9   :  { %13 = sbr.rel (!%p11_p4) target bundleno = 1 (0x1), region = 69 }

// kernel: cheb_lstm_forward.6
= control target key start
LH: loop header
LB: loop body
LE: loop exit
PB: predicated region body
PF: predicated region fallthrough
CT: control target
= control target key end

     0   :  { %s1627_s15 = smov 0   ;;  %s2375_s0 = inlined_call_operand.vmem [shape: f32[2,16,256], index: 0, kind: input, shape index: {}]   ;;  %s2376_s1 = inlined_call_operand.vmem [shape: f32[2,16,16], index: 1, kind: input, shape index: {}]   ;;  %s2377_s2 = inlined_call_operand.vmem [shape: f32[96,128], index: 2, kind: input, shape index: {}]   ;;  %s2378_s3 = inlined_call_operand.vmem [shape: f32[1,128], index: 3, kind: input, shape index: {}]   ;;  %s2379_s4 = inlined_call_operand.vmem [shape: f32[2,16,8,128], index: 4, kind: output, shape index: {}]  }
   0x1 LB: > { %s1499_s16 = sadd.s32 4294967295, %s1595_s15   ;;  %p1503_p0 = scmp.ge.s32.totalorder %s1595_s15, 1  ;;  %s1595_s15 = sphi %s1627_s15, %s14_s15  }
   0x2   : > { %p172_p1 = scmp.lt.s32.totalorder %s1595_s15, 3 }
   0x4   : > { %p173_p2 = pnand %p1503_p0, %p172_p1 }
   0x5   : > { %p203_p3 = scmp.lt.s32.totalorder (!%p173_p2), %s1499_s16, 1  ;;  %s1597_s25 = smov (!%p173_p2), 32  }
   0x6   : > { %176 = sbr.rel (%p173_p2) target bundleno = 739 (0x2e3), region = 36  ;;  %s1598_s26 = smov (!%p173_p2), 96  }
   0x7   : > { %s1599_s27 = smov (!%p173_p2), 64  }
   0xb   : > { %s2381_s16 = smov (!%p203_p3, %s1499_s16), 1  ;;  %vm224_vm0 = vcmask 130048   ;;  %v1600_v11 = vmov 1983009808   ;;  %vm372_vm1 = vcmask 1047556   ;;  %vm1252_vm2 = vcmask 261120  }
   0xc   : > { %s1536_s17 = sshll.u32 %s2381_s16, 5  ;;  %s1537_s21 = sshll.u32 %s2381_s16, 4  ;;  %v377_v12 = vunpack.c.l.s4 %v1600_v11  ;;  %v1601_v57 = vmov 1934713408   ;;  %vm1302_vm3 = vcmask 785408   ;;  %vm1269_vm4 = vcmask 523264  }
   0xd   : > { %s207_s20 = scalar_lea.vmem %s2375_s0, %s1536_s17  ;;  %s212_s24 = scalar_lea.vmem %s2376_s1, %s1537_s21  ;;  %v425_v58 = vunpack.c.l.s4 %v1601_v57 }
   0xe   : > { %v1641_v0 = vld [vmem:[%s207_s20 + $0x18] sm:$0xff]  ;;  %v1643_v1 = vld [vmem:[%s207_s20 + $0x8] sm:$0xff]  ;;  %v1646_v2 = vld [vmem:[%s207_s20 + $0x10] sm:$0xff]  ;;  %v1703_v15 = vunpack.c.0.s8 %v377_v12  ;;  %s1538_s28 = sshll.u32 %s2381_s16, 7 }
   0xf   : > { %268 = vmatpush.msra.mxu1 %v1641_v0  ;;  %245 = vmatpush.msra.mxu0 %v1646_v2  ;;  %v1653_v3 = vld [vmem:[%s207_s20] sm:$0xff]  ;;  %v1669_v5 = vld [vmem:[%s212_s24 + $0x8] sm:$0xff]  ;;  %v486_v19 = vrot.slane %v1646_v2, 4  ;;  %v510_v20 = vrot.slane %v1641_v0, 4  ;;  %v398_v11 = vrot.slane %v1643_v1, 4  ;;  %s2354_s7 = scalar_lea.vmem %s2379_s4, %s1538_s28 }
  0x10   : > { %v1655_v4 = vld [vmem:[%s212_s24] sm:$0xff]  ;;  %367 = vrot.lane.b32.xlu1 %v1641_v0, %s1597_s25  ;;  %355 = vrot.lane.b32.xlu0 %v1641_v0, %s1598_s26 }
  0x11   : > { %269 = vmatpush.msra.mxu1 %v1643_v1  ;;  %246 = vmatpush.msra.mxu0 %v1653_v3 }
  0x12   : > { %1512 = vmatmul.msk.f32.vlgmr.msra.gmra.mxu1 %vm224_vm0, %v1655_v4  ;;  %1510 = vmatmul.msk.f32.vlgmr.msra.gmra.mxu0 %vm224_vm0, %v1655_v4 }
  0x13   : > { %335 = vrot.lane.b32.xlu2 %v1646_v2, %s1598_s26 }
  0x18   : > { %361 = vrot.lane.b32.xlu1 %v1641_v0, %s1599_s27  ;;  %347 = vrot.lane.b32.xlu0 %v1646_v2, %s1597_s25 }
  0x1a   : > { %1513 = vmatmul.msk.f32.gmra.mxu1 %vm224_vm0, %v1669_v5  ;;  %1511 = vmatmul.msk.f32.gmra.mxu0 %vm224_vm0, %v1669_v5 }
  0x1b   : > { %341 = vrot.lane.b32.xlu2 %v1646_v2, %s1599_s27 }
  0x20   : > { %365 = vrot.lane.b32.xlu1 %v1643_v1, %s1597_s25  ;;  %353 = vrot.lane.b32.xlu0 %v1643_v1, %s1598_s26 }
  0x23   : > { %333 = vrot.lane.b32.xlu2 %v1653_v3, %s1598_s26 }
  0x28   : > { %359 = vrot.lane.b32.xlu1 %v1643_v1, %s1599_s27  ;;  %345 = vrot.lane.b32.xlu0 %v1653_v3, %s1597_s25 }
  0x2b   : > { %339 = vrot.lane.b32.xlu2 %v1653_v3, %s1599_s27 }
  0x6d   : > { %v336_v8 = vpop.permute.xlu2 %335 }
  0x6e   : > { %v498_v21 = vrot.slane %v336_v8, 4 }
  0x75   : > { %v342_v25 = vpop.permute.xlu2 %341 }
  0x76   : > { %v487_v27 = vsel %vm372_vm1, %v342_v25, %v486_v19  ;;  %v484_v49 = vrot.slane %v342_v25, 4 }
  0x77   : > { %v495_v30 = vperm.slane %v487_v27, %v1703_v15 }
  0x78   : > { %v485_v52 = vsel %vm372_vm1, %v484_v49, %v1646_v2 }
  0x79   : > { %v546_v35 = vrot.slane %v495_v30, 4  ;;  %v491_v54 = vperm.slane %v485_v52, %v1703_v15 }
  0x7b   : > { %v534_v60 = vrot.slane %v491_v54, 4 }
  0x7d   : > { %v334_v51 = vpop.permute.xlu2 %333 }
  0x82   : > { %v368_v9 = vpop.permute.xlu1 %367  ;;  %v356_v13 = vpop.permute.xlu0 %355 }
  0x83   : > { %v520_v10 = vrot.slane %v368_v9, 4  ;;  %v522_v14 = vrot.slane %v356_v13, 4 }
  0x85   : > { %v521_v16 = vsel %vm372_vm1, %v520_v10, %v356_v13  ;;  %v523_v17 = vsel %vm372_vm1, %v368_v9, %v522_v14  ;;  %v340_v61 = vpop.permute.xlu2 %339  ;;  %v386_v14 = vrot.slane %v334_v51, 4 }
  0x86   : > { %v531_v18 = vperm.slane %v523_v17, %v1703_v15  ;;  %v527_v59 = vperm.slane %v521_v16, %v1703_v15  ;;  %v371_v10 = vrot.slane %v340_v61, 4  ;;  %v374_v17 = vrot.slane %v1653_v3, 4 }
  0x88   : > { %v568_v24 = vrot.slane %v531_v18, 4  ;;  %v556_v9 = vrot.slane %v527_v59, 4 }
  0x8a   : > { %v362_v26 = vpop.permute.xlu1 %361  ;;  %v348_v29 = vpop.permute.xlu0 %347 }
  0x8b   : > { %v511_v28 = vsel %vm372_vm1, %v362_v26, %v510_v20  ;;  %v496_v32 = vrot.slane %v348_v29, 4  ;;  %v499_v33 = vsel %vm372_vm1, %v348_v29, %v498_v21  ;;  %v508_v50 = vrot.slane %v362_v26, 4 }
  0x8c   : > { %v519_v31 = vperm.slane %v511_v28, %v1703_v15  ;;  %v507_v34 = vperm.slane %v499_v33, %v1703_v15  ;;  %v373_v28 = vsel %vm372_vm1, %v371_v10, %v1653_v3 }
  0x8d   : > { %v497_v38 = vsel %vm372_vm1, %v496_v32, %v336_v8  ;;  %v509_v53 = vsel %vm372_vm1, %v508_v50, %v1641_v0 }
  0x8e   : > { %v569_v36 = vsel %vm372_vm1, %v568_v24, %v519_v31  ;;  %v570_v37 = vrot.slane %v519_v31, 4  ;;  %v544_v39 = vrot.slane %v507_v34, 4  ;;  %v547_v40 = vsel %vm372_vm1, %v507_v34, %v546_v35 }
  0x8f   : > { %v1693_v6 = vpop.f32.mrf.mxu1  ;;  %v1695_v7 = vpop.f32.mrf.mxu0  ;;  %v515_v55 = vperm.slane %v509_v53, %v1703_v15  ;;  %v503_v56 = vperm.slane %v497_v38, %v1703_v15 }
  0x90   : > { %630 = vrot.lane.b32.xlu1 %v1693_v6, %s1597_s25  ;;  %618 = vrot.lane.b32.xlu0 %v1693_v6, %s1598_s26  ;;  %v571_v41 = vsel %vm372_vm1, %v531_v18, %v570_v37  ;;  %v545_v42 = vsel %vm372_vm1, %v544_v39, %v495_v30 }
  0x91   : > { %610 = vrot.lane.b32.xlu2 %v1695_v7, %s1597_s25  ;;  %v558_v62 = vrot.slane %v515_v55, 4  ;;  %v532_v63 = vrot.slane %v503_v56, 4  ;;  %v535_v12 = vsel %vm372_vm1, %v503_v56, %v534_v60  ;;  %v557_v30 = vsel %vm372_vm1, %v556_v9, %v515_v55 }
  0x92   : > { %v366_v43 = vpop.permute.xlu1 %365  ;;  %v354_v45 = vpop.permute.xlu0 %353 }
  0x93   : > { %v408_v44 = vrot.slane %v366_v43, 4  ;;  %v410_v46 = vrot.slane %v354_v45, 4  ;;  %v533_v19 = vsel %vm372_vm1, %v532_v63, %v491_v54  ;;  %v559_v20 = vsel %vm372_vm1, %v527_v59, %v558_v62 }
  0x95   : > { %v1748_v47 = vsel %vm372_vm1, %v408_v44, %v354_v45  ;;  %v411_v48 = vsel %vm372_vm1, %v366_v43, %v410_v46  ;;  %v379_v44 = vperm.slane %v373_v28, %v1703_v15 }
  0x96   : > { %v419_v27 = vperm.slane %v411_v48, %v1703_v15  ;;  %v415_v56 = vperm.slane %v1748_v47, %v1703_v15 }
  0x97   : > { %v1710_v22 = vpop.f32.mrf.mxu1  ;;  %v1712_v23 = vpop.f32.mrf.mxu0  ;;  %v422_v62 = vrot.slane %v379_v44, 4 }
  0x98   : > { %314 = vmatpush.msra.mxu3 %v1710_v22  ;;  %624 = vrot.lane.b32.xlu0 %v1693_v6, %s1599_s27 }
  0x99   : > { %598 = vrot.lane.b32.xlu1 %v1695_v7, %s1598_s26  ;;  %291 = vmatpush.msra.mxu2 %v1712_v23 }
  0x9a   : > { %315 = vmatpush.msra.mxu3 %v1693_v6  ;;  %600 = vrot.lane.b32.xlu2 %v1712_v23, %s1598_s26  ;;  %v346_v8 = vpop.permute.xlu0 %345 }
  0x9b   : > { %1516 = vmatmul.msk.f32.vlgmr.msra.gmra.mxu3 %vm224_vm0, %v1655_v4  ;;  %292 = vmatpush.msra.mxu2 %v1695_v7  ;;  %v384_v18 = vrot.slane %v346_v8, 4  ;;  %v387_v37 = vsel %vm372_vm1, %v346_v8, %v386_v14 }
  0x9c   : > { %1514 = vmatmul.msk.f32.vlgmr.msra.gmra.mxu2 %vm224_vm0, %v1655_v4  ;;  %v1767_v4 = vunpack.c.0.s8 %v425_v58  ;;  %v395_v54 = vperm.slane %v387_v37, %v1703_v15  ;;  %v456_v58 = vrot.slane %v419_v27, 4 }
  0x9e   : > { %v575_v13 = vperm.slane %v569_v36, %v1767_v4  ;;  %v579_v21 = vperm.slane %v571_v41, %v1767_v4  ;;  %v555_v24 = vperm.slane %v547_v40, %v1767_v4  ;;  %v539_v25 = vperm.slane %v533_v19, %v1767_v4 }
  0x9f   : > { %v567_v26 = vperm.slane %v559_v20, %v1767_v4  ;;  %v551_v31 = vperm.slane %v545_v42, %v1767_v4  ;;  %v563_v32 = vperm.slane %v557_v30, %v1767_v4  ;;  %v385_v36 = vsel %vm372_vm1, %v384_v18, %v334_v51 }
  0xa0   : > { %620 = vrot.lane.b32.xlu0 %v1710_v22, %s1598_s26  ;;  %v582_v33 = vrot.slane %v539_v25, 4  ;;  %v543_v38 = vperm.slane %v535_v12, %v1767_v4  ;;  %v592_v41 = vrot.slane %v579_v21, 4  ;;  %v375_v42 = vsel %vm372_vm1, %v340_v61, %v374_v17 }
  0xa1   : > { %604 = vrot.lane.b32.xlu1 %v1695_v7, %s1599_s27  ;;  %v584_v34 = vrot.slane %v567_v26, 4  ;;  %v580_v39 = vrot.slane %v563_v32, 4  ;;  %v590_v43 = vrot.slane %v551_v31, 4  ;;  %v588_v48 = vrot.slane %v575_v13, 4 }
  0xa2   : > { %612 = vrot.lane.b32.xlu2 %v1712_v23, %s1597_s25  ;;  %v1792_v40 = vsel %vm372_vm1, %v563_v32, %v582_v33  ;;  %v1804_v50 = vsel %vm372_vm1, %v592_v41, %v555_v24  ;;  %v391_v53 = vperm.slane %v385_v36, %v1703_v15  ;;  %v586_v55 = vrot.slane %v543_v38, 4 }
  0xa3   : > { %1517 = vmatmul.msk.f32.gmra.mxu3 %vm224_vm0, %v1669_v5  ;;  %v1798_v46 = vsel %vm372_vm1, %v584_v34, %v543_v38  ;;  %v1801_v49 = vsel %vm372_vm1, %v580_v39, %v539_v25  ;;  %v1807_v51 = vsel %vm372_vm1, %v575_v13, %v590_v43  ;;  %v1815_v57 = vsel %vm372_vm1, %v588_v48, %v551_v31 }
  0xa4   : > { %1515 = vmatmul.msk.f32.gmra.mxu2 %vm224_vm0, %v1669_v5  ;;  %v360_v5 = vpop.permute.xlu1 %359  ;;  %v383_v59 = vperm.slane %v375_v42, %v1703_v15  ;;  %v1819_v60 = vsel %vm372_vm1, %v567_v26, %v586_v55  ;;  %v594_v61 = vrot.slane %v555_v24, 4  ;;  %v420_v8 = vrot.slane %v391_v53, 4 }
  0xa5   : > { %v396_v16 = vrot.slane %v360_v5, 4  ;;  %v399_v29 = vsel %vm372_vm1, %v360_v5, %v398_v11  ;;  %v432_v9 = vrot.slane %v395_v54, 4  ;;  %v444_v11 = vrot.slane %v415_v56, 4 }
  0xa6   : > { %v407_v45 = vperm.slane %v399_v29, %v1703_v15  ;;  %v1822_v10 = vsel %vm372_vm1, %v579_v21, %v594_v61  ;;  %v434_v47 = vrot.slane %v383_v59, 4  ;;  %v423_v14 = vsel %vm372_vm1, %v391_v53, %v422_v62 }
  0xa7   : > { %v397_v35 = vsel %vm372_vm1, %v396_v16, %v1643_v1  ;;  %v433_v17 = vsel %vm372_vm1, %v432_v9, %v383_v59  ;;  %v421_v18 = vsel %vm372_vm1, %v420_v8, %v379_v44  ;;  %v431_v26 = vperm.slane %v423_v14, %v1767_v4 }
  0xa8   : > { %632 = vrot.lane.b32.xlu0 %v1710_v22, %s1597_s25  ;;  %v403_v52 = vperm.slane %v397_v35, %v1703_v15  ;;  %v458_v63 = vrot.slane %v407_v45, 4  ;;  %v457_v12 = vsel %vm372_vm1, %v456_v58, %v407_v45  ;;  %v427_v21 = vperm.slane %v421_v18, %v1767_v4 }
  0xa9   : > { %606 = vrot.lane.b32.xlu1 %v1712_v23, %s1599_s27  ;;  %v463_v19 = vperm.slane %v457_v12, %v1767_v4  ;;  %v435_v25 = vsel %vm372_vm1, %v395_v54, %v434_v47  ;;  %v439_v28 = vperm.slane %v433_v17, %v1767_v4  ;;  %v474_v42 = vrot.slane %v431_v26, 4 }
  0xaa   : > { %v446_v5 = vrot.slane %v403_v52, 4  ;;  %v459_v13 = vsel %vm372_vm1, %v419_v27, %v458_v63  ;;  %v445_v27 = vsel %vm372_vm1, %v444_v11, %v403_v52  ;;  %v470_v31 = vrot.slane %v427_v21, 4 }
  0xab   : > { %v467_v24 = vperm.slane %v459_v13, %v1767_v4  ;;  %v451_v30 = vperm.slane %v445_v27, %v1767_v4  ;;  %v478_v35 = vrot.slane %v439_v28, 4  ;;  %v443_v36 = vperm.slane %v435_v25, %v1767_v4 }
  0xac   : > { %v447_v16 = vsel %vm372_vm1, %v415_v56, %v446_v5  ;;  %v476_v38 = vrot.slane %v463_v19, 4  ;;  %v662_v63 = vrot.slane %v1693_v6, 4  ;;  %v638_v17 = vrot.slane %v1695_v7, 4 }
  0xad   : > { %v455_v20 = vperm.slane %v447_v16, %v1767_v4  ;;  %v468_v33 = vrot.slane %v451_v30, 4  ;;  %v1843_v34 = vsel %vm372_vm1, %v451_v30, %v470_v31  ;;  %v480_v37 = vrot.slane %v467_v24, 4 }
  0xae   : > { %v1850_v41 = vsel %vm372_vm1, %v463_v19, %v478_v35  ;;  %v1856_v44 = vsel %vm372_vm1, %v476_v38, %v439_v28  ;;  %v482_v45 = vrot.slane %v443_v36, 4  ;;  %v750_v31 = vrot.slane %v1712_v23, 4 }
  0xaf   : > { %v472_v29 = vrot.slane %v455_v20, 4  ;;  %v1847_v39 = vsel %vm372_vm1, %v468_v33, %v427_v21  ;;  %v1853_v43 = vsel %vm372_vm1, %v480_v37, %v443_v36  ;;  %v1859_v48 = vsel %vm372_vm1, %v455_v20, %v474_v42 }
  0xb0   : > { %626 = vrot.lane.b32.xlu0 %v1710_v22, %s1599_s27  ;;  %v1862_v52 = vsel %vm372_vm1, %v467_v24, %v482_v45 }
  0xb1   : > { %v1840_v32 = vsel %vm372_vm1, %v472_v29, %v431_v26 }
  0xeb   : > { %v611_v53 = vpop.permute.xlu2 %610 }
  0xec   : > { %v648_v27 = vrot.slane %v611_v53, 4 }
  0xf4   : > { %v601_v56 = vpop.permute.xlu2 %600 }
  0xf5   : > { %v762_v5 = vrot.slane %v601_v56, 4 }
  0xfc   : > { %v613_v61 = vpop.permute.xlu2 %612 }
  0xfd   : > { %v760_v11 = vrot.slane %v613_v61, 4  ;;  %v763_v18 = vsel %vm372_vm1, %v613_v61, %v762_v5 }
  0xfe   : > { %v771_v30 = vperm.slane %v763_v18, %v1703_v15 }
  0xff   : > { %v761_v25 = vsel %vm372_vm1, %v760_v11, %v601_v56 }
 0x100   : > { %v767_v35 = vperm.slane %v761_v25, %v1703_v15 }
 0x102   : > { %v631_v54 = vpop.permute.xlu1 %630  ;;  %v619_v55 = vpop.permute.xlu0 %618 }
 0x103   : > { %v672_v9 = vrot.slane %v631_v54, 4  ;;  %v674_v16 = vrot.slane %v619_v55, 4 }
 0x105   : > { %v673_v24 = vsel %vm372_vm1, %v672_v9, %v619_v55  ;;  %v675_v29 = vsel %vm372_vm1, %v631_v54, %v674_v16 }
 0x106   : > { %v1891_v33 = vperm.slane %v673_v24, %v1703_v15  ;;  %v808_v24 = vrot.slane %v771_v30, 4 }
 0x10a   : > { %v625_v58 = vpop.permute.xlu0 %624 }
 0x10b   : > { %v599_v59 = vpop.permute.xlu1 %598  ;;  %v660_v62 = vrot.slane %v625_v58, 4  ;;  %v663_v47 = vsel %vm372_vm1, %v625_v58, %v662_v63  ;;  %v1899_v58 = vperm.slane %v675_v29, %v1703_v15 }
 0x10c   : > { %v1871_v19 = vperm.slane %v663_v47, %v1703_v15  ;;  %v650_v26 = vrot.slane %v599_v59, 4  ;;  %v649_v37 = vsel %vm372_vm1, %v648_v27, %v599_v59 }
 0x10d   : > { %v661_v13 = vsel %vm372_vm1, %v660_v62, %v1693_v6  ;;  %v1904_v5 = vperm.slane %v649_v37, %v1703_v15 }
 0x10e   : > { %v1879_v6 = vperm.slane %v661_v13, %v1703_v15  ;;  %v722_v36 = vrot.slane %v1871_v19, 4  ;;  %v651_v45 = vsel %vm372_vm1, %v611_v53, %v650_v26 }
 0x10f   : > { %v1910_v11 = vperm.slane %v651_v45, %v1703_v15 }
 0x110   : > { %v710_v42 = vrot.slane %v1879_v6, 4 }
 0x112   : > { %v621_v8 = vpop.permute.xlu0 %620 }
 0x113   : > { %v605_v12 = vpop.permute.xlu1 %604  ;;  %v786_v54 = vrot.slane %v621_v8, 4 }
 0x114   : > { %v636_v14 = vrot.slane %v605_v12, 4  ;;  %v639_v21 = vsel %vm372_vm1, %v605_v12, %v638_v17 }
 0x116   : > { %v637_v20 = vsel %vm372_vm1, %v636_v14, %v1695_v7  ;;  %v1887_v7 = vperm.slane %v639_v21, %v1703_v15  ;;  %v723_v14 = vsel %vm372_vm1, %v1899_v58, %v722_v36  ;;  %v711_v21 = vsel %vm372_vm1, %v1891_v33, %v710_v42 }
 0x117   : > { %v1882_v28 = vperm.slane %v637_v20, %v1703_v15  ;;  %v796_v36 = vrot.slane %v767_v35, 4  ;;  %v1931_v42 = vperm.slane %v723_v14, %v1767_v4  ;;  %v1934_v45 = vperm.slane %v711_v21, %v1767_v4 }
 0x118   : > { %v698_v59 = vrot.slane %v1887_v7, 4 }
 0x119   : > { %v686_v61 = vrot.slane %v1882_v28, 4 }
 0x11a   : > { %v633_v38 = vpop.permute.xlu0 %632 }
 0x11b   : > { %v784_v55 = vrot.slane %v633_v38, 4  ;;  %v607_v56 = vpop.permute.xlu1 %606  ;;  %v787_v9 = vsel %vm372_vm1, %v633_v38, %v786_v54 }
 0x11c   : > { %v748_v62 = vrot.slane %v607_v56, 4  ;;  %v751_v63 = vsel %vm372_vm1, %v607_v56, %v750_v31  ;;  %v795_v25 = vperm.slane %v787_v9, %v1703_v15  ;;  %v699_v31 = vsel %vm372_vm1, %v1910_v11, %v698_v59 }
 0x11d   : > { %v759_v53 = vperm.slane %v751_v63, %v1703_v15  ;;  %v785_v47 = vsel %vm372_vm1, %v784_v55, %v621_v8  ;;  %v774_v8 = vrot.slane %v1710_v22, 4  ;;  %v1945_v63 = vperm.slane %v699_v31, %v1767_v4 }
 0x11e   : > { %v749_v12 = vsel %vm372_vm1, %v748_v62, %v1712_v23  ;;  %v317_v13 = vpop.f32.mrf.mxu3  ;;  %v687_v23 = vsel %vm372_vm1, %v1904_v5, %v686_v61  ;;  %v791_v26 = vperm.slane %v785_v47, %v1703_v15  ;;  %v832_v61 = vrot.slane %v795_v25, 4 }
 0x11f   : > { %v755_v17 = vperm.slane %v749_v12, %v1703_v15  ;;  %v810_v16 = vrot.slane %v759_v53, 4  ;;  %v324_v18 = vmul.f32 2.0, %v317_v13  ;;  %v294_v20 = vpop.f32.mrf.mxu2  ;;  %v1941_v56 = vperm.slane %v687_v23, %v1767_v4 }
 0x120   : > { %v323_v38 = vmul.f32 2.0, %v294_v20  ;;  %v820_v9 = vrot.slane %v791_v26, 4  ;;  %v809_v12 = vsel %vm372_vm1, %v808_v24, %v759_v53 }
 0x121   : > { %v798_v27 = vrot.slane %v755_v17, 4  ;;  %v1926_v29 = vsub.f32 %v324_v18, %v1643_v1  ;;  %v811_v1 = vsel %vm372_vm1, %v771_v30, %v810_v16  ;;  %v797_v13 = vsel %vm372_vm1, %v796_v36, %v755_v17 }
 0x122   : > { %v627_v37 = vpop.permute.xlu0 %626  ;;  %v1955_v18 = vperm.slane %v811_v1, %v1767_v4  ;;  %v1958_v20 = vsub.f32 %v323_v38, %v1653_v3  ;;  %v815_v23 = vperm.slane %v809_v12, %v1767_v4  ;;  %v803_v3 = vperm.slane %v797_v13, %v1767_v4 }
 0x123   : > { %v772_v54 = vrot.slane %v627_v37, 4  ;;  %v775_v55 = vsel %vm372_vm1, %v627_v37, %v774_v8  ;;  %882 = vrot.lane.b32.xlu2 %v1926_v29, %s1598_s26  ;;  %v799_v59 = vsel %vm372_vm1, %v767_v35, %v798_v27  ;;  %v746_v8 = vrot.slane %v1945_v63, 4 }
 0x124   : > { %v783_v62 = vperm.slane %v775_v55, %v1703_v15  ;;  %v1962_v21 = vperm.slane %v799_v59, %v1767_v4  ;;  %v858_v38 = vrot.slane %v1955_v18, 4 }
 0x125   : > { %v773_v47 = vsel %vm372_vm1, %v772_v54, %v1710_v22  ;;  %v738_v22 = vrot.slane %v1941_v56, 4 }
 0x126   : > { %v779_v30 = vperm.slane %v773_v47, %v1703_v15  ;;  %v833_v14 = vsel %vm372_vm1, %v832_v61, %v783_v62  ;;  %v834_v16 = vrot.slane %v783_v62, 4  ;;  %v850_v61 = vrot.slane %v1962_v21, 4  ;;  %v320_v12 = vpop.f32.mrf.mxu3 }
 0x127   : > { %v839_v35 = vperm.slane %v833_v14, %v1767_v4  ;;  %v1976_v54 = vsel %vm372_vm1, %v1934_v45, %v738_v22  ;;  %v1991_v62 = vsel %vm372_vm1, %v1931_v42, %v746_v8  ;;  %v297_v47 = vpop.f32.mrf.mxu2  ;;  %v720_v22 = vrot.slane %v1899_v58, 4 }
 0x128   : > { %v822_v53 = vrot.slane %v779_v30, 4  ;;  %v821_v17 = vsel %vm372_vm1, %v820_v9, %v779_v30  ;;  %v835_v24 = vsel %vm372_vm1, %v795_v25, %v834_v16  ;;  %v325_v13 = vmul.f32 2.0, %v297_v47 }
 0x129   : > { %v852_v27 = vrot.slane %v839_v35, 4  ;;  %v827_v31 = vperm.slane %v821_v17, %v1767_v4  ;;  %v843_v36 = vperm.slane %v835_v24, %v1767_v4  ;;  %v326_v30 = vmul.f32 2.0, %v320_v12 }
 0x12a   : > { %v823_v37 = vsel %vm372_vm1, %v791_v26, %v822_v53  ;;  %v2006_v14 = vsub.f32 %v325_v13, %v1646_v2  ;;  %v721_v53 = vsel %vm372_vm1, %v720_v22, %v1871_v19  ;;  %v696_v2 = vrot.slane %v1910_v11, 4 }
 0x12b   : > { %874 = vrot.lane.b32.xlu2 %v1958_v20, %s1597_s25  ;;  %v853_v25 = vsel %vm372_vm1, %v852_v27, %v815_v23  ;;  %v844_v55 = vrot.slane %v827_v31, 4  ;;  %v1982_v1 = vperm.slane %v823_v37, %v1767_v4  ;;  %v1987_v26 = vsel %vm372_vm1, %v843_v36, %v858_v38 }
 0x12c   : > { %1164 = vrot.lane.b32.xlu1 %v853_v25, %s1597_s25  ;;  %v2009_v16 = vsub.f32 %v326_v30, %v1641_v0  ;;  %v697_v0 = vsel %vm372_vm1, %v696_v2, %v1887_v7  ;;  %v727_v17 = vperm.slane %v721_v53, %v1767_v4  ;;  %v708_v19 = vrot.slane %v1891_v33, 4 }
 0x12d   : > { %v845_v59 = vsel %vm372_vm1, %v844_v55, %v803_v3  ;;  %v1996_v9 = vsel %vm372_vm1, %v1982_v1, %v850_v61  ;;  %v703_v58 = vperm.slane %v697_v0, %v1767_v4  ;;  %v684_v11 = vrot.slane %v1904_v5, 4 }
 0x12e   : > { %1156 = vrot.lane.b32.xlu0 %v845_v59, %s1597_s25  ;;  %v740_v24 = vrot.slane %v727_v17, 4  ;;  %v709_v27 = vsel %vm372_vm1, %v708_v19, %v1879_v6  ;;  %v854_v37 = vrot.slane %v815_v23, 4  ;;  %v846_v25 = vrot.slane %v803_v3, 4 }
 0x12f   : > { %v685_v7 = vsel %vm372_vm1, %v684_v11, %v1882_v28  ;;  %v715_v5 = vperm.slane %v709_v27, %v1767_v4  ;;  %v742_v59 = vrot.slane %v703_v58, 4  ;;  %v848_v13 = vrot.slane %v1982_v1, 4 }
 0x130   : > { %v741_v8 = vsel %vm372_vm1, %v740_v24, %v703_v58  ;;  %v855_v38 = vsel %vm372_vm1, %v839_v35, %v854_v37  ;;  %v691_v33 = vperm.slane %v685_v7, %v1767_v4  ;;  %v847_v61 = vsel %vm372_vm1, %v827_v31, %v846_v25 }
 0x131   : > { %v732_v55 = vrot.slane %v715_v5, 4  ;;  %v856_v35 = vrot.slane %v843_v36, 4  ;;  %v743_v3 = vsel %vm372_vm1, %v727_v17, %v742_v59  ;;  %v744_v31 = vrot.slane %v1931_v42, 4 }
 0x132   : > { %v734_v28 = vrot.slane %v691_v33, 4  ;;  %v736_v36 = vrot.slane %v1934_v45, 4  ;;  %v849_v30 = vsel %vm372_vm1, %v848_v13, %v1962_v21  ;;  %v926_v59 = vrot.slane %v1926_v29, 4 }
 0x133   : > { %868 = vrot.lane.b32.xlu2 %v1958_v20, %s1599_s27  ;;  %v733_v6 = vsel %vm372_vm1, %v732_v55, %v691_v33  ;;  %v857_v47 = vsel %vm372_vm1, %v856_v35, %v1955_v18  ;;  %v745_v12 = vsel %vm372_vm1, %v744_v31, %v1945_v63 }
 0x134   : > { %862 = vrot.lane.b32.xlu1 %v1958_v20, %s1598_s26  ;;  %v735_v23 = vsel %vm372_vm1, %v715_v5, %v734_v28  ;;  %v737_v18 = vsel %vm372_vm1, %v736_v36, %v1941_v56  ;;  %v902_v28 = vrot.slane %v1958_v20, 4 }
 0x136   : > { %894 = vrot.lane.b32.xlu0 %v1926_v29, %s1597_s25 }
 0x13b   : > { %876 = vrot.lane.b32.xlu2 %v2006_v14, %s1597_s25 }
 0x13c   : > { %884 = vrot.lane.b32.xlu1 %v2009_v16, %s1598_s26 }
 0x13e   : > { %888 = vrot.lane.b32.xlu0 %v1926_v29, %s1599_s27 }
 0x143   : > { %870 = vrot.lane.b32.xlu2 %v2006_v14, %s1599_s27 }
 0x144   : > { %896 = vrot.lane.b32.xlu1 %v2009_v16, %s1597_s25 }
 0x146   : > { %890 = vrot.lane.b32.xlu0 %v2009_v16, %s1599_s27 }
 0x14b   : > { %1148 = vrot.lane.b32.xlu2 %v741_v8, %s1597_s25 }
 0x14c   : > { %864 = vrot.lane.b32.xlu1 %v2006_v14, %s1598_s26 }
 0x14e   : > { %1166 = vrot.lane.b32.xlu0 %v855_v38, %s1597_s25 }
 0x153   : > { %1158 = vrot.lane.b32.xlu2 %v847_v61, %s1597_s25 }
 0x154   : > { %1140 = vrot.lane.b32.xlu1 %v733_v6, %s1597_s25 }
 0x156   : > { %1142 = vrot.lane.b32.xlu0 %v735_v23, %s1597_s25 }
 0x15b   : > { %1168 = vrot.lane.b32.xlu2 %v857_v47, %s1597_s25 }
 0x15c   : > { %1150 = vrot.lane.b32.xlu1 %v743_v3, %s1597_s25 }
 0x15e   : > { %1152 = vrot.lane.b32.xlu0 %v745_v12, %s1597_s25 }
 0x163   : > { %1144 = vrot.lane.b32.xlu2 %v737_v18, %s1597_s25 }
 0x164   : > { %1160 = vrot.lane.b32.xlu1 %v849_v30, %s1597_s25 }
 0x17d   : > { %v883_v42 = vpop.permute.xlu2 %882 }
 0x17e   : > { %v938_v27 = vrot.slane %v883_v42, 4 }
 0x185   : > { %v875_v22 = vpop.permute.xlu2 %874 }
 0x186   : > { %v912_v21 = vrot.slane %v875_v22, 4 }
 0x18d   : > { %v869_v53 = vpop.permute.xlu2 %868 }
 0x18e   : > { %v900_v19 = vrot.slane %v869_v53, 4  ;;  %v903_v47 = vsel %vm372_vm1, %v869_v53, %v902_v28 }
 0x18f   : > { %v2115_v30 = vperm.slane %v903_v47, %v1703_v15 }
 0x195   : > { %v2068_v63 = vpop.permute.xlu2 %876 }
 0x19d   : > { %v2070_v2 = vpop.permute.xlu2 %870 }
 0x19e   : > { %v1165_v1 = vpop.permute.xlu1 %1164  ;;  %v1012_v28 = vrot.slane %v2070_v2, 4 }
 0x19f   : > { %v2074_v45 = vsel %vm1252_vm2, %v1815_v57, %v1165_v1 }
 0x1a0   : > { %v1157_v56 = vpop.permute.xlu0 %1156 }
 0x1a1   : > { %v2078_v0 = vsel %vm1252_vm2, %v1801_v49, %v1157_v56  ;;  %v901_v49 = vsel %vm372_vm1, %v900_v19, %v1958_v20  ;;  %v1014_v19 = vrot.slane %v2006_v14, 4 }
 0x1a2   : > { %v907_v61 = vperm.slane %v901_v49, %v1703_v15 }
 0x1a5   : > { %v2080_v17 = vpop.permute.xlu2 %1148 }
 0x1a6   : > { %v863_v58 = vpop.permute.xlu1 %862 }
 0x1a7   : > { %v913_v11 = vsel %vm372_vm1, %v912_v21, %v863_v58  ;;  %v914_v24 = vrot.slane %v863_v58, 4  ;;  %v1038_v21 = vrot.slane %v2009_v16, 4  ;;  %v950_v58 = vrot.slane %v907_v61, 4 }
 0x1a8   : > { %v2084_v8 = vperm.slane %v913_v11, %v1703_v15  ;;  %v895_v7 = vpop.permute.xlu0 %894 }
 0x1a9   : > { %v936_v57 = vrot.slane %v895_v7, 4  ;;  %v915_v37 = vsel %vm372_vm1, %v875_v22, %v914_v24  ;;  %v939_v38 = vsel %vm372_vm1, %v895_v7, %v938_v27 }
 0x1aa   : > { %v948_v33 = vrot.slane %v2084_v8, 4  ;;  %v2092_v5 = vperm.slane %v915_v37, %v1703_v15  ;;  %v2098_v6 = vperm.slane %v939_v38, %v1703_v15 }
 0x1ab   : > { %v937_v25 = vsel %vm372_vm1, %v936_v57, %v883_v42 }
 0x1ac   : > { %v943_v3 = vperm.slane %v937_v25, %v1703_v15  ;;  %v949_v12 = vsel %vm372_vm1, %v948_v33, %v907_v61  ;;  %v960_v20 = vrot.slane %v2092_v5, 4  ;;  %v984_v18 = vrot.slane %v2098_v6, 4 }
 0x1ad   : > { %v1159_v55 = vpop.permute.xlu2 %1158  ;;  %v955_v22 = vperm.slane %v949_v12, %v1767_v4 }
 0x1ae   : > { %v2102_v23 = vsel %vm1252_vm2, %v1792_v40, %v1159_v55  ;;  %v885_v35 = vpop.permute.xlu1 %884  ;;  %v972_v53 = vrot.slane %v943_v3, 4  ;;  %v961_v24 = vsel %vm372_vm1, %v960_v20, %v2115_v30 }
 0x1af   : > { %v998_v25 = vrot.slane %v955_v22, 4  ;;  %v967_v47 = vperm.slane %v961_v24, %v1767_v4 }
 0x1b0   : > { %v889_v31 = vpop.permute.xlu0 %888 }
 0x1b1   : > { %v924_v13 = vrot.slane %v889_v31, 4  ;;  %v927_v36 = vsel %vm372_vm1, %v889_v31, %v926_v59 }
 0x1b2   : > { %v2112_v40 = vperm.slane %v927_v36, %v1703_v15  ;;  %v1015_v36 = vsel %vm372_vm1, %v2070_v2, %v1014_v19  ;;  %v1024_v19 = vrot.slane %v2068_v63, 4 }
 0x1b3   : > { %v925_v42 = vsel %vm372_vm1, %v924_v13, %v1926_v29  ;;  %v1050_v29 = vrot.slane %v885_v35, 4 }
 0x1b4   : > { %v931_v1 = vperm.slane %v925_v42, %v1703_v15  ;;  %v985_v56 = vsel %vm372_vm1, %v984_v18, %v2112_v40 }
 0x1b5   : > { %v1169_v11 = vpop.permute.xlu2 %1168  ;;  %v991_v7 = vperm.slane %v985_v56, %v1767_v4 }
 0x1b6   : > { %v974_v27 = vrot.slane %v931_v1, 4  ;;  %v2130_v57 = vsel %vm1252_vm2, %v1804_v50, %v1169_v11  ;;  %v897_v37 = vpop.permute.xlu1 %896  ;;  %v973_v49 = vsel %vm372_vm1, %v972_v53, %v931_v1 }
 0x1b7   : > { %v1048_v38 = vrot.slane %v897_v37, 4  ;;  %v979_v33 = vperm.slane %v973_v49, %v1767_v4  ;;  %v1004_v55 = vrot.slane %v991_v7, 4  ;;  %v1051_v61 = vsel %vm372_vm1, %v897_v37, %v1050_v29 }
 0x1b8   : > { %v891_v59 = vpop.permute.xlu0 %890  ;;  %v975_v31 = vsel %vm372_vm1, %v943_v3, %v974_v27  ;;  %v1059_v3 = vperm.slane %v1051_v61, %v1703_v15  ;;  %v951_v29 = vsel %vm372_vm1, %v2084_v8, %v950_v58  ;;  %v1023_v27 = vperm.slane %v1015_v36, %v1703_v15 }
 0x1b9   : > { %v1049_v50 = vsel %vm372_vm1, %v1048_v38, %v885_v35  ;;  %v1036_v12 = vrot.slane %v891_v59, 4  ;;  %v1039_v20 = vsel %vm372_vm1, %v891_v59, %v1038_v21  ;;  %v999_v13 = vsel %vm372_vm1, %v979_v33, %v998_v25 }
 0x1ba   : > { %v2144_v18 = vperm.slane %v1049_v50, %v1703_v15  ;;  %v1047_v42 = vperm.slane %v1039_v20, %v1703_v15  ;;  %1206 = vrot.lane.b32.xlu2 %v999_v13, %s1599_s27  ;;  %v1005_v53 = vsel %vm372_vm1, %v1004_v55, %v967_v47  ;;  %v996_v1 = vrot.slane %v979_v33, 4 }
 0x1bb   : > { %v1037_v35 = vsel %vm372_vm1, %v1036_v12, %v2009_v16  ;;  %1212 = vrot.lane.b32.xlu1 %v1005_v53, %s1599_s27  ;;  %v2154_v56 = vperm.slane %v975_v31, %v1767_v4  ;;  %v1013_v16 = vsel %vm372_vm1, %v1012_v28, %v2006_v14  ;;  %v1096_v33 = vrot.slane %v1059_v3, 4 }
 0x1bc   : > { %v1084_v2 = vrot.slane %v2144_v18, 4  ;;  %v2158_v21 = vperm.slane %v1037_v35, %v1703_v15  ;;  %v1098_v11 = vrot.slane %v1047_v42, 4  ;;  %v997_v24 = vsel %vm372_vm1, %v996_v1, %v955_v22 }
 0x1bd   : > { %1204 = vrot.lane.b32.xlu0 %v997_v24, %s1599_s27  ;;  %v1000_v49 = vrot.slane %v2154_v56, 4  ;;  %v2174_v8 = vperm.slane %v951_v29, %v1767_v4  ;;  %v1019_v14 = vperm.slane %v1013_v16, %v1703_v15  ;;  %v1074_v59 = vrot.slane %v1023_v27, 4 }
 0x1be   : > { %v865_v37 = vpop.permute.xlu1 %864  ;;  %v1085_v38 = vsel %vm372_vm1, %v1084_v2, %v2158_v21  ;;  %v1099_v61 = vsel %vm372_vm1, %v1059_v3, %v1098_v11  ;;  %v1097_v20 = vsel %vm372_vm1, %v1096_v33, %v1047_v42  ;;  %v1006_v13 = vrot.slane %v967_v47, 4  ;;  %v1297_v33 = vld [vmem:[%s2377_s2 + $0x58] sm:$0xff] }
 0x1bf   : > { %v1025_v25 = vsel %vm372_vm1, %v1024_v19, %v865_v37  ;;  %v1026_v22 = vrot.slane %v865_v37, 4  ;;  %v1091_v28 = vperm.slane %v1085_v38, %v1767_v4  ;;  %v1001_v12 = vsel %vm372_vm1, %v1000_v49, %v2174_v8  ;;  %1540 = vmatpush.msrb.mxu2 %v1297_v33  ;;  %1539 = vmatpush.msrb.mxu1 %v1297_v33 }
 0x1c0   : > { %v1031_v55 = vperm.slane %v1025_v25, %v1703_v15  ;;  %v2189_v35 = vperm.slane %v1099_v61, %v1767_v4  ;;  %v1007_v3 = vsel %vm372_vm1, %v991_v7, %v1006_v13  ;;  %v1103_v11 = vperm.slane %v1097_v20, %v1767_v4  ;;  %v1296_v25 = vld [vmem:[%s2377_s2 + $0x50] sm:$0xff]  ;;  %1355 = vmatpush.msrb.mxu0 %v1297_v33 }
 0x1c1   : > { %v1027_v58 = vsel %vm372_vm1, %v2068_v63, %v1026_v22  ;;  %v1108_v1 = vrot.slane %v1091_v28, 4  ;;  %v986_v24 = vrot.slane %v2112_v40, 4  ;;  %v1086_v38 = vrot.slane %v2158_v21, 4  ;;  %v1295_v21 = vld [vmem:[%s2377_s2 + $0x48] sm:$0xff]  ;;  %1543 = vmatpush.msrb.mxu2 %v1296_v25  ;;  %1542 = vmatpush.msrb.mxu1 %v1296_v25 }
 0x1c2   : > { %v1035_v31 = vperm.slane %v1027_v58, %v1703_v15  ;;  %v1060_v50 = vrot.slane %v1031_v55, 4  ;;  %v1120_v7 = vrot.slane %v2189_v35, 4  ;;  %v1116_v16 = vrot.slane %v1103_v11, 4  ;;  %1356 = vmatpush.msrb.mxu0 %v1296_v25  ;;  %1541 = vmatpush.msrb.mxu3 %v1297_v33 }
 0x1c3   : > { %1208 = vrot.lane.b32.xlu1 %v1001_v12, %s1599_s27  ;;  %v1062_v61 = vrot.slane %v1019_v14, 4  ;;  %1546 = vmatpush.msrb.mxu2 %v1295_v21 }
 0x1c4   : > { %v1072_v36 = vrot.slane %v1035_v31, 4  ;;  %v1061_v53 = vsel %vm372_vm1, %v1060_v50, %v1019_v14  ;;  %v1075_v63 = vsel %vm372_vm1, %v1035_v31, %v1074_v59  ;;  %v1087_v50 = vsel %vm372_vm1, %v2144_v18, %v1086_v38  ;;  %1545 = vmatpush.msrb.mxu1 %v1295_v21  ;;  %1357 = vmatpush.msrb.mxu0 %v1295_v21 }
 0x1c5   : > { %v1067_v15 = vperm.slane %v1061_v53, %v1767_v4  ;;  %1214 = vrot.lane.b32.xlu0 %v1007_v3, %s1599_s27  ;;  %v2195_v42 = vperm.slane %v1075_v63, %v1767_v4  ;;  %v1063_v14 = vsel %vm372_vm1, %v1031_v55, %v1062_v61  ;;  %1544 = vmatpush.msrb.mxu3 %v1296_v25  ;;  %v1002_v3 = vrot.slane %v2174_v8, 4  ;;  %v1289_v8 = vld [vmem:[%s2377_s2 + $0x18] sm:$0xff] }
 0x1c6   : > { %v1073_v47 = vsel %vm372_vm1, %v1072_v36, %v1023_v27  ;;  %v987_v27 = vsel %vm372_vm1, %v2098_v6, %v986_v24  ;;  %v962_v6 = vrot.slane %v2115_v30, 4  ;;  %v1294_v30 = vld [vmem:[%s2377_s2 + $0x40] sm:$0xff]  ;;  %v1071_v20 = vperm.slane %v1063_v14, %v1767_v4 }
 0x1c7   : > { %v1109_v2 = vsel %vm372_vm1, %v1108_v1, %v1067_v15  ;;  %v1079_v19 = vperm.slane %v1073_v47, %v1767_v4  ;;  %v1121_v29 = vsel %vm372_vm1, %v1120_v7, %v2195_v42  ;;  %v1110_v40 = vrot.slane %v1067_v15, 4  ;;  %1549 = vmatpush.msrb.mxu2 %v1294_v30  ;;  %1548 = vmatpush.msrb.mxu1 %v1294_v30  ;;  %v1288_v1 = vld [vmem:[%s2377_s2 + $0x10] sm:$0xff]  ;;  %v1286_v47 = vld [vmem:[%s2377_s2] sm:$0xff] }
 0x1c8   : > { %1220 = vrot.lane.b32.xlu2 %v1109_v2, %s1599_s27  ;;  %v995_v58 = vperm.slane %v987_v27, %v1767_v4  ;;  %v963_v31 = vsel %vm372_vm1, %v2092_v5, %v962_v6  ;;  %v1095_v5 = vperm.slane %v1087_v50, %v1767_v4  ;;  %1358 = vmatpush.msrb.mxu0 %v1294_v30  ;;  %v1114_v13 = vrot.slane %v1071_v20, 4  ;;  %v1141_v2 = vpop.permute.xlu1 %1140 }
 0x1c9   : > { %v1118_v37 = vrot.slane %v1079_v19, 4  ;;  %v1117_v49 = vsel %vm372_vm1, %v1116_v16, %v1079_v19  ;;  %v1111_v59 = vsel %vm372_vm1, %v1091_v28, %v1110_v40  ;;  %v971_v28 = vperm.slane %v963_v31, %v1767_v4  ;;  %1547 = vmatpush.msrb.mxu3 %v1295_v21  ;;  %v1145_v19 = vpop.permute.xlu2 %1144 }
 0x1ca   : > { %v1008_v12 = vrot.slane %v995_v58, 4  ;;  %v1112_v55 = vrot.slane %v1095_v5, 4  ;;  %v1122_v4 = vrot.slane %v2195_v42, 4  ;;  %v1003_v15 = vsel %vm372_vm1, %v2154_v56, %v1002_v3  ;;  %v1290_v56 = vld [vmem:[%s2377_s2 + $0x20] sm:$0xff]  ;;  %v1287_v42 = vld [vmem:[%s2377_s2 + $0x8] sm:$0xff] }
 0x1cb   : > { %1232 = vrot.lane.b32.xlu1 %v1121_v29, %s1599_s27  ;;  %v1119_v22 = vsel %vm372_vm1, %v1103_v11, %v1118_v37  ;;  %1550 = vmatpush.msrb.mxu3 %v1294_v30  ;;  %v1167_v11 = vpop.permute.xlu0 %1166  ;;  %v1257_v38 = vsel %vm1252_vm2, %v1856_v44, %v2080_v17  ;;  %v1253_v25 = vsel %vm1252_vm2, %v1847_v39, %v1141_v2 }
 0x1cc   : > { %v1009_v18 = vsel %vm372_vm1, %v1008_v12, %v971_v28  ;;  %v1113_v36 = vsel %vm372_vm1, %v1112_v55, %v1071_v20  ;;  %v1123_v53 = vsel %vm372_vm1, %v2189_v35, %v1122_v4  ;;  %v1291_v35 = vld [vmem:[%s2377_s2 + $0x28] sm:$0xff]  ;;  %v1255_v50 = vsel %vm1252_vm2, %v1840_v32, %v1145_v19 }
 0x1cd   : > { %1228 = vrot.lane.b32.xlu0 %v1117_v49, %s1599_s27 }
 0x1d0   : > { %1230 = vrot.lane.b32.xlu2 %v1119_v22, %s1599_s27  ;;  %v1151_v7 = vpop.permute.xlu1 %1150 }
 0x1d1   : > { %v1258_v44 = vsel %vm1252_vm2, %v1850_v41, %v1151_v7 }
 0x1d3   : > { %1222 = vrot.lane.b32.xlu1 %v1111_v59, %s1599_s27  ;;  %v1143_v29 = vpop.permute.xlu0 %1142 }
 0x1d4   : > { %v1254_v21 = vsel %vm1252_vm2, %v1843_v34, %v1143_v29 }
 0x1d5   : > { %1162 = vrot.lane.b32.xlu0 %v1996_v9, %s1597_s25  ;;  %v1115_v9 = vsel %vm372_vm1, %v1095_v5, %v1114_v13 }
 0x1d8   : > { %1216 = vrot.lane.b32.xlu2 %v1009_v18, %s1599_s27  ;;  %v1161_v27 = vpop.permute.xlu1 %1160 }
 0x1d9   : > { %v1263_v20 = vsel %vm1252_vm2, %v1798_v46, %v1161_v27 }
 0x1db   : > { %1170 = vrot.lane.b32.xlu1 %v1987_v26, %s1597_s25  ;;  %v1010_v26 = vrot.slane %v971_v28, 4  ;;  %v1153_v49 = vpop.permute.xlu0 %1152 }
 0x1dc   : > { %v1259_v34 = vsel %vm1252_vm2, %v1853_v43, %v1153_v49 }
 0x1dd   : > { %1224 = vrot.lane.b32.xlu0 %v1113_v36, %s1599_s27  ;;  %v1011_v63 = vsel %vm372_vm1, %v995_v58, %v1010_v26 }
 0x1e0   : > { %1226 = vrot.lane.b32.xlu2 %v1115_v9, %s1599_s27 }
 0x1e3   : > { %1146 = vrot.lane.b32.xlu1 %v1976_v54, %s1597_s25  ;;  %v1293_v54 = vld [vmem:[%s2377_s2 + $0x38] sm:$0xff] }
 0x1e4   : > { %1552 = vmatpush.msrb.mxu2 %v1293_v54  ;;  %1551 = vmatpush.msrb.mxu1 %v1293_v54 }
 0x1e5   : > { %1234 = vrot.lane.b32.xlu0 %v1123_v53, %s1599_s27  ;;  %1359 = vmatpush.msrb.mxu0 %v1293_v54 }
 0x1e6   : > { %1553 = vmatpush.msrb.mxu3 %v1293_v54 }
 0x1e8   : > { %1154 = vrot.lane.b32.xlu2 %v1991_v62, %s1597_s25  ;;  %v1292_v62 = vld [vmem:[%s2377_s2 + $0x30] sm:$0xff] }
 0x1e9   : > { %1555 = vmatpush.msrb.mxu2 %v1292_v62  ;;  %1554 = vmatpush.msrb.mxu1 %v1292_v62 }
 0x1ea   : > { %1360 = vmatpush.msrb.mxu0 %v1292_v62  ;;  %1556 = vmatpush.msrb.mxu3 %v1292_v62  ;;  %v1588_v62 = vld [vmem:[%s2378_s3] ss:$0 sm:$0xff] }
 0x1eb   : > { %1218 = vrot.lane.b32.xlu1 %v1011_v63, %s1599_s27  ;;  %1558 = vmatpush.msrb.mxu2 %v1291_v35 }
 0x1ec   : > { %1557 = vmatpush.msrb.mxu1 %v1291_v35  ;;  %1361 = vmatpush.msrb.mxu0 %v1291_v35 }
 0x1ed   : > { %1210 = vrot.lane.b32.xlu0 %v1003_v15, %s1599_s27  ;;  %1559 = vmatpush.msrb.mxu3 %v1291_v35 }
 0x1ee   : > { %1561 = vmatpush.msrb.mxu2 %v1290_v56  ;;  %1560 = vmatpush.msrb.mxu1 %v1290_v56 }
 0x1ef   : > { %1362 = vmatpush.msrb.mxu0 %v1290_v56  ;;  %1562 = vmatpush.msrb.mxu3 %v1290_v56 }
 0x1f0   : > { %1564 = vmatpush.msrb.mxu2 %v1289_v8  ;;  %1563 = vmatpush.msrb.mxu1 %v1289_v8 }
 0x1f1   : > { %1363 = vmatpush.msrb.mxu0 %v1289_v8  ;;  %1565 = vmatpush.msrb.mxu3 %v1289_v8 }
 0x1f2   : > { %1567 = vmatpush.msrb.mxu2 %v1288_v1  ;;  %1566 = vmatpush.msrb.mxu1 %v1288_v1 }
 0x1f3   : > { %1364 = vmatpush.msrb.mxu0 %v1288_v1  ;;  %1568 = vmatpush.msrb.mxu3 %v1288_v1 }
 0x1f4   : > { %1570 = vmatpush.msrb.mxu2 %v1287_v42  ;;  %1569 = vmatpush.msrb.mxu1 %v1287_v42 }
 0x1f5   : > { %1365 = vmatpush.msrb.mxu0 %v1287_v42  ;;  %1571 = vmatpush.msrb.mxu3 %v1287_v42 }
 0x1f6   : > { %1573 = vmatpush.msrb.mxu2 %v1286_v47  ;;  %1572 = vmatpush.msrb.mxu1 %v1286_v47 }
 0x1f7   : > { %1366 = vmatpush.msrb.mxu0 %v1286_v47  ;;  %1574 = vmatpush.msrb.mxu3 %v1286_v47 }
 0x214   : > { %v1207_v24 = vpop.permute.xlu2 %1206 }
 0x215   : > { %v1271_v61 = vsel %vm1269_vm4, %v1254_v21, %v1207_v24 }
 0x222   : > { %v1221_v16 = vpop.permute.xlu2 %1220 }
 0x223   : > { %v1278_v37 = vsel %vm1269_vm4, %v2078_v0, %v1221_v16 }
 0x224   : > { %1526 = vmatmul.msk.f32.vlgmr.msrb.gmra.mxu2 %vm1302_vm3, %v1278_v37 }
 0x22a   : > { %v1231_v0 = vpop.permute.xlu2 %1230 }
 0x22d   : > { %v1213_v40 = vpop.permute.xlu1 %1212 }
 0x22e   : > { %v1274_v33 = vsel %vm1269_vm4, %v1257_v38, %v1213_v40 }
 0x22f   : > { %1522 = vmatmul.msk.f32.vlgmr.msrb.gmra.mxu1 %vm1302_vm3, %v1274_v33  ;;  %v1205_v22 = vpop.permute.xlu0 %1204 }
 0x230   : > { %v1270_v58 = vsel %vm1269_vm4, %v1253_v25, %v1205_v22 }
 0x231   : > { %1518 = vmatmul.msk.f32.vlgmr.msrb.gmra.mxu0 %vm1302_vm3, %v1270_v58 }
 0x232   : > { %v1217_v31 = vpop.permute.xlu2 %1216 }
 0x233   : > { %v1276_v14 = vsel %vm1269_vm4, %v1259_v34, %v1217_v31 }
 0x235   : > { %v1209_v6 = vpop.permute.xlu1 %1208 }
 0x236   : > { %v1272_v12 = vsel %vm1269_vm4, %v1255_v50, %v1209_v6 }
 0x237   : > { %v1215_v17 = vpop.permute.xlu0 %1214 }
 0x238   : > { %v1275_v59 = vsel %vm1269_vm4, %v1258_v44, %v1215_v17 }
 0x239   : > { %1519 = vmatmul.msk.f32.gmra.mxu0 %vm1302_vm3, %v1271_v61  ;;  %1523 = vmatmul.msk.f32.gmra.mxu1 %vm1302_vm3, %v1275_v59 }
 0x23a   : > { %v1227_v55 = vpop.permute.xlu2 %1226 }
 0x23d   : > { %v1233_v39 = vpop.permute.xlu1 %1232 }
 0x23f   : > { %v1229_v30 = vpop.permute.xlu0 %1228 }
 0x240   : > { %v1282_v41 = vsel %vm1269_vm4, %v2074_v45, %v1229_v30  ;;  %v1266_v45 = vsel %vm1252_vm2, %v1807_v51, %v1167_v11 }
 0x241   : > { %1520 = vmatmul.msk.f32.gmra.mxu0 %vm1302_vm3, %v1272_v12  ;;  %1524 = vmatmul.msk.f32.gmra.mxu1 %vm1302_vm3, %v1276_v14  ;;  %v1283_v5 = vsel %vm1269_vm4, %v1266_v45, %v1231_v0 }
 0x242   : > { %1530 = vmatmul.msk.f32.vlgmr.msrb.gmra.mxu3 %vm1302_vm3, %v1282_v41  ;;  %v1155_v63 = vpop.permute.xlu2 %1154 }
 0x245   : > { %v1223_v28 = vpop.permute.xlu1 %1222 }
 0x246   : > { %v1279_v32 = vsel %vm1269_vm4, %v2102_v23, %v1223_v28  ;;  %v1284_v23 = vsel %vm1269_vm4, %v2130_v57, %v1233_v39  ;;  %v1260_v57 = vsel %vm1252_vm2, %v1862_v52, %v1155_v63 }
 0x247   : > { %1527 = vmatmul.msk.f32.gmra.mxu2 %vm1302_vm3, %v1279_v32  ;;  %v1163_v43 = vpop.permute.xlu0 %1162 }
 0x248   : > { %v1264_v9 = vsel %vm1252_vm2, %v1819_v60, %v1163_v43 }
 0x249   : > { %v1281_v53 = vsel %vm1269_vm4, %v1264_v9, %v1227_v55 }
 0x24a   : > { %1531 = vmatmul.msk.f32.gmra.mxu3 %vm1302_vm3, %v1283_v5 }
 0x24d   : > { %v1171_v18 = vpop.permute.xlu1 %1170 }
 0x24e   : > { %v1268_v4 = vsel %vm1252_vm2, %v1822_v10, %v1171_v18 }
 0x24f   : > { %v1225_v13 = vpop.permute.xlu0 %1224 }
 0x250   : > { %v1280_v36 = vsel %vm1269_vm4, %v1263_v20, %v1225_v13 }
 0x251   : > { %1528 = vmatmul.msk.f32.gmra.mxu2 %vm1302_vm3, %v1280_v36 }
 0x252   : > { %1532 = vmatmul.msk.f32.gmra.mxu3 %vm1302_vm3, %v1284_v23 }
 0x255   : > { %v1147_v51 = vpop.permute.xlu1 %1146 }
 0x256   : > { %v1256_v10 = vsel %vm1252_vm2, %v1859_v48, %v1147_v51 }
 0x257   : > { %v1235_v46 = vpop.permute.xlu0 %1234 }
 0x258   : > { %v1285_v26 = vsel %vm1269_vm4, %v1268_v4, %v1235_v46 }
 0x259   : > { %1529 = vmatmul.msk.f32.gmra.mxu2 %vm1302_vm3, %v1281_v53 }
 0x25a   : > { %1533 = vmatmul.msk.f32.gmra.mxu3 %vm1302_vm3, %v1285_v26 }
 0x25d   : > { %v1219_v3 = vpop.permute.xlu1 %1218 }
 0x25e   : > { %v1277_v60 = vsel %vm1269_vm4, %v1260_v57, %v1219_v3 }
 0x25f   : > { %1525 = vmatmul.msk.f32.gmra.mxu1 %vm1302_vm3, %v1277_v60  ;;  %v1211_v15 = vpop.permute.xlu0 %1210 }
 0x260   : > { %v1273_v54 = vsel %vm1269_vm4, %v1256_v10, %v1211_v15 }
 0x261   : > { %1521 = vmatmul.msk.f32.gmra.mxu0 %vm1302_vm3, %v1273_v54 }
 0x2a7   : > { %v1392_v48 = vpop.f32.mrf.mxu2 }
 0x2a8   : > { %v1393_v52 = vadd.f32 %v1588_v62, %v1392_v48 }
 0x2aa   : > { %1424 = vst [vmem:[%s2354_s7 + $0x40] sm:$0xff] %v1393_v52 }
 0x2ac   : > { %v1380_v35 = vpop.f32.mrf.mxu1 }
 0x2ad   : > { %v1381_v56 = vadd.f32 %v1588_v62, %v1380_v35 }
 0x2ae   : > { %v1368_v8 = vpop.f32.mrf.mxu0 }
 0x2af   : > { %1420 = vst [vmem:[%s2354_s7 + $0x20] sm:$0xff] %v1381_v56  ;;  %v1369_v1 = vadd.f32 %v1588_v62, %v1368_v8 }
 0x2b1   : > { %1416 = vst [vmem:[%s2354_s7] sm:$0xff] %v1369_v1 }
 0x2b6   : > { %v1371_v42 = vpop.f32.mrf.mxu0  ;;  %v1383_v47 = vpop.f32.mrf.mxu1 }
 0x2b7   : > { %v1372_v2 = vadd.f32 %v1588_v62, %v1371_v42  ;;  %v1384_v19 = vadd.f32 %v1588_v62, %v1383_v47 }
 0x2b9   : > { %1417 = vst [vmem:[%s2354_s7 + $0x8] sm:$0xff] %v1372_v2 }
 0x2ba   : > { %1421 = vst [vmem:[%s2354_s7 + $0x28] sm:$0xff] %v1384_v19 }
 0x2be   : > { %v1374_v11 = vpop.f32.mrf.mxu0  ;;  %v1386_v24 = vpop.f32.mrf.mxu1 }
 0x2bf   : > { %v1375_v7 = vadd.f32 %v1588_v62, %v1374_v11  ;;  %v1387_v29 = vadd.f32 %v1588_v62, %v1386_v24 }
 0x2c1   : > { %1418 = vst [vmem:[%s2354_s7 + $0x10] sm:$0xff] %v1375_v7 }
 0x2c2   : > { %1422 = vst [vmem:[%s2354_s7 + $0x30] sm:$0xff] %v1387_v29 }
 0x2c5   : > { %v1404_v16 = vpop.f32.mrf.mxu3 }
 0x2c6   : > { %v1405_v37 = vadd.f32 %v1588_v62, %v1404_v16 }
 0x2c8   : > { %1428 = vst [vmem:[%s2354_s7 + $0x60] sm:$0xff] %v1405_v37 }
 0x2ca   : > { %v1395_v27 = vpop.f32.mrf.mxu2 }
 0x2cb   : > { %v1396_v49 = vadd.f32 %v1588_v62, %v1395_v27 }
 0x2cd   : > { %1425 = vst [vmem:[%s2354_s7 + $0x48] sm:$0xff] %v1396_v49  ;;  %v1407_v38 = vpop.f32.mrf.mxu3 }
 0x2ce   : > { %v1408_v40 = vadd.f32 %v1588_v62, %v1407_v38 }
 0x2d0   : > { %1429 = vst [vmem:[%s2354_s7 + $0x68] sm:$0xff] %v1408_v40 }
 0x2d4   : > { %v1398_v33 = vpop.f32.mrf.mxu2 }
 0x2d5   : > { %v1399_v25 = vadd.f32 %v1588_v62, %v1398_v33  ;;  %v1410_v22 = vpop.f32.mrf.mxu3 }
 0x2d6   : > { %v1411_v58 = vadd.f32 %v1588_v62, %v1410_v22 }
 0x2d7   : > { %1426 = vst [vmem:[%s2354_s7 + $0x50] sm:$0xff] %v1399_v25 }
 0x2d8   : > { %1430 = vst [vmem:[%s2354_s7 + $0x70] sm:$0xff] %v1411_v58 }
 0x2dc   : > { %v1389_v0 = vpop.f32.mrf.mxu1  ;;  %v1401_v21 = vpop.f32.mrf.mxu2 }
 0x2dd   : > { %v1390_v6 = vadd.f32 %v1588_v62, %v1389_v0  ;;  %v1402_v44 = vadd.f32 %v1588_v62, %v1401_v21  ;;  %v1413_v17 = vpop.f32.mrf.mxu3 }
 0x2de   : > { %v1414_v61 = vadd.f32 %v1588_v62, %v1413_v17  ;;  %v1377_v59 = vpop.f32.mrf.mxu0 }
 0x2df   : > { %1423 = vst [vmem:[%s2354_s7 + $0x38] sm:$0xff] %v1390_v6  ;;  %v1378_v39 = vadd.f32 %v1588_v62, %v1377_v59 }
 0x2e0   : > { %1427 = vst [vmem:[%s2354_s7 + $0x58] sm:$0xff] %v1402_v44 }
 0x2e1   : > { %1431 = vst [vmem:[%s2354_s7 + $0x78] sm:$0xff] %v1414_v61 }
 0x2e2   : > { %1419 = vst [vmem:[%s2354_s7 + $0x18] sm:$0xff] %v1378_v39 }
 0x2e3 PF: > { %s14_s15 = sadd.s32 1, %s1595_s15  }
 0x2e4   : > { %p11_p4 = scmp.ge.s32.totalorder %s14_s15, 4  }
 0x2e6   :  { %13 = sbr.rel (!%p11_p4) target bundleno = 1 (0x1), region = 69 }

</bundles_post_ra>
